<compile_context>
chip_gen: v5e
topology: v5e:2x2
jax: 0.10.0
libtpu: 0.0.40
codegen_flags: <defaults>
</compile_context>

<pallas_src>
import functools

import jax
import jax.numpy as jnp
from jax.experimental import pallas as pl
from jax.experimental.pallas import tpu as pltpu

LAYER_DIMS = [16, 1024, 512, 256, 128, 64, 32, 16, 16, 8]
N_LAYERS = len(LAYER_DIMS) - 1
LANES = 128
IN_DIM = LAYER_DIMS[0]
OUT_DIM = LAYER_DIMS[-1]
# Every activation (input, hidden, logits) is lane-padded to >= 128.
PADDED = [max(d, LANES) for d in LAYER_DIMS]
IN_PAD, OUT_PAD = PADDED[0], PADDED[-1]

MIN_GRID_STEPS = 2      # keep >= 2 grid steps so v7x's 2 TCs both get work
MAX_TILE_B = 2048       # VMEM-safe tile cap on 64 MiB/TC parts (v7x)


def _round_up(n, m):
    return ((n + m - 1) // m) * m


@functools.lru_cache(maxsize=1)
def _vmem_limit_bytes():
    """Per-generation scoped VMEM budget with headroom (<=48 MiB on 64 MiB
    chips like v7x, 64 MiB on 128 MiB chips like v5e/v6e)."""
    cap = 128 * 1024 * 1024
    try:
        cap = int(pltpu.get_tpu_info().vmem_capacity_bytes)
    except Exception:
        pass
    return min(64 * 1024 * 1024, (cap * 3) // 4)


def mlp_kernel(x_ref, *refs):
    """refs = (W1, W2, b2, W3, b3, ..., W9, b9, o_ref).

    x_ref: (tb, 128) f32, real features in lanes [:16], lane 16 == 1.0
    W_i  : bf16 (in_pad, out_pad);  b_i: f32 (1, out_pad)
    o_ref: (tb, 128) f32 softmax probabilities, lanes >= 8 are exact zeros.
    """
    o_ref = refs[-1]
    params = refs[:-1]

    # Layer 1: bias folded into W1 via the ones-lane of the padded input.
    h = jnp.maximum(
        jnp.dot(x_ref[...].astype(jnp.bfloat16), params[0][...],
                preferred_element_type=jnp.float32),
        0.0,
    ).astype(jnp.bfloat16)

    # Layers 2..8: fused bias-add + ReLU + bf16 cast epilogue.
    for i in range(1, N_LAYERS - 1):
        w = params[2 * i - 1][...]
        b = params[2 * i][...]
        h = jnp.maximum(
            jnp.dot(h, w, preferred_element_type=jnp.float32) + b,
            0.0,
        ).astype(jnp.bfloat16)

    # Layer 9: f32 logits, lane-padded to 128 (padding lanes are exactly 0).
    logits = (jnp.dot(h, params[-2][...], preferred_element_type=jnp.float32)
              + params[-1][...])

    # Masked, numerically stable softmax over the OUT_DIM real lanes; padding
    # lanes are written as zeros so the (tb, 128) store stays lane-dense.
    lane = jax.lax.broadcasted_iota(jnp.int32, logits.shape, 1)
    valid = lane < OUT_DIM
    masked = jnp.where(valid, logits, jnp.float32(-1e30))
    m = jnp.max(masked, axis=-1, keepdims=True)
    e = jnp.where(valid, jnp.exp(masked - m), 0.0)
    s = jnp.sum(e, axis=-1, keepdims=True)
    o_ref[...] = (e * pl.reciprocal(s, approx=False)).astype(o_ref.dtype)


def init_params(key):
    """PyTorch-style init: U(-1/sqrt(fan_in), 1/sqrt(fan_in)), (out, in) layout."""
    params = []
    for i in range(N_LAYERS):
        fan_in, fan_out = LAYER_DIMS[i], LAYER_DIMS[i + 1]
        key, kw, kb = jax.random.split(key, 3)
        bound = 1.0 / float(fan_in) ** 0.5
        w_pt = jax.random.uniform(kw, (fan_out, fan_in), jnp.float32,
                                  minval=-bound, maxval=bound)
        b = jax.random.uniform(kb, (fan_out,), jnp.float32,
                               minval=-bound, maxval=bound)
        params.append((w_pt, b))
    return params


def prepare_params(params):
    """Transpose to (in, out), zero-pad to 128-lane multiples, cast weights to
    bf16 (biases stay f32).  Layer-1 bias is folded into W1 row IN_DIM, which
    pairs with the ones-lane of the padded input."""
    flat = []
    for i, (w_pt, b) in enumerate(params):
        in_d, out_d = LAYER_DIMS[i], LAYER_DIMS[i + 1]
        in_p, out_p = PADDED[i], PADDED[i + 1]
        w = jnp.zeros((in_p, out_p), jnp.float32).at[:in_d, :out_d].set(w_pt.T)
        if i == 0:
            w = w.at[in_d, :out_d].set(b)          # bias -> ones-lane row
            flat.append(w.astype(jnp.bfloat16))
        else:
            bb = jnp.zeros((1, out_p), jnp.float32).at[:, :out_d].set(b)
            flat.append(w.astype(jnp.bfloat16))
            flat.append(bb)
    return flat


@functools.partial(jax.jit, static_argnames=("tile_b",))
def mlp_forward(x, flat_params, tile_b=1024):
    B = x.shape[0]

    # Batch tile: large enough to amortize per-step overhead, small enough to
    # keep >= MIN_GRID_STEPS steps (both TCs busy on v7x) and fit VMEM.
    tb = min(tile_b, MAX_TILE_B,
             max(8, _round_up(pl.cdiv(B, MIN_GRID_STEPS), 8)))
    Bp = _round_up(B, tb)

    # Pad input to (Bp, 128): features in lanes [:16], ones-lane at lane 16
    # (folds the layer-1 bias into the matmul); remaining lanes zero.
    xp = jnp.zeros((Bp, IN_PAD), jnp.float32)
    xp = xp.at[:B, :IN_DIM].set(x.astype(jnp.float32))
    xp = xp.at[:, IN_DIM].set(1.0)

    in_specs = [pl.BlockSpec((tb, IN_PAD), lambda i: (i, 0))]
    for p in flat_params:
        # Constant index_map: parameters stay resident in VMEM across steps.
        in_specs.append(pl.BlockSpec(p.shape, lambda i: (0, 0)))

    flops = Bp * sum(2 * PADDED[i] * PADDED[i + 1] for i in range(N_LAYERS))
    param_bytes = sum(p.size * p.dtype.itemsize for p in flat_params)
    cost = pl.CostEstimate(
        flops=flops,
        transcendentals=Bp * OUT_PAD,
        bytes_accessed=Bp * (IN_PAD * 4 + OUT_PAD * 4) + param_bytes,
    )

    out = pl.pallas_call(
        mlp_kernel,
        out_shape=jax.ShapeDtypeStruct((Bp, OUT_PAD), jnp.float32),
        grid=(Bp // tb,),
        in_specs=in_specs,
        out_specs=pl.BlockSpec((tb, OUT_PAD), lambda i: (i, 0)),
        compiler_params=pltpu.CompilerParams(
            dimension_semantics=("parallel",),
            vmem_limit_bytes=_vmem_limit_bytes(),
        ),
        cost_estimate=cost,
    )(xp, *flat_params)

    return out[:B, :OUT_DIM]


def mlp_reference(x, flat_params):
    """Pure-JAX mirror of the kernel math (bf16 dots, f32 accumulation)."""
    B = x.shape[0]
    xp = jnp.zeros((B, IN_PAD), jnp.float32).at[:, :IN_DIM].set(x)
    xp = xp.at[:, IN_DIM].set(1.0)
    h = jnp.maximum(
        jnp.dot(xp.astype(jnp.bfloat16), flat_params[0],
                preferred_element_type=jnp.float32), 0.0).astype(jnp.bfloat16)
    for i in range(1, N_LAYERS - 1):
        w = flat_params[2 * i - 1]
        b = flat_params[2 * i]
        h = jnp.maximum(
            jnp.dot(h, w, preferred_element_type=jnp.float32) + b,
            0.0).astype(jnp.bfloat16)
    logits = (jnp.dot(h, flat_params[-2], preferred_element_type=jnp.float32)
              + flat_params[-1])[:, :OUT_DIM]
    m = jnp.max(logits, axis=-1, keepdims=True)
    e = jnp.exp(logits - m)
    return e / jnp.sum(e, axis=-1, keepdims=True)


if __name__ == "__main__":
    key = jax.random.PRNGKey(0)
    kp, kx = jax.random.split(key)
    flat_params = prepare_params(init_params(kp))

    B = 8
    x = jax.random.normal(kx, (B, IN_DIM), dtype=jnp.float32)

    out = jax.block_until_ready(mlp_forward(x, flat_params))

    # sanity: shape, softmax rows sum to ~1, matches pure-JAX reference
    assert out.shape == (B, OUT_DIM)
    row_sums = jnp.sum(out, axis=1)
    assert bool(jnp.all(jnp.abs(row_sums - 1.0) < 2e-3))
    ref = mlp_reference(x, flat_params)
    assert bool(jnp.max(jnp.abs(out - ref)) < 5e-3)

    print("KERNEL_OK")
</pallas_src>

<mosaic_0001>
module attributes {stable_mosaic.version = 11 : i64} {
  func.func @mlp_kernel(%arg0: i32, %arg1: memref<8x128xf32, #tpu.memory_space<vmem>>, %arg2: memref<128x1024xbf16, #tpu.memory_space<vmem>>, %arg3: memref<1024x512xbf16, #tpu.memory_space<vmem>>, %arg4: memref<1x512xf32, #tpu.memory_space<vmem>>, %arg5: memref<512x256xbf16, #tpu.memory_space<vmem>>, %arg6: memref<1x256xf32, #tpu.memory_space<vmem>>, %arg7: memref<256x128xbf16, #tpu.memory_space<vmem>>, %arg8: memref<1x128xf32, #tpu.memory_space<vmem>>, %arg9: memref<128x128xbf16, #tpu.memory_space<vmem>>, %arg10: memref<1x128xf32, #tpu.memory_space<vmem>>, %arg11: memref<128x128xbf16, #tpu.memory_space<vmem>>, %arg12: memref<1x128xf32, #tpu.memory_space<vmem>>, %arg13: memref<128x128xbf16, #tpu.memory_space<vmem>>, %arg14: memref<1x128xf32, #tpu.memory_space<vmem>>, %arg15: memref<128x128xbf16, #tpu.memory_space<vmem>>, %arg16: memref<1x128xf32, #tpu.memory_space<vmem>>, %arg17: memref<128x128xbf16, #tpu.memory_space<vmem>>, %arg18: memref<1x128xf32, #tpu.memory_space<vmem>>, %arg19: memref<8x128xf32, #tpu.memory_space<vmem>>) attributes {dimension_semantics = [#tpu.dimension_semantics<parallel>], iteration_bounds = array<i64: 1>, scalar_prefetch = 0 : i64, scratch_operands = 0 : i64, tpu.core_type = #tpu.core_type<tc>, window_params = [{transform_indices = @transform_0, window_bounds = array<i64: 8, 128>}, {pipeline_mode = #tpu.pipeline_mode<synchronous>, transform_indices = @transform_1, window_bounds = array<i64: 128, 1024>}, {pipeline_mode = #tpu.pipeline_mode<synchronous>, transform_indices = @transform_2, window_bounds = array<i64: 1024, 512>}, {pipeline_mode = #tpu.pipeline_mode<synchronous>, transform_indices = @transform_3, window_bounds = array<i64: 1, 512>}, {pipeline_mode = #tpu.pipeline_mode<synchronous>, transform_indices = @transform_4, window_bounds = array<i64: 512, 256>}, {pipeline_mode = #tpu.pipeline_mode<synchronous>, transform_indices = @transform_5, window_bounds = array<i64: 1, 256>}, {pipeline_mode = #tpu.pipeline_mode<synchronous>, transform_indices = @transform_6, window_bounds = array<i64: 256, 128>}, {pipeline_mode = #tpu.pipeline_mode<synchronous>, transform_indices = @transform_7, window_bounds = array<i64: 1, 128>}, {pipeline_mode = #tpu.pipeline_mode<synchronous>, transform_indices = @transform_8, window_bounds = array<i64: 128, 128>}, {pipeline_mode = #tpu.pipeline_mode<synchronous>, transform_indices = @transform_9, window_bounds = array<i64: 1, 128>}, {pipeline_mode = #tpu.pipeline_mode<synchronous>, transform_indices = @transform_10, window_bounds = array<i64: 128, 128>}, {pipeline_mode = #tpu.pipeline_mode<synchronous>, transform_indices = @transform_11, window_bounds = array<i64: 1, 128>}, {pipeline_mode = #tpu.pipeline_mode<synchronous>, transform_indices = @transform_12, window_bounds = array<i64: 128, 128>}, {pipeline_mode = #tpu.pipeline_mode<synchronous>, transform_indices = @transform_13, window_bounds = array<i64: 1, 128>}, {pipeline_mode = #tpu.pipeline_mode<synchronous>, transform_indices = @transform_14, window_bounds = array<i64: 128, 128>}, {pipeline_mode = #tpu.pipeline_mode<synchronous>, transform_indices = @transform_15, window_bounds = array<i64: 1, 128>}, {pipeline_mode = #tpu.pipeline_mode<synchronous>, transform_indices = @transform_16, window_bounds = array<i64: 128, 128>}, {pipeline_mode = #tpu.pipeline_mode<synchronous>, transform_indices = @transform_17, window_bounds = array<i64: 1, 128>}, {transform_indices = @transform_18, window_bounds = array<i64: 8, 128>}]} {
    %c0 = arith.constant 0 : index
    %c0_0 = arith.constant 0 : index
    %0 = vector.load %arg1[%c0, %c0_0] : memref<8x128xf32, #tpu.memory_space<vmem>>, vector<8x128xf32>
    %1 = arith.truncf %0 : vector<8x128xf32> to vector<8x128xbf16>
    %c0_1 = arith.constant 0 : index
    %c0_2 = arith.constant 0 : index
    %2 = vector.load %arg2[%c0_1, %c0_2] : memref<128x1024xbf16, #tpu.memory_space<vmem>>, vector<128x1024xbf16>
    %cst = arith.constant dense<0.000000e+00> : vector<8x1024xf32>
    %3 = tpu.matmul %1, %2, %cst {dimension_numbers = #tpu.dot_dimension_numbers<[1], [0], [0], [1], [0, 0, 1, 1], [], []>} : vector<8x128xbf16>, vector<128x1024xbf16>, vector<8x1024xf32> -> vector<8x1024xf32>
    %cst_3 = arith.constant 0.000000e+00 : f32
    %4 = vector.broadcast %cst_3 : f32 to vector<8x1024xf32>
    %5 = arith.maximumf %3, %4 : vector<8x1024xf32>
    %6 = arith.truncf %5 : vector<8x1024xf32> to vector<8x1024xbf16>
    %c0_4 = arith.constant 0 : index
    %c0_5 = arith.constant 0 : index
    %7 = vector.load %arg3[%c0_4, %c0_5] : memref<1024x512xbf16, #tpu.memory_space<vmem>>, vector<1024x512xbf16>
    %c0_6 = arith.constant 0 : index
    %c0_7 = arith.constant 0 : index
    %8 = vector.load %arg4[%c0_6, %c0_7] : memref<1x512xf32, #tpu.memory_space<vmem>>, vector<1x512xf32>
    %cst_8 = arith.constant dense<0.000000e+00> : vector<8x512xf32>
    %9 = tpu.matmul %6, %7, %cst_8 {dimension_numbers = #tpu.dot_dimension_numbers<[1], [0], [0], [1], [0, 0, 1, 1], [], []>} : vector<8x1024xbf16>, vector<1024x512xbf16>, vector<8x512xf32> -> vector<8x512xf32>
    %10 = vector.broadcast %8 : vector<1x512xf32> to vector<8x512xf32>
    %11 = arith.addf %9, %10 : vector<8x512xf32>
    %cst_9 = arith.constant 0.000000e+00 : f32
    %12 = vector.broadcast %cst_9 : f32 to vector<8x512xf32>
    %13 = arith.maximumf %11, %12 : vector<8x512xf32>
    %14 = arith.truncf %13 : vector<8x512xf32> to vector<8x512xbf16>
    %c0_10 = arith.constant 0 : index
    %c0_11 = arith.constant 0 : index
    %15 = vector.load %arg5[%c0_10, %c0_11] : memref<512x256xbf16, #tpu.memory_space<vmem>>, vector<512x256xbf16>
    %c0_12 = arith.constant 0 : index
    %c0_13 = arith.constant 0 : index
    %16 = vector.load %arg6[%c0_12, %c0_13] : memref<1x256xf32, #tpu.memory_space<vmem>>, vector<1x256xf32>
    %cst_14 = arith.constant dense<0.000000e+00> : vector<8x256xf32>
    %17 = tpu.matmul %14, %15, %cst_14 {dimension_numbers = #tpu.dot_dimension_numbers<[1], [0], [0], [1], [0, 0, 1, 1], [], []>} : vector<8x512xbf16>, vector<512x256xbf16>, vector<8x256xf32> -> vector<8x256xf32>
    %18 = vector.broadcast %16 : vector<1x256xf32> to vector<8x256xf32>
    %19 = arith.addf %17, %18 : vector<8x256xf32>
    %cst_15 = arith.constant 0.000000e+00 : f32
    %20 = vector.broadcast %cst_15 : f32 to vector<8x256xf32>
    %21 = arith.maximumf %19, %20 : vector<8x256xf32>
    %22 = arith.truncf %21 : vector<8x256xf32> to vector<8x256xbf16>
    %c0_16 = arith.constant 0 : index
    %c0_17 = arith.constant 0 : index
    %23 = vector.load %arg7[%c0_16, %c0_17] : memref<256x128xbf16, #tpu.memory_space<vmem>>, vector<256x128xbf16>
    %c0_18 = arith.constant 0 : index
    %c0_19 = arith.constant 0 : index
    %24 = vector.load %arg8[%c0_18, %c0_19] : memref<1x128xf32, #tpu.memory_space<vmem>>, vector<1x128xf32>
    %cst_20 = arith.constant dense<0.000000e+00> : vector<8x128xf32>
    %25 = tpu.matmul %22, %23, %cst_20 {dimension_numbers = #tpu.dot_dimension_numbers<[1], [0], [0], [1], [0, 0, 1, 1], [], []>} : vector<8x256xbf16>, vector<256x128xbf16>, vector<8x128xf32> -> vector<8x128xf32>
    %26 = vector.broadcast %24 : vector<1x128xf32> to vector<8x128xf32>
    %27 = arith.addf %25, %26 : vector<8x128xf32>
    %cst_21 = arith.constant 0.000000e+00 : f32
    %28 = vector.broadcast %cst_21 : f32 to vector<8x128xf32>
    %29 = arith.maximumf %27, %28 : vector<8x128xf32>
    %30 = arith.truncf %29 : vector<8x128xf32> to vector<8x128xbf16>
    %c0_22 = arith.constant 0 : index
    %c0_23 = arith.constant 0 : index
    %31 = vector.load %arg9[%c0_22, %c0_23] : memref<128x128xbf16, #tpu.memory_space<vmem>>, vector<128x128xbf16>
    %c0_24 = arith.constant 0 : index
    %c0_25 = arith.constant 0 : index
    %32 = vector.load %arg10[%c0_24, %c0_25] : memref<1x128xf32, #tpu.memory_space<vmem>>, vector<1x128xf32>
    %cst_26 = arith.constant dense<0.000000e+00> : vector<8x128xf32>
    %33 = tpu.matmul %30, %31, %cst_26 {dimension_numbers = #tpu.dot_dimension_numbers<[1], [0], [0], [1], [0, 0, 1, 1], [], []>} : vector<8x128xbf16>, vector<128x128xbf16>, vector<8x128xf32> -> vector<8x128xf32>
    %34 = vector.broadcast %32 : vector<1x128xf32> to vector<8x128xf32>
    %35 = arith.addf %33, %34 : vector<8x128xf32>
    %cst_27 = arith.constant 0.000000e+00 : f32
    %36 = vector.broadcast %cst_27 : f32 to vector<8x128xf32>
    %37 = arith.maximumf %35, %36 : vector<8x128xf32>
    %38 = arith.truncf %37 : vector<8x128xf32> to vector<8x128xbf16>
    %c0_28 = arith.constant 0 : index
    %c0_29 = arith.constant 0 : index
    %39 = vector.load %arg11[%c0_28, %c0_29] : memref<128x128xbf16, #tpu.memory_space<vmem>>, vector<128x128xbf16>
    %c0_30 = arith.constant 0 : index
    %c0_31 = arith.constant 0 : index
    %40 = vector.load %arg12[%c0_30, %c0_31] : memref<1x128xf32, #tpu.memory_space<vmem>>, vector<1x128xf32>
    %cst_32 = arith.constant dense<0.000000e+00> : vector<8x128xf32>
    %41 = tpu.matmul %38, %39, %cst_32 {dimension_numbers = #tpu.dot_dimension_numbers<[1], [0], [0], [1], [0, 0, 1, 1], [], []>} : vector<8x128xbf16>, vector<128x128xbf16>, vector<8x128xf32> -> vector<8x128xf32>
    %42 = vector.broadcast %40 : vector<1x128xf32> to vector<8x128xf32>
    %43 = arith.addf %41, %42 : vector<8x128xf32>
    %cst_33 = arith.constant 0.000000e+00 : f32
    %44 = vector.broadcast %cst_33 : f32 to vector<8x128xf32>
    %45 = arith.maximumf %43, %44 : vector<8x128xf32>
    %46 = arith.truncf %45 : vector<8x128xf32> to vector<8x128xbf16>
    %c0_34 = arith.constant 0 : index
    %c0_35 = arith.constant 0 : index
    %47 = vector.load %arg13[%c0_34, %c0_35] : memref<128x128xbf16, #tpu.memory_space<vmem>>, vector<128x128xbf16>
    %c0_36 = arith.constant 0 : index
    %c0_37 = arith.constant 0 : index
    %48 = vector.load %arg14[%c0_36, %c0_37] : memref<1x128xf32, #tpu.memory_space<vmem>>, vector<1x128xf32>
    %cst_38 = arith.constant dense<0.000000e+00> : vector<8x128xf32>
    %49 = tpu.matmul %46, %47, %cst_38 {dimension_numbers = #tpu.dot_dimension_numbers<[1], [0], [0], [1], [0, 0, 1, 1], [], []>} : vector<8x128xbf16>, vector<128x128xbf16>, vector<8x128xf32> -> vector<8x128xf32>
    %50 = vector.broadcast %48 : vector<1x128xf32> to vector<8x128xf32>
    %51 = arith.addf %49, %50 : vector<8x128xf32>
    %cst_39 = arith.constant 0.000000e+00 : f32
    %52 = vector.broadcast %cst_39 : f32 to vector<8x128xf32>
    %53 = arith.maximumf %51, %52 : vector<8x128xf32>
    %54 = arith.truncf %53 : vector<8x128xf32> to vector<8x128xbf16>
    %c0_40 = arith.constant 0 : index
    %c0_41 = arith.constant 0 : index
    %55 = vector.load %arg15[%c0_40, %c0_41] : memref<128x128xbf16, #tpu.memory_space<vmem>>, vector<128x128xbf16>
    %c0_42 = arith.constant 0 : index
    %c0_43 = arith.constant 0 : index
    %56 = vector.load %arg16[%c0_42, %c0_43] : memref<1x128xf32, #tpu.memory_space<vmem>>, vector<1x128xf32>
    %cst_44 = arith.constant dense<0.000000e+00> : vector<8x128xf32>
    %57 = tpu.matmul %54, %55, %cst_44 {dimension_numbers = #tpu.dot_dimension_numbers<[1], [0], [0], [1], [0, 0, 1, 1], [], []>} : vector<8x128xbf16>, vector<128x128xbf16>, vector<8x128xf32> -> vector<8x128xf32>
    %58 = vector.broadcast %56 : vector<1x128xf32> to vector<8x128xf32>
    %59 = arith.addf %57, %58 : vector<8x128xf32>
    %cst_45 = arith.constant 0.000000e+00 : f32
    %60 = vector.broadcast %cst_45 : f32 to vector<8x128xf32>
    %61 = arith.maximumf %59, %60 : vector<8x128xf32>
    %62 = arith.truncf %61 : vector<8x128xf32> to vector<8x128xbf16>
    %c0_46 = arith.constant 0 : index
    %c0_47 = arith.constant 0 : index
    %63 = vector.load %arg17[%c0_46, %c0_47] : memref<128x128xbf16, #tpu.memory_space<vmem>>, vector<128x128xbf16>
    %cst_48 = arith.constant dense<0.000000e+00> : vector<8x128xf32>
    %64 = tpu.matmul %62, %63, %cst_48 {dimension_numbers = #tpu.dot_dimension_numbers<[1], [0], [0], [1], [0, 0, 1, 1], [], []>} : vector<8x128xbf16>, vector<128x128xbf16>, vector<8x128xf32> -> vector<8x128xf32>
    %c0_49 = arith.constant 0 : index
    %c0_50 = arith.constant 0 : index
    %65 = vector.load %arg18[%c0_49, %c0_50] : memref<1x128xf32, #tpu.memory_space<vmem>>, vector<1x128xf32>
    %66 = vector.broadcast %65 : vector<1x128xf32> to vector<8x128xf32>
    %67 = arith.addf %64, %66 : vector<8x128xf32>
    %68 = tpu.iota {dimensions = array<i32: 1>} : vector<8x128xi32>
    %c8_i32 = arith.constant 8 : i32
    %69 = vector.broadcast %c8_i32 : i32 to vector<8x128xi32>
    %70 = arith.cmpi slt, %68, %69 : vector<8x128xi32>
    %cst_51 = arith.constant -1.000000e+30 : f32
    %71 = vector.broadcast %cst_51 : f32 to vector<8x128xf32>
    %72 = arith.select %70, %67, %71 : vector<8x128xi1>, vector<8x128xf32>
    %cst_52 = arith.constant dense<0xFF800000> : vector<8xf32>
    %73 = vector.multi_reduction <maximumf>, %72, %cst_52 [1] : vector<8x128xf32> to vector<8xf32>
    %74 = vector.shape_cast %73 : vector<8xf32> to vector<8x1xf32>
    %75 = vector.broadcast %74 : vector<8x1xf32> to vector<8x128xf32>
    %76 = arith.subf %72, %75 : vector<8x128xf32>
    %77 = math.exp %76 : vector<8x128xf32>
    %cst_53 = arith.constant 0.000000e+00 : f32
    %78 = vector.broadcast %cst_53 : f32 to vector<8x128xf32>
    %79 = arith.select %70, %77, %78 : vector<8x128xi1>, vector<8x128xf32>
    %cst_54 = arith.constant dense<0.000000e+00> : vector<8xf32>
    %80 = vector.multi_reduction <add>, %79, %cst_54 [1] : vector<8x128xf32> to vector<8xf32>
    %81 = vector.shape_cast %80 : vector<8xf32> to vector<8x1xf32>
    %82 = tpu.reciprocal %81 : vector<8x1xf32> -> vector<8x1xf32>
    %83 = vector.broadcast %82 : vector<8x1xf32> to vector<8x128xf32>
    %84 = arith.mulf %79, %83 : vector<8x128xf32>
    %c0_55 = arith.constant 0 : index
    %c0_56 = arith.constant 0 : index
    %85 = vector.load %arg19[%c0_55, %c0_56] : memref<8x128xf32, #tpu.memory_space<vmem>>, vector<8x128xf32>
    tpu.vector_store %arg19[%c0_55, %c0_56], %84 {strides = array<i32>} : memref<8x128xf32, #tpu.memory_space<vmem>>, vector<8x128xf32>,
    return
  }
  func.func @transform_0(%arg0: i32) -> (i32, i32) {
    %c0_i32 = arith.constant 0 : i32
    %c0_i32_0 = arith.constant 0 : i32
    return %arg0, %c0_i32 : i32, i32
  }
  func.func @transform_1(%arg0: i32) -> (i32, i32) {
    %c0_i32 = arith.constant 0 : i32
    %c0_i32_0 = arith.constant 0 : i32
    %c0_i32_1 = arith.constant 0 : i32
    return %c0_i32, %c0_i32_0 : i32, i32
  }
  func.func @transform_2(%arg0: i32) -> (i32, i32) {
    %c0_i32 = arith.constant 0 : i32
    %c0_i32_0 = arith.constant 0 : i32
    %c0_i32_1 = arith.constant 0 : i32
    return %c0_i32, %c0_i32_0 : i32, i32
  }
  func.func @transform_3(%arg0: i32) -> (i32, i32) {
    %c0_i32 = arith.constant 0 : i32
    %c0_i32_0 = arith.constant 0 : i32
    %c0_i32_1 = arith.constant 0 : i32
    return %c0_i32, %c0_i32_0 : i32, i32
  }
  func.func @transform_4(%arg0: i32) -> (i32, i32) {
    %c0_i32 = arith.constant 0 : i32
    %c0_i32_0 = arith.constant 0 : i32
    %c0_i32_1 = arith.constant 0 : i32
    return %c0_i32, %c0_i32_0 : i32, i32
  }
  func.func @transform_5(%arg0: i32) -> (i32, i32) {
    %c0_i32 = arith.constant 0 : i32
    %c0_i32_0 = arith.constant 0 : i32
    %c0_i32_1 = arith.constant 0 : i32
    return %c0_i32, %c0_i32_0 : i32, i32
  }
  func.func @transform_6(%arg0: i32) -> (i32, i32) {
    %c0_i32 = arith.constant 0 : i32
    %c0_i32_0 = arith.constant 0 : i32
    %c0_i32_1 = arith.constant 0 : i32
    return %c0_i32, %c0_i32_0 : i32, i32
  }
  func.func @transform_7(%arg0: i32) -> (i32, i32) {
    %c0_i32 = arith.constant 0 : i32
    %c0_i32_0 = arith.constant 0 : i32
    %c0_i32_1 = arith.constant 0 : i32
    return %c0_i32, %c0_i32_0 : i32, i32
  }
  func.func @transform_8(%arg0: i32) -> (i32, i32) {
    %c0_i32 = arith.constant 0 : i32
    %c0_i32_0 = arith.constant 0 : i32
    %c0_i32_1 = arith.constant 0 : i32
    return %c0_i32, %c0_i32_0 : i32, i32
  }
  func.func @transform_9(%arg0: i32) -> (i32, i32) {
    %c0_i32 = arith.constant 0 : i32
    %c0_i32_0 = arith.constant 0 : i32
    %c0_i32_1 = arith.constant 0 : i32
    return %c0_i32, %c0_i32_0 : i32, i32
  }
  func.func @transform_10(%arg0: i32) -> (i32, i32) {
    %c0_i32 = arith.constant 0 : i32
    %c0_i32_0 = arith.constant 0 : i32
    %c0_i32_1 = arith.constant 0 : i32
    return %c0_i32, %c0_i32_0 : i32, i32
  }
  func.func @transform_11(%arg0: i32) -> (i32, i32) {
    %c0_i32 = arith.constant 0 : i32
    %c0_i32_0 = arith.constant 0 : i32
    %c0_i32_1 = arith.constant 0 : i32
    return %c0_i32, %c0_i32_0 : i32, i32
  }
  func.func @transform_12(%arg0: i32) -> (i32, i32) {
    %c0_i32 = arith.constant 0 : i32
    %c0_i32_0 = arith.constant 0 : i32
    %c0_i32_1 = arith.constant 0 : i32
    return %c0_i32, %c0_i32_0 : i32, i32
  }
  func.func @transform_13(%arg0: i32) -> (i32, i32) {
    %c0_i32 = arith.constant 0 : i32
    %c0_i32_0 = arith.constant 0 : i32
    %c0_i32_1 = arith.constant 0 : i32
    return %c0_i32, %c0_i32_0 : i32, i32
  }
  func.func @transform_14(%arg0: i32) -> (i32, i32) {
    %c0_i32 = arith.constant 0 : i32
    %c0_i32_0 = arith.constant 0 : i32
    %c0_i32_1 = arith.constant 0 : i32
    return %c0_i32, %c0_i32_0 : i32, i32
  }
  func.func @transform_15(%arg0: i32) -> (i32, i32) {
    %c0_i32 = arith.constant 0 : i32
    %c0_i32_0 = arith.constant 0 : i32
    %c0_i32_1 = arith.constant 0 : i32
    return %c0_i32, %c0_i32_0 : i32, i32
  }
  func.func @transform_16(%arg0: i32) -> (i32, i32) {
    %c0_i32 = arith.constant 0 : i32
    %c0_i32_0 = arith.constant 0 : i32
    %c0_i32_1 = arith.constant 0 : i32
    return %c0_i32, %c0_i32_0 : i32, i32
  }
  func.func @transform_17(%arg0: i32) -> (i32, i32) {
    %c0_i32 = arith.constant 0 : i32
    %c0_i32_0 = arith.constant 0 : i32
    %c0_i32_1 = arith.constant 0 : i32
    return %c0_i32, %c0_i32_0 : i32, i32
  }
  func.func @transform_18(%arg0: i32) -> (i32, i32) {
    %c0_i32 = arith.constant 0 : i32
    %c0_i32_0 = arith.constant 0 : i32
    return %arg0, %c0_i32 : i32, i32
  }
}

</mosaic_0001>

<bundles_post_ra>
// kernel: mlp_forward.1
= control target key start
LH: loop header
LB: loop body
LE: loop exit
PB: predicated region body
PF: predicated region fallthrough
CT: control target
= control target key end

     0   :  { %s6543_s0 = inlined_call_operand.vmem [shape: f32[8,128], index: 0, kind: input, shape index: {}]   ;;  %s6544_s1 = inlined_call_operand.hbm [shape: bf16[128,1024], index: 1, kind: input, shape index: {}]   ;;  %s6545_s2 = inlined_call_operand.hbm [shape: bf16[1024,512], index: 2, kind: input, shape index: {}]   ;;  %s6546_s3 = inlined_call_operand.vmem [shape: f32[1,512], index: 3, kind: input, shape index: {}]   ;;  %s6547_s4 = inlined_call_operand.hbm [shape: bf16[512,256], index: 4, kind: input, shape index: {}]   ;;  %s6548_s5 = inlined_call_operand.vmem [shape: f32[1,256], index: 5, kind: input, shape index: {}]   ;;  %s6549_s6 = inlined_call_operand.hbm [shape: bf16[256,128], index: 6, kind: input, shape index: {}]   ;;  %s6550_s7 = inlined_call_operand.vmem [shape: f32[1,128], index: 7, kind: input, shape index: {}]   ;;  %s6551_s8 = inlined_call_operand.vmem [shape: bf16[128,128], index: 8, kind: input, shape index: {}]   ;;  %s6552_s9 = inlined_call_operand.vmem [shape: f32[1,128], index: 9, kind: input, shape index: {}]   ;;  %s6553_s10 = inlined_call_operand.hbm [shape: bf16[128,128], index: 10, kind: input, shape index: {}]   ;;  %s6554_s11 = inlined_call_operand.vmem [shape: f32[1,128], index: 11, kind: input, shape index: {}]   ;;  %s6555_s12 = inlined_call_operand.hbm [shape: bf16[128,128], index: 12, kind: input, shape index: {}]   ;;  %s6556_s13 = inlined_call_operand.vmem [shape: f32[1,128], index: 13, kind: input, shape index: {}]   ;;  %s6557_s14 = inlined_call_operand.hbm [shape: bf16[128,128], index: 14, kind: input, shape index: {}]   ;;  %s6558_s15 = inlined_call_operand.vmem [shape: f32[1,128], index: 15, kind: input, shape index: {}]   ;;  %s6559_s16 = inlined_call_operand.hbm [shape: bf16[128,128], index: 16, kind: input, shape index: {}]   ;;  %s6560_s17 = inlined_call_operand.vmem [shape: f32[1,128], index: 17, kind: input, shape index: {}]   ;;  %s6561_s18 = inlined_call_operand.hbm [shape: f32[8,128], index: 18, kind: output, shape index: {}]  }
   0x1   :  { %6566 = sst [smem:[#allocation23_spill]] %s6543_s0 }
   0x2   :  { %6567 = sst [smem:[#allocation24_spill]] %s6544_s1 }
   0x3   :  { %6568 = sst [smem:[#allocation25_spill]] %s6545_s2 }
   0x4   :  { %23 = vsyncpa [#allocation3], 0 }
   0x5   :  { %24 = vsyncpa [#allocation6], 0 }
   0x6   :  { %25 = vsyncpa [#allocation9], 0 }
   0x7   :  { %26 = vsyncpa [#allocation12], 0 }
   0x8   :  { %27 = vsyncpa [#allocation15], 0  ;;  %s6569_s29 = sld [smem:[#allocation25_spill]] }
   0xe   :  { %s48_s30 = sshll.u32 %s6569_s29, 4  ;;  %s49_s30 = int_to_ptr.hbm [resolvable:$true] %s48_s30 }
   0xf   :  { %28 = vsyncpa [#allocation4], 0  ;;  %s6236_s0 = smov [#allocation5]   ;;  %s78_s21 = sshll.u32 %s6549_s6, 4  ;;  %s79_s21 = int_to_ptr.hbm [resolvable:$true] %s78_s21 }
  0x10   :  { %s50_s19 = sshll.u32 %s6236_s0, 4  ;;  %s6237_s22 = smov 256   ;;  %s51_s19 = int_to_ptr.vmem [resolvable:$true] %s50_s19 }
  0x11   :  { %s6238_s2 = smov 16   ;;  %s6239_s23 = smov [#allocation8]  }
  0x12   :  { %56 = dma.hbm_to_vmem [thread:$0]  %s49_s30, 32768, %s51_s19, [#allocation6], %s6237_s22, %s6237_s22, %s6238_s2  }
  0x13   :  { %s80_s24 = sshll.u32 %s6239_s23, 4  ;;  %s6562_s25 = smov 64   ;;  %s81_s24 = int_to_ptr.vmem [resolvable:$true] %s80_s24 }
  0x14   :  { %s6564_s26 = smov 4   ;;  %s112_s29 = sshll.u32 %s6555_s12, 4  ;;  %s113_s29 = int_to_ptr.hbm [resolvable:$true] %s112_s29 }
  0x15   :  { %86 = dma.hbm_to_vmem [thread:$0]  %s79_s21, 2048, %s81_s24, [#allocation9], %s6562_s25, %s6562_s25, %s6564_s26  }
  0x16   :  { %s6242_s0 = smov [#allocation11]   ;;  %s6570_s19 = sld [smem:[#allocation24_spill]] }
  0x17   :  { %s114_s6 = sshll.u32 %s6242_s0, 4  ;;  %s6243_s22 = smov [#allocation2]   ;;  %s115_s6 = int_to_ptr.vmem [resolvable:$true] %s114_s6 }
  0x18   :  { %120 = dma.hbm_to_vmem [thread:$0]  %s113_s29, 1024, %s115_s6, [#allocation12], %s6562_s25, %s6562_s25, %s6564_s26  }
  0x19   :  { %s37_s2 = sshll.u32 %s6243_s22, 4  ;;  %s6244_s21 = smov 512   ;;  %s38_s2 = int_to_ptr.vmem [resolvable:$true] %s37_s2 }
  0x1a   :  { %s6245_s23 = smov 32   ;;  %s63_s27 = sshll.u32 %s6547_s4, 4  ;;  %s64_s27 = int_to_ptr.hbm [resolvable:$true] %s63_s27 }
  0x1b   :  { %s6246_s28 = smov [#allocation7]   ;;  %s6247_s29 = smov 128  }
  0x1c   :  { %s35_s20 = sshll.u32 %s6570_s19, 4  ;;  %s65_s0 = sshll.u32 %s6246_s28, 4  ;;  %s36_s20 = int_to_ptr.hbm [resolvable:$true] %s35_s20  ;;  %s66_s0 = int_to_ptr.vmem [resolvable:$true] %s65_s0 }
  0x1d   :  { %43 = dma.hbm_to_vmem [thread:$0]  %s36_s20, 8192, %s38_s2, [#allocation3], %s6244_s21, %s6244_s21, %s6245_s23  }
  0x1e   :  { %s97_s19 = sshll.u32 %s6553_s10, 4  ;;  %s6248_s6 = smov 8   ;;  %s98_s19 = int_to_ptr.hbm [resolvable:$true] %s97_s19 }
  0x1f   :  { %71 = dma.hbm_to_vmem [thread:$0]  %s64_s27, 8192, %s66_s0, [#allocation6], %s6247_s29, %s6247_s29, %s6248_s6  }
  0x20   :  { %s6249_s22 = smov [#allocation10]   ;;  %s127_s2 = sshll.u32 %s6557_s14, 4  ;;  %s128_s2 = int_to_ptr.hbm [resolvable:$true] %s127_s2 }
  0x21   :  { %s99_s25 = sshll.u32 %s6249_s22, 4  ;;  %s6571_s4 = smov 4   ;;  %s100_s25 = int_to_ptr.vmem [resolvable:$true] %s99_s25 }
  0x22   :  { %s6572_s21 = smov 64   ;;  %s142_s10 = sshll.u32 %s6559_s16, 4  ;;  %s143_s10 = int_to_ptr.hbm [resolvable:$true] %s142_s10 }
  0x23   :  { %105 = dma.hbm_to_vmem [thread:$0]  %s98_s19, 1024, %s100_s25, [#allocation9], %s6572_s21, %s6572_s21, %s6571_s4  }
  0x24   :  { %s6250_s24 = smov [#allocation13]   ;;  %s6251_s26 = smov [#allocation14]  }
  0x25   :  { %s129_s28 = sshll.u32 %s6250_s24, 4  ;;  %s144_s14 = sshll.u32 %s6251_s26, 4  ;;  %s130_s28 = int_to_ptr.vmem [resolvable:$true] %s129_s28  ;;  %s145_s14 = int_to_ptr.vmem [resolvable:$true] %s144_s14 }
  0x26   :  { %135 = dma.hbm_to_vmem [thread:$0]  %s128_s2, 1024, %s130_s28, [#allocation12], %s6572_s21, %s6572_s21, %s6571_s4  }
  0x27   :  { %150 = dma.hbm_to_vmem [thread:$0]  %s143_s10, 1024, %s145_s14, [#allocation15], %s6572_s21, %s6572_s21, %s6571_s4  }
  0x28   :  { %6224 = dma.done.wait [#allocation3], 8192  }
  0x29   :  { %6225 = vsyncadd [#allocation3], 4294959104 }
  0x2a   :  { %6226 = dma.done.wait [#allocation6], 40960  }
  0x2b   :  { %6227 = vsyncadd [#allocation6], 4294926336 }
  0x2c   :  { %6228 = dma.done.wait [#allocation9], 3072  }
  0x2d   :  { %6229 = vsyncadd [#allocation9], 4294964224 }
  0x2e   :  { %6230 = dma.done.wait [#allocation12], 2048  }
  0x2f   :  { %6231 = vsyncadd [#allocation12], 4294965248 }
  0x30   :  { %6232 = dma.done.wait [#allocation15], 1024  }
  0x31   :  { %6233 = vsyncadd [#allocation15], 4294966272  ;;  %v4007_v0 = vld [vmem:[#allocation2 + $0x1c0] sm:$0xf]  ;;  %v5597_v2 = vld [vmem:[#allocation2 + $0x1c4] sm:$0xf] }
  0x32   :  { %v5601_v1 = vld [vmem:[#allocation2 + $0x1dc] sm:$0xf0]  ;;  %v4009_v4 = vld [vmem:[#allocation2 + $0x1e0] sm:$0xf0]  ;;  %v4015_v5 = vld [vmem:[#allocation2 + $0x1c8] sm:$0xf] }
  0x33   :  { %v4008_v3 = vor.u32 %v5601_v1, %v4007_v0  ;;  %v5602_v6 = vld [vmem:[#allocation2 + $0x1e4] sm:$0xf0]  ;;  %v4012_v7 = vor.u32 %v5597_v2, %v4009_v4  ;;  %v5598_v9 = vld [vmem:[#allocation2 + $0x1cc] sm:$0xf]  ;;  %v3975_v11 = vld [vmem:[#allocation2 + $0x180] sm:$0xf] }
  0x34   :  { %v4016_v8 = vor.u32 %v5602_v6, %v4015_v5  ;;  %v4017_v10 = vld [vmem:[#allocation2 + $0x1e8] sm:$0xf0]  ;;  %v5593_v13 = vld [vmem:[#allocation2 + $0x19c] sm:$0xf0]  ;;  %v5589_v14 = vld [vmem:[#allocation2 + $0x184] sm:$0xf] }
  0x35   :  { %571 = vmatpush.bf16.msra.mxu0 %v4008_v3  ;;  %v4020_v12 = vor.u32 %v5598_v9, %v4017_v10  ;;  %v3977_v15 = vld [vmem:[#allocation2 + $0x1a0] sm:$0xf0]  ;;  %584 = vmatpush.bf16.msra.mxu1 %v4012_v7  ;;  %v3976_v16 = vor.u32 %v5593_v13, %v3975_v11  ;;  %v3983_v18 = vld [vmem:[#allocation2 + $0x188] sm:$0xf]  ;;  %v5590_v20 = vld [vmem:[#allocation2 + $0x18c] sm:$0xf] }
  0x36   :  { %597 = vmatpush.bf16.msra.mxu2 %v4016_v8  ;;  %v3980_v17 = vor.u32 %v5589_v14, %v3977_v15  ;;  %v5594_v19 = vld [vmem:[#allocation2 + $0x1a4] sm:$0xf0]  ;;  %v3985_v22 = vld [vmem:[#allocation2 + $0x1a8] sm:$0xf0]  ;;  %v3943_v23 = vld [vmem:[#allocation2 + $0x140] sm:$0xf] }
  0x37   :  { %610 = vmatpush.bf16.msra.mxu3 %v4020_v12  ;;  %v3984_v21 = vor.u32 %v5594_v19, %v3983_v18  ;;  %v5585_v24 = vld [vmem:[#allocation2 + $0x15c] sm:$0xf0]  ;;  %v3988_v25 = vor.u32 %v5590_v20, %v3985_v22  ;;  %v5581_v26 = vld [vmem:[#allocation2 + $0x144] sm:$0xf]  ;;  %v3951_v28 = vld [vmem:[#allocation2 + $0x148] sm:$0xf] }
  0x38   :  { %v3945_v27 = vld [vmem:[#allocation2 + $0x160] sm:$0xf0]  ;;  %v3944_v29 = vor.u32 %v5585_v24, %v3943_v23  ;;  %v5586_v30 = vld [vmem:[#allocation2 + $0x164] sm:$0xf0]  ;;  %v5582_v31 = vld [vmem:[#allocation2 + $0x14c] sm:$0xf] }
  0x39   :  { %572 = vmatpush.bf16.msra.mxu0 %v3976_v16  ;;  %v3953_v32 = vld [vmem:[#allocation2 + $0x168] sm:$0xf0]  ;;  %585 = vmatpush.bf16.msra.mxu1 %v3980_v17  ;;  %v3948_v33 = vor.u32 %v5581_v26, %v3945_v27  ;;  %v3952_v34 = vor.u32 %v5586_v30, %v3951_v28  ;;  %v3911_v35 = vld [vmem:[#allocation2 + $0x100] sm:$0xf]  ;;  %v5573_v37 = vld [vmem:[#allocation2 + $0x104] sm:$0xf] }
  0x3a   :  { %598 = vmatpush.bf16.msra.mxu2 %v3984_v21  ;;  %v5577_v36 = vld [vmem:[#allocation2 + $0x11c] sm:$0xf0]  ;;  %v3956_v38 = vor.u32 %v5582_v31, %v3953_v32  ;;  %v3913_v39 = vld [vmem:[#allocation2 + $0x120] sm:$0xf0]  ;;  %v3919_v40 = vld [vmem:[#allocation2 + $0x108] sm:$0xf] }
  0x3b   :  { %611 = vmatpush.bf16.msra.mxu3 %v3988_v25  ;;  %v5578_v41 = vld [vmem:[#allocation2 + $0x124] sm:$0xf0]  ;;  %v5574_v42 = vld [vmem:[#allocation2 + $0x10c] sm:$0xf]  ;;  %v3912_v44 = vor.u32 %v5577_v36, %v3911_v35  ;;  %v3916_v45 = vor.u32 %v5573_v37, %v3913_v39  ;;  %v3879_v47 = vld [vmem:[#allocation2 + $0xc0] sm:$0xf] }
  0x3c   :  { %v3921_v43 = vld [vmem:[#allocation2 + $0x128] sm:$0xf0]  ;;  %v3920_v46 = vor.u32 %v5578_v41, %v3919_v40  ;;  %v5569_v48 = vld [vmem:[#allocation2 + $0xdc] sm:$0xf0]  ;;  %v5565_v49 = vld [vmem:[#allocation2 + $0xc4] sm:$0xf] }
  0x3d   :  { %573 = vmatpush.bf16.msra.mxu0 %v3944_v29  ;;  %586 = vmatpush.bf16.msra.mxu1 %v3948_v33  ;;  %v3924_v50 = vor.u32 %v5574_v42, %v3921_v43  ;;  %v3881_v51 = vld [vmem:[#allocation2 + $0xe0] sm:$0xf0]  ;;  %v3887_v52 = vld [vmem:[#allocation2 + $0xc8] sm:$0xf]  ;;  %v5566_v54 = vld [vmem:[#allocation2 + $0xcc] sm:$0xf]  ;;  %v3880_v56 = vor.u32 %v5569_v48, %v3879_v47 }
  0x3e   :  { %599 = vmatpush.bf16.msra.mxu2 %v3952_v34  ;;  %v5570_v53 = vld [vmem:[#allocation2 + $0xe4] sm:$0xf0]  ;;  %v3889_v55 = vld [vmem:[#allocation2 + $0xe8] sm:$0xf0]  ;;  %v3884_v57 = vor.u32 %v5565_v49, %v3881_v51  ;;  %v3847_v59 = vld [vmem:[#allocation2 + $0x80] sm:$0xf] }
  0x3f   :  { %612 = vmatpush.bf16.msra.mxu3 %v3956_v38  ;;  %v3888_v58 = vor.u32 %v5570_v53, %v3887_v52  ;;  %v5561_v60 = vld [vmem:[#allocation2 + $0x9c] sm:$0xf0]  ;;  %v5557_v61 = vld [vmem:[#allocation2 + $0x84] sm:$0xf]  ;;  %v3892_v62 = vor.u32 %v5566_v54, %v3889_v55  ;;  %v3855_v0 = vld [vmem:[#allocation2 + $0x88] sm:$0xf] }
  0x40   :  { %v3849_v63 = vld [vmem:[#allocation2 + $0xa0] sm:$0xf0]  ;;  %v5562_v1 = vld [vmem:[#allocation2 + $0xa4] sm:$0xf0]  ;;  %v5558_v2 = vld [vmem:[#allocation2 + $0x8c] sm:$0xf]  ;;  %v3848_v4 = vor.u32 %v5561_v60, %v3847_v59 }
  0x41   :  { %574 = vmatpush.bf16.msra.mxu0 %v3912_v44  ;;  %587 = vmatpush.bf16.msra.mxu1 %v3916_v45  ;;  %v3857_v3 = vld [vmem:[#allocation2 + $0xa8] sm:$0xf0]  ;;  %v3852_v5 = vor.u32 %v5557_v61, %v3849_v63  ;;  %v3856_v6 = vor.u32 %v5562_v1, %v3855_v0  ;;  %v3815_v7 = vld [vmem:[#allocation2 + $0x40] sm:$0xf]  ;;  %v5549_v9 = vld [vmem:[#allocation2 + $0x44] sm:$0xf] }
  0x42   :  { %600 = vmatpush.bf16.msra.mxu2 %v3920_v46  ;;  %v5553_v8 = vld [vmem:[#allocation2 + $0x5c] sm:$0xf0]  ;;  %v3860_v10 = vor.u32 %v5558_v2, %v3857_v3  ;;  %v3817_v11 = vld [vmem:[#allocation2 + $0x60] sm:$0xf0]  ;;  %v3823_v12 = vld [vmem:[#allocation2 + $0x48] sm:$0xf] }
  0x43   :  { %613 = vmatpush.bf16.msra.mxu3 %v3924_v50  ;;  %v5554_v13 = vld [vmem:[#allocation2 + $0x64] sm:$0xf0]  ;;  %v5550_v14 = vld [vmem:[#allocation2 + $0x4c] sm:$0xf]  ;;  %v3816_v16 = vor.u32 %v5553_v8, %v3815_v7  ;;  %v3783_v17 = vld [vmem:[#allocation2] sm:$0xf]  ;;  %v3820_v19 = vor.u32 %v5549_v9, %v3817_v11 }
  0x44   :  { %v3825_v15 = vld [vmem:[#allocation2 + $0x68] sm:$0xf0]  ;;  %v5545_v18 = vld [vmem:[#allocation2 + $0x1c] sm:$0xf0]  ;;  %v3824_v20 = vor.u32 %v5554_v13, %v3823_v12  ;;  %v5541_v21 = vld [vmem:[#allocation2 + $0x4] sm:$0xf] }
  0x45   :  { %575 = vmatpush.bf16.msra.mxu0 %v3880_v56  ;;  %588 = vmatpush.bf16.msra.mxu1 %v3884_v57  ;;  %v3785_v22 = vld [vmem:[#allocation2 + $0x20] sm:$0xf0]  ;;  %v3791_v23 = vld [vmem:[#allocation2 + $0x8] sm:$0xf]  ;;  %v3828_v24 = vor.u32 %v5550_v14, %v3825_v15  ;;  %v5542_v26 = vld [vmem:[#allocation2 + $0xc] sm:$0xf]  ;;  %v3784_v31 = vor.u32 %v5545_v18, %v3783_v17 }
  0x46   :  { %601 = vmatpush.bf16.msra.mxu2 %v3888_v58  ;;  %v5546_v25 = vld [vmem:[#allocation2 + $0x24] sm:$0xf0]  ;;  %v3793_v27 = vld [vmem:[#allocation2 + $0x28] sm:$0xf0]  ;;  %v4023_v28 = vld [vmem:[#allocation2 + $0x1d0] sm:$0xf]  ;;  %v3788_v35 = vor.u32 %v5541_v21, %v3785_v22 }
  0x47   :  { %614 = vmatpush.bf16.msra.mxu3 %v3892_v62  ;;  %v5603_v29 = vld [vmem:[#allocation2 + $0x1ec] sm:$0xf0]  ;;  %v5599_v30 = vld [vmem:[#allocation2 + $0x1d4] sm:$0xf]  ;;  %v4031_v33 = vld [vmem:[#allocation2 + $0x1d8] sm:$0xf]  ;;  %v3792_v36 = vor.u32 %v5546_v25, %v3791_v23  ;;  %v3796_v40 = vor.u32 %v5542_v26, %v3793_v27 }
  0x48   :  { %v4025_v32 = vld [vmem:[#allocation2 + $0x1f0] sm:$0xf0]  ;;  %v5604_v34 = vld [vmem:[#allocation2 + $0x1f4] sm:$0xf0]  ;;  %v5600_v37 = vld [vmem:[#allocation2 + $0x1dc] sm:$0xf]  ;;  %v4024_v41 = vor.u32 %v5603_v29, %v4023_v28 }
  0x49   :  { %576 = vmatpush.bf16.msra.mxu0 %v3848_v4  ;;  %589 = vmatpush.bf16.msra.mxu1 %v3852_v5  ;;  %v4033_v38 = vld [vmem:[#allocation2 + $0x1f8] sm:$0xf0]  ;;  %s6573_s27 = sld [smem:[#allocation23_spill]]  ;;  %v4028_v42 = vor.u32 %v5599_v30, %v4025_v32  ;;  %v4032_v43 = vor.u32 %v5604_v34, %v4031_v33  ;;  %v3991_v44 = vld [vmem:[#allocation2 + $0x190] sm:$0xf]  ;;  %s3767_s29 = sshll.u32 %s6561_s18, 4  ;;  %s3768_s29 = int_to_ptr.hbm [resolvable:$true] %s3767_s29 }
  0x4a   :  { %602 = vmatpush.bf16.msra.mxu2 %v3856_v6  ;;  %v5595_v45 = vld [vmem:[#allocation2 + $0x1ac] sm:$0xf0]  ;;  %v5591_v46 = vld [vmem:[#allocation2 + $0x194] sm:$0xf]  ;;  %v4036_v47 = vor.u32 %v5600_v37, %v4033_v38  ;;  %v3999_v50 = vld [vmem:[#allocation2 + $0x198] sm:$0xf] }
  0x4b   :  { %615 = vmatpush.bf16.msra.mxu3 %v3860_v10  ;;  %v3993_v49 = vld [vmem:[#allocation2 + $0x1b0] sm:$0xf0]  ;;  %v5596_v51 = vld [vmem:[#allocation2 + $0x1b4] sm:$0xf0]  ;;  %v5592_v52 = vld [vmem:[#allocation2 + $0x19c] sm:$0xf]  ;;  %v3992_v54 = vor.u32 %v5595_v45, %v3991_v44 }
  0x4c   :  { %v4001_v53 = vld [vmem:[#allocation2 + $0x1b8] sm:$0xf0]  ;;  %v3996_v55 = vor.u32 %v5591_v46, %v3993_v49  ;;  %v4000_v56 = vor.u32 %v5596_v51, %v3999_v50  ;;  %v3959_v57 = vld [vmem:[#allocation2 + $0x150] sm:$0xf]  ;;  %v5583_v59 = vld [vmem:[#allocation2 + $0x154] sm:$0xf] }
  0x4d   :  { %577 = vmatpush.bf16.msra.mxu0 %v3816_v16  ;;  %590 = vmatpush.bf16.msra.mxu1 %v3820_v19  ;;  %v5587_v58 = vld [vmem:[#allocation2 + $0x16c] sm:$0xf0]  ;;  %v4004_v60 = vor.u32 %v5592_v52, %v4001_v53  ;;  %v3961_v61 = vld [vmem:[#allocation2 + $0x170] sm:$0xf0]  ;;  %v3967_v62 = vld [vmem:[#allocation2 + $0x158] sm:$0xf] }
  0x4e   :  { %603 = vmatpush.bf16.msra.mxu2 %v3824_v20  ;;  %v5588_v63 = vld [vmem:[#allocation2 + $0x174] sm:$0xf0]  ;;  %v5584_v0 = vld [vmem:[#allocation2 + $0x15c] sm:$0xf]  ;;  %v3960_v2 = vor.u32 %v5587_v58, %v3959_v57  ;;  %v3964_v3 = vor.u32 %v5583_v59, %v3961_v61  ;;  %v3927_v5 = vld [vmem:[#allocation2 + $0x110] sm:$0xf] }
  0x4f   :  { %v185_v39 = vld [vmem:[%s6573_s27] sm:$0xff]  ;;  %616 = vmatpush.bf16.msra.mxu3 %v3828_v24  ;;  %v3969_v1 = vld [vmem:[#allocation2 + $0x178] sm:$0xf0]  ;;  %v3968_v4 = vor.u32 %v5588_v63, %v3967_v62  ;;  %v5579_v6 = vld [vmem:[#allocation2 + $0x12c] sm:$0xf0] }
  0x50   :  { %v6390_v48 = vpack.c.bf16 %v185_v39, %v185_v39  ;;  %v5575_v7 = vld [vmem:[#allocation2 + $0x114] sm:$0xf]  ;;  %v3972_v8 = vor.u32 %v5584_v0, %v3969_v1  ;;  %v3935_v10 = vld [vmem:[#allocation2 + $0x118] sm:$0xf]  ;;  %v5576_v12 = vld [vmem:[#allocation2 + $0x11c] sm:$0xf]  ;;  %v3928_v14 = vor.u32 %v5579_v6, %v3927_v5 }
  0x51   :  { %578 = vmatpush.bf16.msra.mxu0 %v3784_v31  ;;  %591 = vmatpush.bf16.msra.mxu1 %v3788_v35  ;;  %v3929_v9 = vld [vmem:[#allocation2 + $0x130] sm:$0xf0]  ;;  %v5580_v11 = vld [vmem:[#allocation2 + $0x134] sm:$0xf0]  ;;  %v3937_v13 = vld [vmem:[#allocation2 + $0x138] sm:$0xf0] }
  0x52   :  { %604 = vmatpush.bf16.msra.mxu2 %v3792_v36  ;;  %v3932_v15 = vor.u32 %v5575_v7, %v3929_v9  ;;  %v3936_v16 = vor.u32 %v5580_v11, %v3935_v10  ;;  %v3895_v17 = vld [vmem:[#allocation2 + $0xd0] sm:$0xf]  ;;  %v5567_v19 = vld [vmem:[#allocation2 + $0xd4] sm:$0xf]  ;;  %v3940_v20 = vor.u32 %v5576_v12, %v3937_v13  ;;  %v3903_v22 = vld [vmem:[#allocation2 + $0xd8] sm:$0xf] }
  0x53   :  { %617 = vmatpush.bf16.msra.mxu3 %v3796_v40  ;;  %v5571_v18 = vld [vmem:[#allocation2 + $0xec] sm:$0xf0]  ;;  %v3897_v21 = vld [vmem:[#allocation2 + $0xf0] sm:$0xf0]  ;;  %v5572_v23 = vld [vmem:[#allocation2 + $0xf4] sm:$0xf0] }
  0x54   :  { %579 = vmatmul.bf16.vlgmr.msra.gmra.mxu0 %v6390_v48  ;;  %592 = vmatmul.bf16.vlgmr.msra.gmra.mxu1 %v6390_v48  ;;  %v5568_v24 = vld [vmem:[#allocation2 + $0xdc] sm:$0xf]  ;;  %v3896_v26 = vor.u32 %v5571_v18, %v3895_v17  ;;  %v3900_v27 = vor.u32 %v5567_v19, %v3897_v21  ;;  %v3904_v28 = vor.u32 %v5572_v23, %v3903_v22  ;;  %v3863_v29 = vld [vmem:[#allocation2 + $0x90] sm:$0xf]  ;;  %v5559_v31 = vld [vmem:[#allocation2 + $0x94] sm:$0xf] }
  0x55   :  { %623 = vmatpush.bf16.msrb.mxu0 %v4024_v41  ;;  %636 = vmatpush.bf16.msrb.mxu1 %v4028_v42  ;;  %v3905_v25 = vld [vmem:[#allocation2 + $0xf8] sm:$0xf0]  ;;  %v5563_v30 = vld [vmem:[#allocation2 + $0xac] sm:$0xf0]  ;;  %v3865_v33 = vld [vmem:[#allocation2 + $0xb0] sm:$0xf0] }
  0x56   :  { %649 = vmatpush.bf16.msrb.mxu2 %v4032_v43  ;;  %618 = vmatmul.bf16.vlgmr.msra.gmra.mxu3 %v6390_v48  ;;  %v3908_v32 = vor.u32 %v5568_v24, %v3905_v25  ;;  %v3871_v34 = vld [vmem:[#allocation2 + $0x98] sm:$0xf]  ;;  %v5560_v36 = vld [vmem:[#allocation2 + $0x9c] sm:$0xf]  ;;  %v3864_v38 = vor.u32 %v5563_v30, %v3863_v29  ;;  %v3868_v39 = vor.u32 %v5559_v31, %v3865_v33  ;;  %v3831_v41 = vld [vmem:[#allocation2 + $0x50] sm:$0xf] }
  0x57   :  { %662 = vmatpush.bf16.msrb.mxu3 %v4036_v47  ;;  %605 = vmatmul.bf16.vlgmr.msra.gmra.mxu2 %v6390_v48  ;;  %v5564_v35 = vld [vmem:[#allocation2 + $0xb4] sm:$0xf0]  ;;  %v3873_v37 = vld [vmem:[#allocation2 + $0xb8] sm:$0xf0]  ;;  %v5555_v42 = vld [vmem:[#allocation2 + $0x6c] sm:$0xf0] }
  0x58   :  { %v3872_v40 = vor.u32 %v5564_v35, %v3871_v34  ;;  %v5551_v43 = vld [vmem:[#allocation2 + $0x54] sm:$0xf]  ;;  %v3876_v44 = vor.u32 %v5560_v36, %v3873_v37  ;;  %v3839_v46 = vld [vmem:[#allocation2 + $0x58] sm:$0xf]  ;;  %v5552_v49 = vld [vmem:[#allocation2 + $0x5c] sm:$0xf]  ;;  %v3832_v51 = vor.u32 %v5555_v42, %v3831_v41 }
  0x59   :  { %624 = vmatpush.bf16.msrb.mxu0 %v3992_v54  ;;  %637 = vmatpush.bf16.msrb.mxu1 %v3996_v55  ;;  %v3833_v45 = vld [vmem:[#allocation2 + $0x70] sm:$0xf0]  ;;  %v5556_v47 = vld [vmem:[#allocation2 + $0x74] sm:$0xf0]  ;;  %v3841_v50 = vld [vmem:[#allocation2 + $0x78] sm:$0xf0] }
  0x5a   :  { %650 = vmatpush.bf16.msrb.mxu2 %v4000_v56  ;;  %v3799_v52 = vld [vmem:[#allocation2 + $0x10] sm:$0xf]  ;;  %v3836_v53 = vor.u32 %v5551_v43, %v3833_v45  ;;  %v3840_v54 = vor.u32 %v5556_v47, %v3839_v46  ;;  %v5543_v56 = vld [vmem:[#allocation2 + $0x14] sm:$0xf]  ;;  %v3844_v58 = vor.u32 %v5552_v49, %v3841_v50  ;;  %v3807_v59 = vld [vmem:[#allocation2 + $0x18] sm:$0xf] }
  0x5b   :  { %663 = vmatpush.bf16.msrb.mxu3 %v4004_v60  ;;  %v5547_v55 = vld [vmem:[#allocation2 + $0x2c] sm:$0xf0]  ;;  %v3801_v57 = vld [vmem:[#allocation2 + $0x30] sm:$0xf0]  ;;  %v5548_v60 = vld [vmem:[#allocation2 + $0x34] sm:$0xf0] }
  0x5c   :  { %v5544_v61 = vld [vmem:[#allocation2 + $0x1c] sm:$0xf]  ;;  %v4151_v63 = vld [vmem:[#allocation5 + $0xe0] sm:$0xf]  ;;  %v5635_v0 = vld [vmem:[#allocation5 + $0xec] sm:$0xf0]  ;;  %v3800_v1 = vor.u32 %v5547_v55, %v3799_v52  ;;  %v3808_v5 = vor.u32 %v5548_v60, %v3807_v59 }
  0x5d   :  { %625 = vmatpush.bf16.msrb.mxu0 %v3960_v2  ;;  %638 = vmatpush.bf16.msrb.mxu1 %v3964_v3  ;;  %v3809_v62 = vld [vmem:[#allocation2 + $0x38] sm:$0xf0]  ;;  %v4279_v2 = vld [vmem:[#allocation5 + $0x1e0] sm:$0xf]  ;;  %v5667_v3 = vld [vmem:[#allocation5 + $0x1ec] sm:$0xf0]  ;;  %v4152_v7 = vor.u32 %v5635_v0, %v4151_v63 }
  0x5e   :  { %651 = vmatpush.bf16.msrb.mxu2 %v3968_v4  ;;  %v3804_v4 = vor.u32 %v5543_v56, %v3801_v57  ;;  %v3812_v6 = vor.u32 %v5544_v61, %v3809_v62  ;;  %v4407_v9 = vld [vmem:[#allocation5 + $0x2e0] sm:$0xf]  ;;  %v5699_v10 = vld [vmem:[#allocation5 + $0x2ec] sm:$0xf0]  ;;  %v4280_v11 = vor.u32 %v5667_v3, %v4279_v2 }
  0x5f   :  { %664 = vmatpush.bf16.msrb.mxu3 %v3972_v8  ;;  %v4135_v8 = vld [vmem:[#allocation5 + $0xc0] sm:$0xf]  ;;  %v5631_v12 = vld [vmem:[#allocation5 + $0xcc] sm:$0xf0]  ;;  %v4408_v17 = vor.u32 %v5699_v10, %v4407_v9 }
  0x60   :  { %v4535_v13 = vld [vmem:[#allocation5 + $0x3e0] sm:$0xf]  ;;  %v4136_v18 = vor.u32 %v5631_v12, %v4135_v8  ;;  %v5695_v22 = vld [vmem:[#allocation5 + $0x2cc] sm:$0xf0] }
  0x61   :  { %626 = vmatpush.bf16.msrb.mxu0 %v3928_v14  ;;  %639 = vmatpush.bf16.msrb.mxu1 %v3932_v15  ;;  %v5731_v14 = vld [vmem:[#allocation5 + $0x3ec] sm:$0xf0]  ;;  %v4263_v15 = vld [vmem:[#allocation5 + $0x1c0] sm:$0xf] }
  0x62   :  { %652 = vmatpush.bf16.msrb.mxu2 %v3936_v16  ;;  %v5663_v16 = vld [vmem:[#allocation5 + $0x1cc] sm:$0xf0]  ;;  %v4536_v19 = vor.u32 %v5731_v14, %v4535_v13  ;;  %v4391_v21 = vld [vmem:[#allocation5 + $0x2c0] sm:$0xf] }
  0x63   :  { %665 = vmatpush.bf16.msrb.mxu3 %v3940_v20  ;;  %v4119_v20 = vld [vmem:[#allocation5 + $0xa0] sm:$0xf]  ;;  %v4264_v23 = vor.u32 %v5663_v16, %v4263_v15  ;;  %v5627_v24 = vld [vmem:[#allocation5 + $0xac] sm:$0xf0]  ;;  %v4392_v29 = vor.u32 %v5695_v22, %v4391_v21 }
  0x64   :  { %v4519_v25 = vld [vmem:[#allocation5 + $0x3c0] sm:$0xf]  ;;  %v4120_v30 = vor.u32 %v5627_v24, %v4119_v20  ;;  %v5691_v34 = vld [vmem:[#allocation5 + $0x2ac] sm:$0xf0] }
  0x65   :  { %627 = vmatpush.bf16.msrb.mxu0 %v3896_v26  ;;  %640 = vmatpush.bf16.msrb.mxu1 %v3900_v27  ;;  %v5727_v26 = vld [vmem:[#allocation5 + $0x3cc] sm:$0xf0]  ;;  %v4247_v27 = vld [vmem:[#allocation5 + $0x1a0] sm:$0xf] }
  0x66   :  { %653 = vmatpush.bf16.msrb.mxu2 %v3904_v28  ;;  %v5659_v28 = vld [vmem:[#allocation5 + $0x1ac] sm:$0xf0]  ;;  %v4520_v31 = vor.u32 %v5727_v26, %v4519_v25  ;;  %v4375_v33 = vld [vmem:[#allocation5 + $0x2a0] sm:$0xf] }
  0x67   :  { %666 = vmatpush.bf16.msrb.mxu3 %v3908_v32  ;;  %v4103_v32 = vld [vmem:[#allocation5 + $0x80] sm:$0xf]  ;;  %v4248_v35 = vor.u32 %v5659_v28, %v4247_v27  ;;  %v5623_v36 = vld [vmem:[#allocation5 + $0x8c] sm:$0xf0]  ;;  %v4376_v41 = vor.u32 %v5691_v34, %v4375_v33 }
  0x68   :  { %v4503_v37 = vld [vmem:[#allocation5 + $0x3a0] sm:$0xf]  ;;  %v4104_v43 = vor.u32 %v5623_v36, %v4103_v32  ;;  %v5687_v46 = vld [vmem:[#allocation5 + $0x28c] sm:$0xf0] }
  0x69   :  { %628 = vmatpush.bf16.msrb.mxu0 %v3864_v38  ;;  %641 = vmatpush.bf16.msrb.mxu1 %v3868_v39  ;;  %v5723_v38 = vld [vmem:[#allocation5 + $0x3ac] sm:$0xf0]  ;;  %v4231_v39 = vld [vmem:[#allocation5 + $0x180] sm:$0xf] }
  0x6a   :  { %654 = vmatpush.bf16.msrb.mxu2 %v3872_v40  ;;  %v5655_v40 = vld [vmem:[#allocation5 + $0x18c] sm:$0xf0]  ;;  %v4087_v42 = vld [vmem:[#allocation5 + $0x60] sm:$0xf] }
  0x6b   :  { %667 = vmatpush.bf16.msrb.mxu3 %v3876_v44  ;;  %v4504_v44 = vor.u32 %v5723_v38, %v4503_v37  ;;  %v4359_v45 = vld [vmem:[#allocation5 + $0x280] sm:$0xf]  ;;  %v4232_v47 = vor.u32 %v5655_v40, %v4231_v39  ;;  %v5719_v50 = vld [vmem:[#allocation5 + $0x38c] sm:$0xf0] }
  0x6c   :  { %v4487_v49 = vld [vmem:[#allocation5 + $0x380] sm:$0xf]  ;;  %v5651_v52 = vld [vmem:[#allocation5 + $0x16c] sm:$0xf0] }
  0x6d   :  { %629 = vmatpush.bf16.msrb.mxu0 %v3832_v51  ;;  %642 = vmatpush.bf16.msrb.mxu1 %v3836_v53  ;;  %v4215_v51 = vld [vmem:[#allocation5 + $0x160] sm:$0xf]  ;;  %v4360_v53 = vor.u32 %v5687_v46, %v4359_v45  ;;  %v5615_v55 = vld [vmem:[#allocation5 + $0x4c] sm:$0xf0]  ;;  %v4488_v59 = vor.u32 %v5719_v50, %v4487_v49 }
  0x6e   :  { %655 = vmatpush.bf16.msrb.mxu2 %v3840_v54  ;;  %v4071_v54 = vld [vmem:[#allocation5 + $0x40] sm:$0xf]  ;;  %v5683_v57 = vld [vmem:[#allocation5 + $0x26c] sm:$0xf0]  ;;  %v4216_v60 = vor.u32 %v5651_v52, %v4215_v51 }
  0x6f   :  { %668 = vmatpush.bf16.msrb.mxu3 %v3844_v58  ;;  %v4343_v56 = vld [vmem:[#allocation5 + $0x260] sm:$0xf]  ;;  %v5715_v62 = vld [vmem:[#allocation5 + $0x36c] sm:$0xf0]  ;;  %v4072_v2 = vor.u32 %v5615_v55, %v4071_v54 }
  0x70   :  { %v4471_v61 = vld [vmem:[#allocation5 + $0x360] sm:$0xf]  ;;  %v5647_v0 = vld [vmem:[#allocation5 + $0x14c] sm:$0xf0] }
  0x71   :  { %630 = vmatpush.bf16.msrb.mxu0 %v3800_v1  ;;  %643 = vmatpush.bf16.msrb.mxu1 %v3804_v4  ;;  %v4199_v63 = vld [vmem:[#allocation5 + $0x140] sm:$0xf]  ;;  %v4344_v1 = vor.u32 %v5683_v57, %v4343_v56  ;;  %v4472_v3 = vor.u32 %v5715_v62, %v4471_v61  ;;  %v5611_v8 = vld [vmem:[#allocation5 + $0x2c] sm:$0xf0] }
  0x72   :  { %656 = vmatpush.bf16.msrb.mxu2 %v3808_v5  ;;  %v4055_v4 = vld [vmem:[#allocation5 + $0x20] sm:$0xf]  ;;  %v5711_v10 = vld [vmem:[#allocation5 + $0x34c] sm:$0xf0] }
  0x73   :  { %669 = vmatpush.bf16.msrb.mxu3 %v3812_v6  ;;  %v4327_v5 = vld [vmem:[#allocation5 + $0x240] sm:$0xf]  ;;  %v5679_v6 = vld [vmem:[#allocation5 + $0x24c] sm:$0xf0]  ;;  %v4056_v15 = vor.u32 %v5611_v8, %v4055_v4 }
  0x74   :  { %631 = vmatmul.bf16.vlgmr.msrb.gmra.mxu0 %v6390_v48  ;;  %644 = vmatmul.bf16.vlgmr.msrb.gmra.mxu1 %v6390_v48  ;;  %v4455_v9 = vld [vmem:[#allocation5 + $0x340] sm:$0xf]  ;;  %v5643_v12 = vld [vmem:[#allocation5 + $0x12c] sm:$0xf0]  ;;  %v4328_v13 = vor.u32 %v5679_v6, %v4327_v5 }
  0x75   :  { %2237 = vmatpush.bf16.msra.mxu0 %v4152_v7  ;;  %2250 = vmatpush.bf16.msra.mxu1 %v4280_v11  ;;  %v4200_v7 = vor.u32 %v5647_v0, %v4199_v63  ;;  %v4183_v11 = vld [vmem:[#allocation5 + $0x120] sm:$0xf]  ;;  %v4456_v16 = vor.u32 %v5711_v10, %v4455_v9  ;;  %v5639_v24 = vld [vmem:[#allocation5 + $0x10c] sm:$0xf0] }
  0x76   :  { %657 = vmatmul.bf16.vlgmr.msrb.gmra.mxu2 %v6390_v48  ;;  %670 = vmatmul.bf16.vlgmr.msrb.gmra.mxu3 %v6390_v48  ;;  %v5619_v48 = vld [vmem:[#allocation5 + $0x6c] sm:$0xf0]  ;;  %v4039_v14 = vld [vmem:[#allocation5] sm:$0xf]  ;;  %v4184_v20 = vor.u32 %v5643_v12, %v4183_v11 }
  0x77   :  { %2263 = vmatpush.bf16.msra.mxu2 %v4408_v17  ;;  %2276 = vmatpush.bf16.msra.mxu3 %v4536_v19  ;;  %v4088_v58 = vor.u32 %v5619_v48, %v4087_v42  ;;  %v5607_v17 = vld [vmem:[#allocation5 + $0xc] sm:$0xf0]  ;;  %v4167_v21 = vld [vmem:[#allocation5 + $0x100] sm:$0xf] }
  0x78   :  { %v5675_v19 = vld [vmem:[#allocation5 + $0x22c] sm:$0xf0]  ;;  %v4439_v22 = vld [vmem:[#allocation5 + $0x320] sm:$0xf]  ;;  %v4168_v36 = vor.u32 %v5639_v24, %v4167_v21 }
  0x79   :  { %2238 = vmatpush.bf16.msra.mxu0 %v4136_v18  ;;  %2251 = vmatpush.bf16.msra.mxu1 %v4264_v23  ;;  %v4311_v18 = vld [vmem:[#allocation5 + $0x220] sm:$0xf]  ;;  %v5707_v23 = vld [vmem:[#allocation5 + $0x32c] sm:$0xf0] }
  0x7a   :  { %v4663_v25 = vld [vmem:[#allocation5 + $0x4e0] sm:$0xf]  ;;  %v5763_v26 = vld [vmem:[#allocation5 + $0x4ec] sm:$0xf0] }
  0x7b   :  { %2264 = vmatpush.bf16.msra.mxu2 %v4392_v29  ;;  %2277 = vmatpush.bf16.msra.mxu3 %v4520_v31  ;;  %v4791_v27 = vld [vmem:[#allocation5 + $0x5e0] sm:$0xf]  ;;  %v5795_v28 = vld [vmem:[#allocation5 + $0x5ec] sm:$0xf0]  ;;  %v4312_v29 = vor.u32 %v5675_v19, %v4311_v18  ;;  %v4440_v31 = vor.u32 %v5707_v23, %v4439_v22  ;;  %v4664_v37 = vor.u32 %v5763_v26, %v4663_v25 }
  0x7c   :  { %v4647_v32 = vld [vmem:[#allocation5 + $0x4c0] sm:$0xf]  ;;  %v5671_v34 = vld [vmem:[#allocation5 + $0x20c] sm:$0xf0] }
  0x7d   :  { %2239 = vmatpush.bf16.msra.mxu0 %v4120_v30  ;;  %2252 = vmatpush.bf16.msra.mxu1 %v4248_v35  ;;  %v4040_v30 = vor.u32 %v5607_v17, %v4039_v14  ;;  %v4295_v33 = vld [vmem:[#allocation5 + $0x200] sm:$0xf]  ;;  %v5703_v38 = vld [vmem:[#allocation5 + $0x30c] sm:$0xf0] }
  0x7e   :  { %v4423_v35 = vld [vmem:[#allocation5 + $0x300] sm:$0xf]  ;;  %v5827_v40 = vld [vmem:[#allocation5 + $0x6ec] sm:$0xf0]  ;;  %v4296_v46 = vor.u32 %v5671_v34, %v4295_v33 }
  0x7f   :  { %2265 = vmatpush.bf16.msra.mxu2 %v4376_v41  ;;  %2278 = vmatpush.bf16.msra.mxu3 %v4504_v44  ;;  %v4919_v39 = vld [vmem:[#allocation5 + $0x6e0] sm:$0xf]  ;;  %v4792_v41 = vor.u32 %v5795_v28, %v4791_v27  ;;  %v5759_v42 = vld [vmem:[#allocation5 + $0x4cc] sm:$0xf0] }
  0x80   :  { %v5047_v48 = vld [vmem:[#allocation5 + $0x7e0] sm:$0xf]  ;;  %v5791_v45 = vld [vmem:[#allocation5 + $0x5cc] sm:$0xf0]  ;;  %v4920_v49 = vor.u32 %v5827_v40, %v4919_v39  ;;  %v4648_v50 = vor.u32 %v5759_v42, %v4647_v32 }
  0x81   :  { %2240 = vmatpush.bf16.msra.mxu0 %v4104_v43  ;;  %2253 = vmatpush.bf16.msra.mxu1 %v4232_v47  ;;  %v5859_v43 = vld [vmem:[#allocation5 + $0x7ec] sm:$0xf0]  ;;  %v4775_v44 = vld [vmem:[#allocation5 + $0x5c0] sm:$0xf]  ;;  %v4424_v47 = vor.u32 %v5703_v38, %v4423_v35 }
  0x82   :  { %v5048_v51 = vor.u32 %v5859_v43, %v5047_v48  ;;  %v4631_v52 = vld [vmem:[#allocation5 + $0x4a0] sm:$0xf]  ;;  %v5823_v54 = vld [vmem:[#allocation5 + $0x6cc] sm:$0xf0]  ;;  %v4776_v55 = vor.u32 %v5791_v45, %v4775_v44 }
  0x83   :  { %2266 = vmatpush.bf16.msra.mxu2 %v4360_v53  ;;  %2279 = vmatpush.bf16.msra.mxu3 %v4488_v59  ;;  %v4903_v53 = vld [vmem:[#allocation5 + $0x6c0] sm:$0xf]  ;;  %v5755_v56 = vld [vmem:[#allocation5 + $0x4ac] sm:$0xf0] }
  0x84   :  { %v5031_v57 = vld [vmem:[#allocation5 + $0x7c0] sm:$0xf]  ;;  %v4904_v61 = vor.u32 %v5823_v54, %v4903_v53  ;;  %v4632_v62 = vor.u32 %v5755_v56, %v4631_v52  ;;  %v5751_v4 = vld [vmem:[#allocation5 + $0x48c] sm:$0xf0] }
  0x85   :  { %2241 = vmatpush.bf16.msra.mxu0 %v4088_v58  ;;  %2254 = vmatpush.bf16.msra.mxu1 %v4216_v60  ;;  %v5855_v58 = vld [vmem:[#allocation5 + $0x7cc] sm:$0xf0]  ;;  %v4759_v59 = vld [vmem:[#allocation5 + $0x5a0] sm:$0xf] }
  0x86   :  { %v5787_v60 = vld [vmem:[#allocation5 + $0x5ac] sm:$0xf0]  ;;  %v5032_v63 = vor.u32 %v5855_v58, %v5031_v57  ;;  %v4615_v0 = vld [vmem:[#allocation5 + $0x480] sm:$0xf] }
  0x87   :  { %2267 = vmatpush.bf16.msra.mxu2 %v4344_v1  ;;  %2280 = vmatpush.bf16.msra.mxu3 %v4472_v3  ;;  %v4887_v1 = vld [vmem:[#allocation5 + $0x6a0] sm:$0xf]  ;;  %v4760_v3 = vor.u32 %v5787_v60, %v4759_v59  ;;  %v5851_v6 = vld [vmem:[#allocation5 + $0x7ac] sm:$0xf0]  ;;  %v4616_v10 = vor.u32 %v5751_v4, %v4615_v0  ;;  %v4153_v4 = vld [vmem:[#allocation5 + $0xf0] sm:$0xf0] }
  0x88   :  { %v5015_v5 = vld [vmem:[#allocation5 + $0x7a0] sm:$0xf]  ;;  %v5783_v8 = vld [vmem:[#allocation5 + $0x58c] sm:$0xf0] }
  0x89   :  { %2242 = vmatpush.bf16.msra.mxu0 %v4072_v2  ;;  %2255 = vmatpush.bf16.msra.mxu1 %v4200_v7  ;;  %v5819_v2 = vld [vmem:[#allocation5 + $0x6ac] sm:$0xf0]  ;;  %v4743_v7 = vld [vmem:[#allocation5 + $0x580] sm:$0xf]  ;;  %v5016_v11 = vor.u32 %v5851_v6, %v5015_v5  ;;  %v5665_v6 = vld [vmem:[#allocation5 + $0x1e4] sm:$0xf] }
  0x8a   :  { %v4888_v9 = vor.u32 %v5819_v2, %v4887_v1  ;;  %v4599_v12 = vld [vmem:[#allocation5 + $0x460] sm:$0xf]  ;;  %v5815_v14 = vld [vmem:[#allocation5 + $0x68c] sm:$0xf0] }
  0x8b   :  { %2268 = vmatpush.bf16.msra.mxu2 %v4328_v13  ;;  %2281 = vmatpush.bf16.msra.mxu3 %v4456_v16  ;;  %v4871_v13 = vld [vmem:[#allocation5 + $0x680] sm:$0xf]  ;;  %v5747_v16 = vld [vmem:[#allocation5 + $0x46c] sm:$0xf0] }
  0x8c   :  { %v4999_v17 = vld [vmem:[#allocation5 + $0x780] sm:$0xf]  ;;  %v5847_v18 = vld [vmem:[#allocation5 + $0x78c] sm:$0xf0]  ;;  %v4872_v21 = vor.u32 %v5815_v14, %v4871_v13  ;;  %v4600_v22 = vor.u32 %v5747_v16, %v4599_v12  ;;  %v5629_v14 = vld [vmem:[#allocation5 + $0xc4] sm:$0xf] }
  0x8d   :  { %2243 = vmatpush.bf16.msra.mxu0 %v4056_v15  ;;  %2256 = vmatpush.bf16.msra.mxu1 %v4184_v20  ;;  %v4744_v15 = vor.u32 %v5783_v8, %v4743_v7  ;;  %v4727_v19 = vld [vmem:[#allocation5 + $0x560] sm:$0xf]  ;;  %v5779_v20 = vld [vmem:[#allocation5 + $0x56c] sm:$0xf0]  ;;  %v5000_v23 = vor.u32 %v5847_v18, %v4999_v17  ;;  %v4281_v7 = vld [vmem:[#allocation5 + $0x1f0] sm:$0xf0] }
  0x8e   :  { %v4583_v24 = vld [vmem:[#allocation5 + $0x440] sm:$0xf]  ;;  %v5811_v26 = vld [vmem:[#allocation5 + $0x66c] sm:$0xf0]  ;;  %v4728_v27 = vor.u32 %v5779_v20, %v4727_v19  ;;  %v4284_v13 = vor.u32 %v5665_v6, %v4281_v7  ;;  %v5661_v17 = vld [vmem:[#allocation5 + $0x1c4] sm:$0xf] }
  0x8f   :  { %2269 = vmatpush.bf16.msra.mxu2 %v4312_v29  ;;  %2282 = vmatpush.bf16.msra.mxu3 %v4440_v31  ;;  %v4855_v25 = vld [vmem:[#allocation5 + $0x660] sm:$0xf]  ;;  %v5743_v28 = vld [vmem:[#allocation5 + $0x44c] sm:$0xf0]  ;;  %v4265_v18 = vld [vmem:[#allocation5 + $0x1d0] sm:$0xf0] }
  0x90   :  { %v4983_v29 = vld [vmem:[#allocation5 + $0x760] sm:$0xf]  ;;  %v5775_v32 = vld [vmem:[#allocation5 + $0x54c] sm:$0xf0]  ;;  %v4856_v33 = vor.u32 %v5811_v26, %v4855_v25  ;;  %v4584_v34 = vor.u32 %v5743_v28, %v4583_v24  ;;  %v5697_v20 = vld [vmem:[#allocation5 + $0x2e4] sm:$0xf]  ;;  %v4268_v24 = vor.u32 %v5661_v17, %v4265_v18 }
  0x91   :  { %2244 = vmatpush.bf16.msra.mxu0 %v4040_v30  ;;  %2257 = vmatpush.bf16.msra.mxu1 %v4168_v36  ;;  %v5843_v30 = vld [vmem:[#allocation5 + $0x76c] sm:$0xf0]  ;;  %v4711_v31 = vld [vmem:[#allocation5 + $0x540] sm:$0xf]  ;;  %v4537_v25 = vld [vmem:[#allocation5 + $0x3f0] sm:$0xf0] }
  0x92   :  { %v4984_v35 = vor.u32 %v5843_v30, %v4983_v29  ;;  %v4712_v36 = vor.u32 %v5775_v32, %v4711_v31  ;;  %v5739_v38 = vld [vmem:[#allocation5 + $0x42c] sm:$0xf0]  ;;  %v4695_v39 = vld [vmem:[#allocation5 + $0x520] sm:$0xf]  ;;  %v5625_v26 = vld [vmem:[#allocation5 + $0xa4] sm:$0xf] }
  0x93   :  { %2270 = vmatpush.bf16.msra.mxu2 %v4296_v46  ;;  %2283 = vmatpush.bf16.msra.mxu3 %v4424_v47  ;;  %v4839_v48 = vld [vmem:[#allocation5 + $0x640] sm:$0xf]  ;;  %v5807_v43 = vld [vmem:[#allocation5 + $0x64c] sm:$0xf0]  ;;  %v5657_v31 = vld [vmem:[#allocation5 + $0x1a4] sm:$0xf] }
  0x94   :  { %v4967_v44 = vld [vmem:[#allocation5 + $0x740] sm:$0xf]  ;;  %v4840_v45 = vor.u32 %v5807_v43, %v4839_v48  ;;  %v5839_v46 = vld [vmem:[#allocation5 + $0x74c] sm:$0xf0]  ;;  %v4249_v32 = vld [vmem:[#allocation5 + $0x1b0] sm:$0xf0] }
  0x95   :  { %2289 = vmatpush.bf16.msrb.mxu0 %v4664_v37  ;;  %2302 = vmatpush.bf16.msrb.mxu1 %v4792_v41  ;;  %v4567_v37 = vld [vmem:[#allocation5 + $0x420] sm:$0xf]  ;;  %v5771_v41 = vld [vmem:[#allocation5 + $0x52c] sm:$0xf0]  ;;  %v4968_v47 = vor.u32 %v5839_v46, %v4967_v44  ;;  %v4252_v48 = vor.u32 %v5657_v31, %v4249_v32  ;;  %v4521_v43 = vld [vmem:[#allocation5 + $0x3d0] sm:$0xf0] }
  0x96   :  { %v4568_v40 = vor.u32 %v5739_v38, %v4567_v37  ;;  %v4696_v42 = vor.u32 %v5771_v41, %v4695_v39  ;;  %v5767_v53 = vld [vmem:[#allocation5 + $0x50c] sm:$0xf0]  ;;  %v4951_v57 = vld [vmem:[#allocation5 + $0x720] sm:$0xf]  ;;  %v5693_v39 = vld [vmem:[#allocation5 + $0x2c4] sm:$0xf] }
  0x97   :  { %2315 = vmatpush.bf16.msrb.mxu2 %v4920_v49  ;;  %2328 = vmatpush.bf16.msrb.mxu3 %v5048_v51  ;;  %v4551_v49 = vld [vmem:[#allocation5 + $0x400] sm:$0xf]  ;;  %v5803_v56 = vld [vmem:[#allocation5 + $0x62c] sm:$0xf0]  ;;  %v5725_v41 = vld [vmem:[#allocation5 + $0x3c4] sm:$0xf] }
  0x98   :  { %v4679_v51 = vld [vmem:[#allocation5 + $0x500] sm:$0xf]  ;;  %v5835_v58 = vld [vmem:[#allocation5 + $0x72c] sm:$0xf0]  ;;  %v5621_v44 = vld [vmem:[#allocation5 + $0x84] sm:$0xf] }
  0x99   :  { %2290 = vmatpush.bf16.msrb.mxu0 %v4648_v50  ;;  %2303 = vmatpush.bf16.msrb.mxu1 %v4776_v55  ;;  %v5735_v50 = vld [vmem:[#allocation5 + $0x40c] sm:$0xf0]  ;;  %v4680_v54 = vor.u32 %v5767_v53, %v4679_v51  ;;  %v4823_v55 = vld [vmem:[#allocation5 + $0x620] sm:$0xf]  ;;  %v4952_v60 = vor.u32 %v5835_v58, %v4951_v57  ;;  %v5653_v46 = vld [vmem:[#allocation5 + $0x184] sm:$0xf] }
  0x9a   :  { %v4552_v52 = vor.u32 %v5735_v50, %v4551_v49  ;;  %v4824_v59 = vor.u32 %v5803_v56, %v4823_v55  ;;  %v4935_v0 = vld [vmem:[#allocation5 + $0x700] sm:$0xf]  ;;  %v5831_v1 = vld [vmem:[#allocation5 + $0x70c] sm:$0xf0]  ;;  %v4524_v50 = vor.u32 %v5725_v41, %v4521_v43  ;;  %v4377_v53 = vld [vmem:[#allocation5 + $0x2b0] sm:$0xf0] }
  0x9b   :  { %2316 = vmatpush.bf16.msrb.mxu2 %v4904_v61  ;;  %2329 = vmatpush.bf16.msrb.mxu3 %v5032_v63  ;;  %v4807_v61 = vld [vmem:[#allocation5 + $0x600] sm:$0xf]  ;;  %v4936_v2 = vor.u32 %v5831_v1, %v4935_v0  ;;  %v4505_v57 = vld [vmem:[#allocation5 + $0x3b0] sm:$0xf0]  ;;  %v5617_v58 = vld [vmem:[#allocation5 + $0x64] sm:$0xf] }
  0x9c   :  { %v4489_v6 = vld [vmem:[#allocation5 + $0x390] sm:$0xf0]  ;;  %v5613_v7 = vld [vmem:[#allocation5 + $0x44] sm:$0xf] }
  0x9d   :  { %2291 = vmatpush.bf16.msrb.mxu0 %v4632_v62  ;;  %2304 = vmatpush.bf16.msrb.mxu1 %v4760_v3  ;;  %v5799_v62 = vld [vmem:[#allocation5 + $0x60c] sm:$0xf0]  ;;  %v5633_v3 = vld [vmem:[#allocation5 + $0xe4] sm:$0xf]  ;;  %v4345_v17 = vld [vmem:[#allocation5 + $0x270] sm:$0xf0] }
  0x9e   :  { %v4808_v63 = vor.u32 %v5799_v62, %v4807_v61  ;;  %v5649_v61 = vld [vmem:[#allocation5 + $0x164] sm:$0xf]  ;;  %v4217_v62 = vld [vmem:[#allocation5 + $0x170] sm:$0xf0] }
  0x9f   :  { %2317 = vmatpush.bf16.msrb.mxu2 %v4888_v9  ;;  %2330 = vmatpush.bf16.msrb.mxu3 %v5016_v11  ;;  %v4156_v11 = vor.u32 %v5633_v3, %v4153_v4  ;;  %v4361_v3 = vld [vmem:[#allocation5 + $0x290] sm:$0xf0]  ;;  %v5717_v4 = vld [vmem:[#allocation5 + $0x384] sm:$0xf] }
  0xa0   :  { %v5713_v18 = vld [vmem:[#allocation5 + $0x364] sm:$0xf]  ;;  %v4457_v32 = vld [vmem:[#allocation5 + $0x350] sm:$0xf0] }
  0xa1   :  { %2292 = vmatpush.bf16.msrb.mxu0 %v4616_v10  ;;  %2305 = vmatpush.bf16.msrb.mxu1 %v4744_v15  ;;  %v4137_v15 = vld [vmem:[#allocation5 + $0xd0] sm:$0xf0] }
  0xa2   :  { %v4140_v19 = vor.u32 %v5629_v14, %v4137_v15  ;;  %v5681_v15 = vld [vmem:[#allocation5 + $0x264] sm:$0xf]  ;;  %v4665_v41 = vld [vmem:[#allocation5 + $0x4f0] sm:$0xf0] }
  0xa3   :  { %2318 = vmatpush.bf16.msrb.mxu2 %v4872_v21  ;;  %2331 = vmatpush.bf16.msrb.mxu3 %v5000_v23  ;;  %v4409_v21 = vld [vmem:[#allocation5 + $0x2f0] sm:$0xf0] }
  0xa4   :  { %v4793_v43 = vld [vmem:[#allocation5 + $0x5f0] sm:$0xf0] }
  0xa5   :  { %2293 = vmatpush.bf16.msrb.mxu0 %v4600_v22  ;;  %2306 = vmatpush.bf16.msrb.mxu1 %v4728_v27  ;;  %v5729_v22 = vld [vmem:[#allocation5 + $0x3e4] sm:$0xf]  ;;  %v4121_v27 = vld [vmem:[#allocation5 + $0xb0] sm:$0xf0] }
  0xa6   :  { %v4540_v37 = vor.u32 %v5729_v22, %v4537_v25  ;;  %v4124_v38 = vor.u32 %v5625_v26, %v4121_v27  ;;  %v4057_v22 = vld [vmem:[#allocation5 + $0x30] sm:$0xf0]  ;;  %v4348_v25 = vor.u32 %v5681_v15, %v4345_v17 }
  0xa7   :  { %2319 = vmatpush.bf16.msrb.mxu2 %v4856_v33  ;;  %2332 = vmatpush.bf16.msrb.mxu3 %v4984_v35  ;;  %v4412_v35 = vor.u32 %v5697_v20, %v4409_v21  ;;  %v4473_v20 = vld [vmem:[#allocation5 + $0x370] sm:$0xf0]  ;;  %v5609_v21 = vld [vmem:[#allocation5 + $0x24] sm:$0xf] }
  0xa8   :  { %v4476_v26 = vor.u32 %v5713_v18, %v4473_v20  ;;  %v4060_v27 = vor.u32 %v5609_v21, %v4057_v22  ;;  %v5753_v18 = vld [vmem:[#allocation5 + $0x4a4] sm:$0xf] }
  0xa9   :  { %2294 = vmatpush.bf16.msrb.mxu0 %v4584_v34  ;;  %2307 = vmatpush.bf16.msrb.mxu1 %v4712_v36 }
  0xab   :  { %2320 = vmatpush.bf16.msrb.mxu2 %v4840_v45  ;;  %2333 = vmatpush.bf16.msrb.mxu3 %v4968_v47  ;;  %v4105_v45 = vld [vmem:[#allocation5 + $0x90] sm:$0xf0] }
  0xac   :  { %v4233_v47 = vld [vmem:[#allocation5 + $0x190] sm:$0xf0]  ;;  %v4108_v51 = vor.u32 %v5621_v44, %v4105_v45 }
  0xad   :  { %2295 = vmatpush.bf16.msrb.mxu0 %v4568_v40  ;;  %2308 = vmatpush.bf16.msrb.mxu1 %v4696_v42  ;;  %v4393_v40 = vld [vmem:[#allocation5 + $0x2d0] sm:$0xf0]  ;;  %v4236_v56 = vor.u32 %v5653_v46, %v4233_v47 }
  0xae   :  { %v4396_v49 = vor.u32 %v5693_v39, %v4393_v40 }
  0xaf   :  { %2321 = vmatpush.bf16.msrb.mxu2 %v4824_v59  ;;  %2334 = vmatpush.bf16.msrb.mxu3 %v4952_v60  ;;  %v4089_v59 = vld [vmem:[#allocation5 + $0x70] sm:$0xf0] }
  0xb0   :  { %v4092_v1 = vor.u32 %v5617_v58, %v4089_v59 }
  0xb1   :  { %2296 = vmatpush.bf16.msrb.mxu0 %v4552_v52  ;;  %2309 = vmatpush.bf16.msrb.mxu1 %v4680_v54  ;;  %v5689_v52 = vld [vmem:[#allocation5 + $0x2a4] sm:$0xf] }
  0xb2   :  { %v5721_v54 = vld [vmem:[#allocation5 + $0x3a4] sm:$0xf] }
  0xb3   :  { %2322 = vmatpush.bf16.msrb.mxu2 %v4808_v63  ;;  %2335 = vmatpush.bf16.msrb.mxu3 %v4936_v2  ;;  %v4380_v63 = vor.u32 %v5689_v52, %v4377_v53  ;;  %v4508_v0 = vor.u32 %v5721_v54, %v4505_v57  ;;  %v5685_v2 = vld [vmem:[#allocation5 + $0x284] sm:$0xf]  ;;  %v4441_v54 = vld [vmem:[#allocation5 + $0x330] sm:$0xf0] }
  0xb4   :  { %v5705_v53 = vld [vmem:[#allocation5 + $0x324] sm:$0xf] }
  0xd1   :  { %v580_v5 = vpop.f32.mrf.mxu0  ;;  %v593_v9 = vpop.f32.mrf.mxu1 }
  0xd2   :  { %v675_v8 = vmax.f32 %v580_v5, 0.0  ;;  %v676_v10 = vmax.f32 %v593_v9, 0.0  ;;  %v4220_v5 = vor.u32 %v5649_v61, %v4217_v62  ;;  %v5645_v9 = vld [vmem:[#allocation5 + $0x144] sm:$0xf]  ;;  %v4649_v61 = vld [vmem:[#allocation5 + $0x4d0] sm:$0xf0] }
  0xd3   :  { %v5789_v62 = vld [vmem:[#allocation5 + $0x5c4] sm:$0xf] }
  0xd4   :  { %v6400_v12 = vpack.c.bf16 %v675_v8, %v675_v8  ;;  %v6402_v16 = vpack.c.bf16 %v676_v10, %v676_v10  ;;  %v4073_v8 = vld [vmem:[#allocation5 + $0x50] sm:$0xf0] }
  0xd5   :  { %v4201_v10 = vld [vmem:[#allocation5 + $0x150] sm:$0xf0]  ;;  %v4076_v14 = vor.u32 %v5613_v7, %v4073_v8 }
  0xd6   :  { %2245 = vmatmul.bf16.vlgmr.msra.gmra.mxu0 %v6400_v12  ;;  %2258 = vmatmul.bf16.vlgmr.msra.gmra.mxu1 %v6402_v16  ;;  %v4921_v8 = vld [vmem:[#allocation5 + $0x6f0] sm:$0xf0] }
  0xd7   :  { %2341 = vmatpush.bf16.msra.mxu0 %v4156_v11  ;;  %2354 = vmatpush.bf16.msra.mxu1 %v4284_v13  ;;  %v4364_v11 = vor.u32 %v5685_v2, %v4361_v3  ;;  %v4492_v13 = vor.u32 %v5717_v4, %v4489_v6  ;;  %v4297_v2 = vld [vmem:[#allocation5 + $0x210] sm:$0xf0]  ;;  %v5701_v3 = vld [vmem:[#allocation5 + $0x304] sm:$0xf] }
  0xd8   :  { %v4425_v4 = vld [vmem:[#allocation5 + $0x310] sm:$0xf0] }
  0xd9   :  { %v619_v29 = vpop.f32.mrf.mxu3  ;;  %v582_v30 = vpop.f32.mrf.mxu0  ;;  %v4428_v22 = vor.u32 %v5701_v3, %v4425_v4  ;;  %v5773_v3 = vld [vmem:[#allocation5 + $0x544] sm:$0xf]  ;;  %v4713_v4 = vld [vmem:[#allocation5 + $0x550] sm:$0xf0] }
  0xda   :  { %v606_v23 = vpop.f32.mrf.mxu2  ;;  %v678_v33 = vmax.f32 %v619_v29, 0.0  ;;  %v595_v34 = vpop.f32.mrf.mxu1  ;;  %v4329_v29 = vld [vmem:[#allocation5 + $0x250] sm:$0xf0]  ;;  %v5709_v30 = vld [vmem:[#allocation5 + $0x344] sm:$0xf] }
  0xdb   :  { %v677_v28 = vmax.f32 %v606_v23, 0.0  ;;  %2342 = vmatpush.bf16.msra.mxu0 %v4140_v19  ;;  %2355 = vmatpush.bf16.msra.mxu1 %v4268_v24  ;;  %v4204_v19 = vor.u32 %v5645_v9, %v4201_v10  ;;  %v5641_v23 = vld [vmem:[#allocation5 + $0x124] sm:$0xf]  ;;  %v4185_v24 = vld [vmem:[#allocation5 + $0x130] sm:$0xf0]  ;;  %v4460_v46 = vor.u32 %v5709_v30, %v4457_v32 }
  0xdc   :  { %v6408_v42 = vpack.c.bf16 %v678_v33, %v678_v33  ;;  %v4188_v31 = vor.u32 %v5641_v23, %v4185_v24  ;;  %v5605_v33 = vld [vmem:[#allocation5 + $0x4] sm:$0xf]  ;;  %v4041_v34 = vld [vmem:[#allocation5 + $0x10] sm:$0xf0] }
  0xdd   :  { %v6406_v36 = vpack.c.bf16 %v677_v28, %v677_v28  ;;  %v5677_v28 = vld [vmem:[#allocation5 + $0x244] sm:$0xf]  ;;  %v4044_v47 = vor.u32 %v5605_v33, %v4041_v34  ;;  %v5049_v10 = vld [vmem:[#allocation5 + $0x7f0] sm:$0xf0] }
  0xde   :  { %2284 = vmatmul.bf16.vlgmr.msra.gmra.mxu3 %v6408_v42  ;;  %v4332_v40 = vor.u32 %v5677_v28, %v4329_v29  ;;  %v5857_v9 = vld [vmem:[#allocation5 + $0x7e4] sm:$0xf]  ;;  %v4761_v24 = vld [vmem:[#allocation5 + $0x5b0] sm:$0xf0] }
  0xdf   :  { %2271 = vmatmul.bf16.vlgmr.msra.gmra.mxu2 %v6406_v36  ;;  %2380 = vmatpush.bf16.msra.mxu3 %v4540_v37  ;;  %v4169_v37 = vld [vmem:[#allocation5 + $0x110] sm:$0xf0]  ;;  %v5785_v23 = vld [vmem:[#allocation5 + $0x5a4] sm:$0xf]  ;;  %v5052_v28 = vor.u32 %v5857_v9, %v5049_v10  ;;  %v4716_v10 = vor.u32 %v5773_v3, %v4713_v4  ;;  %v4127_v3 = vld [vmem:[#allocation5 + $0xa8] sm:$0xf] }
  0xe0   :  { %2367 = vmatpush.bf16.msra.mxu2 %v4412_v35  ;;  %2343 = vmatpush.bf16.msra.mxu0 %v4124_v38  ;;  %v5637_v35 = vld [vmem:[#allocation5 + $0x104] sm:$0xf]  ;;  %v4764_v33 = vor.u32 %v5785_v23, %v4761_v24  ;;  %v5033_v34 = vld [vmem:[#allocation5 + $0x7d0] sm:$0xf0] }
  0xe1   :  { %2356 = vmatpush.bf16.msra.mxu1 %v4252_v48  ;;  %v621_v60 = vpop.f32.mrf.mxu3  ;;  %v5761_v38 = vld [vmem:[#allocation5 + $0x4e4] sm:$0xf]  ;;  %v4172_v52 = vor.u32 %v5637_v35, %v4169_v37  ;;  %v4617_v37 = vld [vmem:[#allocation5 + $0x490] sm:$0xf0] }
  0xe2   :  { %v608_v55 = vpop.f32.mrf.mxu2  ;;  %v5793_v48 = vld [vmem:[#allocation5 + $0x5e4] sm:$0xf] }
  0xe3   :  { %2381 = vmatpush.bf16.msra.mxu3 %v4524_v50  ;;  %v4313_v50 = vld [vmem:[#allocation5 + $0x230] sm:$0xf0]  ;;  %v4796_v58 = vor.u32 %v5793_v48, %v4793_v43  ;;  %v5757_v60 = vld [vmem:[#allocation5 + $0x4c4] sm:$0xf] }
  0xe4   :  { %2368 = vmatpush.bf16.msra.mxu2 %v4396_v49  ;;  %2344 = vmatpush.bf16.msra.mxu0 %v4108_v51  ;;  %v5673_v49 = vld [vmem:[#allocation5 + $0x224] sm:$0xf]  ;;  %v4652_v7 = vor.u32 %v5757_v60, %v4649_v61  ;;  %v4873_v60 = vld [vmem:[#allocation5 + $0x690] sm:$0xf0] }
  0xe5   :  { %2357 = vmatpush.bf16.msra.mxu1 %v4236_v56  ;;  %v4668_v56 = vor.u32 %v5761_v38, %v4665_v41  ;;  %v4316_v59 = vor.u32 %v5673_v49, %v4313_v50  ;;  %v5821_v30 = vld [vmem:[#allocation5 + $0x6c4] sm:$0xf]  ;;  %v5017_v50 = vld [vmem:[#allocation5 + $0x7b0] sm:$0xf0] }
  0xe6   :  { %v5853_v32 = vld [vmem:[#allocation5 + $0x7c4] sm:$0xf] }
  0xe7   :  { %2382 = vmatpush.bf16.msra.mxu3 %v4508_v0  ;;  %v4777_v0 = vld [vmem:[#allocation5 + $0x5d0] sm:$0xf0]  ;;  %v5749_v35 = vld [vmem:[#allocation5 + $0x484] sm:$0xf]  ;;  %v5036_v48 = vor.u32 %v5853_v32, %v5033_v34 }
  0xe8   :  { %2369 = vmatpush.bf16.msra.mxu2 %v4380_v63  ;;  %2345 = vmatpush.bf16.msra.mxu0 %v4092_v1  ;;  %v4444_v63 = vor.u32 %v5705_v53, %v4441_v54  ;;  %v5669_v1 = vld [vmem:[#allocation5 + $0x204] sm:$0xf]  ;;  %v4780_v15 = vor.u32 %v5789_v62, %v4777_v0  ;;  %v4620_v43 = vor.u32 %v5749_v35, %v4617_v37  ;;  %v4729_v54 = vld [vmem:[#allocation5 + $0x570] sm:$0xf0]  ;;  %v5636_v35 = vld [vmem:[#allocation5 + $0xf4] sm:$0xf0] }
  0xe9   :  { %2358 = vmatpush.bf16.msra.mxu1 %v4220_v5  ;;  %v5825_v5 = vld [vmem:[#allocation5 + $0x6e4] sm:$0xf]  ;;  %v4300_v17 = vor.u32 %v5669_v1, %v4297_v2  ;;  %v5001_v0 = vld [vmem:[#allocation5 + $0x790] sm:$0xf0]  ;;  %v4287_v37 = vld [vmem:[#allocation5 + $0x1e8] sm:$0xf] }
  0xea   :  { %v5781_v38 = vld [vmem:[#allocation5 + $0x584] sm:$0xf]  ;;  %v4585_v2 = vld [vmem:[#allocation5 + $0x450] sm:$0xf0] }
  0xeb   :  { %2383 = vmatpush.bf16.msra.mxu3 %v4492_v13  ;;  %v5849_v49 = vld [vmem:[#allocation5 + $0x7a4] sm:$0xf]  ;;  %v4681_v32 = vld [vmem:[#allocation5 + $0x510] sm:$0xf0] }
  0xec   :  { %2370 = vmatpush.bf16.msra.mxu2 %v4364_v11  ;;  %2346 = vmatpush.bf16.msra.mxu0 %v4076_v14  ;;  %v5777_v53 = vld [vmem:[#allocation5 + $0x564] sm:$0xf] }
  0xed   :  { %2359 = vmatpush.bf16.msra.mxu1 %v4204_v19  ;;  %v4633_v19 = vld [vmem:[#allocation5 + $0x4b0] sm:$0xf0]  ;;  %v4732_v62 = vor.u32 %v5777_v53, %v4729_v54  ;;  %v5741_v1 = vld [vmem:[#allocation5 + $0x444] sm:$0xf]  ;;  %v5664_v53 = vld [vmem:[#allocation5 + $0x1d4] sm:$0xf0] }
  0xee   :  { %v4636_v29 = vor.u32 %v5753_v18, %v4633_v19  ;;  %v4588_v9 = vor.u32 %v5741_v1, %v4585_v2  ;;  %v4697_v18 = vld [vmem:[#allocation5 + $0x530] sm:$0xf0]  ;;  %v5837_v23 = vld [vmem:[#allocation5 + $0x744] sm:$0xf]  ;;  %v4543_v1 = vld [vmem:[#allocation5 + $0x3e8] sm:$0xf] }
  0xef   :  { %2384 = vmatpush.bf16.msra.mxu3 %v4476_v26  ;;  %v4924_v26 = vor.u32 %v5825_v5, %v4921_v8  ;;  %v4857_v8 = vld [vmem:[#allocation5 + $0x670] sm:$0xf0]  ;;  %v5732_v2 = vld [vmem:[#allocation5 + $0x3f4] sm:$0xf0] }
  0xf0   :  { %2371 = vmatpush.bf16.msra.mxu2 %v4348_v25  ;;  %2347 = vmatpush.bf16.msra.mxu0 %v4060_v27 }
  0xf1   :  { %v632_v39 = vpop.f32.mrf.mxu0  ;;  %v645_v45 = vpop.f32.mrf.mxu1  ;;  %2360 = vmatpush.bf16.msra.mxu1 %v4188_v31  ;;  %v4905_v31 = vld [vmem:[#allocation5 + $0x6d0] sm:$0xf0] }
  0xf2   :  { %v679_v44 = vmax.f32 %v632_v39, 0.0  ;;  %v680_v51 = vmax.f32 %v645_v45, 0.0  ;;  %v4745_v39 = vld [vmem:[#allocation5 + $0x590] sm:$0xf0] }
  0xf3   :  { %2385 = vmatpush.bf16.msra.mxu3 %v4460_v46  ;;  %v4889_v45 = vld [vmem:[#allocation5 + $0x6b0] sm:$0xf0] }
  0xf4   :  { %v6412_v55 = vpack.c.bf16 %v679_v44, %v679_v44  ;;  %v6414_v57 = vpack.c.bf16 %v680_v51, %v680_v51  ;;  %2372 = vmatpush.bf16.msra.mxu2 %v4332_v40  ;;  %2348 = vmatpush.bf16.msra.mxu0 %v4044_v47  ;;  %v4908_v40 = vor.u32 %v5821_v30, %v4905_v31  ;;  %v5817_v44 = vld [vmem:[#allocation5 + $0x6a4] sm:$0xf]  ;;  %v4553_v30 = vld [vmem:[#allocation5 + $0x410] sm:$0xf0] }
  0xf5   :  { %2361 = vmatpush.bf16.msra.mxu1 %v4172_v52  ;;  %v4748_v47 = vor.u32 %v5781_v38, %v4745_v39  ;;  %v5745_v51 = vld [vmem:[#allocation5 + $0x464] sm:$0xf]  ;;  %v4601_v52 = vld [vmem:[#allocation5 + $0x470] sm:$0xf0]  ;;  %v5668_v38 = vld [vmem:[#allocation5 + $0x1f4] sm:$0xf0] }
  0xf6   :  { %2297 = vmatmul.bf16.vlgmr.msrb.gmra.mxu0 %v6412_v55  ;;  %2310 = vmatmul.bf16.vlgmr.msrb.gmra.mxu1 %v6414_v57  ;;  %v4604_v61 = vor.u32 %v5745_v51, %v4601_v52  ;;  %v5765_v31 = vld [vmem:[#allocation5 + $0x504] sm:$0xf]  ;;  %v5632_v51 = vld [vmem:[#allocation5 + $0xd4] sm:$0xf0]  ;;  %v4271_v52 = vld [vmem:[#allocation5 + $0x1c8] sm:$0xf] }
  0xf7   :  { %2386 = vmatpush.bf16.msra.mxu3 %v4444_v63  ;;  %v5845_v63 = vld [vmem:[#allocation5 + $0x784] sm:$0xf] }
  0xf8   :  { %2393 = vmatpush.bf16.msrb.mxu0 %v4668_v56  ;;  %2373 = vmatpush.bf16.msra.mxu2 %v4316_v59  ;;  %v4892_v56 = vor.u32 %v5817_v44, %v4889_v45  ;;  %v5813_v59 = vld [vmem:[#allocation5 + $0x684] sm:$0xf]  ;;  %v4953_v45 = vld [vmem:[#allocation5 + $0x730] sm:$0xf0] }
  0xf9   :  { %v658_v6 = vpop.f32.mrf.mxu2  ;;  %2406 = vmatpush.bf16.msrb.mxu1 %v4796_v58  ;;  %v671_v13 = vpop.f32.mrf.mxu3  ;;  %v5020_v58 = vor.u32 %v5849_v49, %v5017_v50  ;;  %v4876_v5 = vor.u32 %v5813_v59, %v4873_v60  ;;  %v5833_v44 = vld [vmem:[#allocation5 + $0x724] sm:$0xf]  ;;  %v4143_v49 = vld [vmem:[#allocation5 + $0xc8] sm:$0xf]  ;;  %v4937_v60 = vld [vmem:[#allocation5 + $0x710] sm:$0xf0] }
  0xfa   :  { %v681_v11 = vmax.f32 %v658_v6, 0.0  ;;  %v634_v14 = vpop.f32.mrf.mxu0  ;;  %v682_v20 = vmax.f32 %v671_v13, 0.0  ;;  %v647_v21 = vpop.f32.mrf.mxu1  ;;  %v5004_v6 = vor.u32 %v5845_v63, %v5001_v0  ;;  %v4985_v13 = vld [vmem:[#allocation5 + $0x770] sm:$0xf0]  ;;  %v4956_v54 = vor.u32 %v5833_v44, %v4953_v45  ;;  %v5829_v59 = vld [vmem:[#allocation5 + $0x704] sm:$0xf] }
  0xfb   :  { %2387 = vmatpush.bf16.msra.mxu3 %v4428_v22  ;;  %v5737_v14 = vld [vmem:[#allocation5 + $0x424] sm:$0xf]  ;;  %v4841_v22 = vld [vmem:[#allocation5 + $0x650] sm:$0xf0]  ;;  %v4144_v63 = vor.u32 %v5632_v51, %v4143_v49  ;;  %v4272_v0 = vor.u32 %v5664_v53, %v4271_v52  ;;  %v4495_v44 = vld [vmem:[#allocation5 + $0x388] sm:$0xf] }
  0xfc   :  { %v6418_v25 = vpack.c.bf16 %v681_v11, %v681_v11  ;;  %v6420_v27 = vpack.c.bf16 %v682_v20, %v682_v20  ;;  %2394 = vmatpush.bf16.msrb.mxu0 %v4652_v7  ;;  %2374 = vmatpush.bf16.msra.mxu2 %v4300_v17  ;;  %v5809_v7 = vld [vmem:[#allocation5 + $0x664] sm:$0xf]  ;;  %v5720_v45 = vld [vmem:[#allocation5 + $0x394] sm:$0xf0]  ;;  %v4207_v49 = vld [vmem:[#allocation5 + $0x148] sm:$0xf] }
  0xfd   :  { %2407 = vmatpush.bf16.msrb.mxu1 %v4780_v15  ;;  %v5841_v11 = vld [vmem:[#allocation5 + $0x764] sm:$0xf]  ;;  %v4569_v15 = vld [vmem:[#allocation5 + $0x430] sm:$0xf0]  ;;  %v4860_v19 = vor.u32 %v5809_v7, %v4857_v8  ;;  %v5660_v7 = vld [vmem:[#allocation5 + $0x1b4] sm:$0xf0]  ;;  %v4940_v8 = vor.u32 %v5829_v59, %v4937_v60  ;;  %v4496_v52 = vor.u32 %v5720_v45, %v4495_v44 }
  0xfe   :  { %2323 = vmatmul.bf16.vlgmr.msrb.gmra.mxu2 %v6418_v25  ;;  %2336 = vmatmul.bf16.vlgmr.msrb.gmra.mxu3 %v6420_v27  ;;  %v5769_v17 = vld [vmem:[#allocation5 + $0x524] sm:$0xf]  ;;  %v4988_v20 = vor.u32 %v5841_v11, %v4985_v13  ;;  %v4572_v24 = vor.u32 %v5737_v14, %v4569_v15  ;;  %v4399_v11 = vld [vmem:[#allocation5 + $0x2c8] sm:$0xf]  ;;  %v5696_v13 = vld [vmem:[#allocation5 + $0x2d4] sm:$0xf0] }
  0xff   :  { %2432 = vmatpush.bf16.msrb.mxu3 %v5052_v28  ;;  %v5805_v21 = vld [vmem:[#allocation5 + $0x644] sm:$0xf]  ;;  %v4969_v28 = vld [vmem:[#allocation5 + $0x750] sm:$0xf0]  ;;  %v4351_v53 = vld [vmem:[#allocation5 + $0x268] sm:$0xf] }
 0x100   :  { %2419 = vmatpush.bf16.msrb.mxu2 %v4924_v26  ;;  %2395 = vmatpush.bf16.msrb.mxu0 %v4636_v29  ;;  %v4700_v26 = vor.u32 %v5769_v17, %v4697_v18  ;;  %v5733_v29 = vld [vmem:[#allocation5 + $0x404] sm:$0xf]  ;;  %v4844_v34 = vor.u32 %v5805_v21, %v4841_v22  ;;  %v4972_v39 = vor.u32 %v5837_v23, %v4969_v28  ;;  %v4527_v17 = vld [vmem:[#allocation5 + $0x3c8] sm:$0xf]  ;;  %v5728_v18 = vld [vmem:[#allocation5 + $0x3d4] sm:$0xf0] }
 0x101   :  { %v660_v41 = vpop.f32.mrf.mxu2  ;;  %2408 = vmatpush.bf16.msrb.mxu1 %v4764_v33  ;;  %v673_v46 = vpop.f32.mrf.mxu3  ;;  %v4159_v33 = vld [vmem:[#allocation5 + $0xe8] sm:$0xf]  ;;  %v5656_v22 = vld [vmem:[#allocation5 + $0x194] sm:$0xf0]  ;;  %v4400_v23 = vor.u32 %v5696_v13, %v4399_v11 }
 0x102   :  { %v4825_v41 = vld [vmem:[#allocation5 + $0x630] sm:$0xf0]  ;;  %v4160_v46 = vor.u32 %v5636_v35, %v4159_v33  ;;  %v4239_v21 = vld [vmem:[#allocation5 + $0x188] sm:$0xf]  ;;  %v5692_v28 = vld [vmem:[#allocation5 + $0x2b4] sm:$0xf0] }
 0x103   :  { %2433 = vmatpush.bf16.msrb.mxu3 %v5036_v48  ;;  %v4556_v48 = vor.u32 %v5733_v29, %v4553_v30  ;;  %v4240_v30 = vor.u32 %v5656_v22, %v4239_v21  ;;  %v4095_v33 = vld [vmem:[#allocation5 + $0x68] sm:$0xf]  ;;  %v5716_v60 = vld [vmem:[#allocation5 + $0x374] sm:$0xf0] }
 0x104   :  { %2420 = vmatpush.bf16.msrb.mxu2 %v4908_v40  ;;  %2396 = vmatpush.bf16.msrb.mxu0 %v4620_v43  ;;  %v5801_v40 = vld [vmem:[#allocation5 + $0x624] sm:$0xf]  ;;  %v4684_v43 = vor.u32 %v5765_v31, %v4681_v32  ;;  %v4511_v31 = vld [vmem:[#allocation5 + $0x3a8] sm:$0xf]  ;;  %v5724_v32 = vld [vmem:[#allocation5 + $0x3b4] sm:$0xf0] }
 0x105   :  { %2409 = vmatpush.bf16.msrb.mxu1 %v4748_v47  ;;  %v4288_v47 = vor.u32 %v5668_v38, %v4287_v37  ;;  %v4828_v50 = vor.u32 %v5801_v40, %v4825_v41  ;;  %v4223_v35 = vld [vmem:[#allocation5 + $0x168] sm:$0xf]  ;;  %v5652_v37 = vld [vmem:[#allocation5 + $0x174] sm:$0xf0] }
 0x106   :  { %2349 = vmatmul.bf16.vlgmr.msra.gmra.mxu0 %v6400_v12  ;;  %2362 = vmatmul.bf16.vlgmr.msra.gmra.mxu1 %v6402_v16  ;;  %v4367_v40 = vld [vmem:[#allocation5 + $0x288] sm:$0xf]  ;;  %v5688_v41 = vld [vmem:[#allocation5 + $0x294] sm:$0xf0] }
 0x107   :  { %2434 = vmatpush.bf16.msrb.mxu3 %v5020_v58  ;;  %v4809_v58 = vld [vmem:[#allocation5 + $0x610] sm:$0xf0]  ;;  %v4368_v51 = vor.u32 %v5688_v41, %v4367_v40  ;;  %v4479_v59 = vld [vmem:[#allocation5 + $0x368] sm:$0xf]  ;;  %v5640_v13 = vld [vmem:[#allocation5 + $0x114] sm:$0xf0] }
 0x108   :  { %2421 = vmatpush.bf16.msrb.mxu2 %v4892_v56  ;;  %2397 = vmatpush.bf16.msrb.mxu0 %v4604_v61  ;;  %v5797_v56 = vld [vmem:[#allocation5 + $0x604] sm:$0xf]  ;;  %v4415_v61 = vld [vmem:[#allocation5 + $0x2e8] sm:$0xf]  ;;  %v5676_v22 = vld [vmem:[#allocation5 + $0x234] sm:$0xf0] }
 0x109   :  { %2410 = vmatpush.bf16.msrb.mxu1 %v4732_v62  ;;  %v5700_v62 = vld [vmem:[#allocation5 + $0x2f4] sm:$0xf0]  ;;  %v4812_v4 = vor.u32 %v5797_v56, %v4809_v58  ;;  %v4175_v11 = vld [vmem:[#allocation5 + $0x108] sm:$0xf] }
 0x10a   :  { %v4319_v21 = vld [vmem:[#allocation5 + $0x228] sm:$0xf]  ;;  %v5704_v41 = vld [vmem:[#allocation5 + $0x314] sm:$0xf0] }
 0x10b   :  { %2435 = vmatpush.bf16.msrb.mxu3 %v5004_v6  ;;  %v4255_v6 = vld [vmem:[#allocation5 + $0x1a8] sm:$0xf] }
 0x10c   :  { %2422 = vmatpush.bf16.msrb.mxu2 %v4876_v5  ;;  %2398 = vmatpush.bf16.msrb.mxu0 %v4588_v9  ;;  %v5628_v5 = vld [vmem:[#allocation5 + $0xb4] sm:$0xf0]  ;;  %v4416_v9 = vor.u32 %v5700_v62, %v4415_v61  ;;  %v4256_v15 = vor.u32 %v5660_v7, %v4255_v6  ;;  %v4063_v61 = vld [vmem:[#allocation5 + $0x28] sm:$0xf] }
 0x10d   :  { %2411 = vmatpush.bf16.msrb.mxu1 %v4716_v10  ;;  %v4544_v10 = vor.u32 %v5732_v2, %v4543_v1  ;;  %v4128_v14 = vor.u32 %v5628_v5, %v4127_v3  ;;  %v5612_v62 = vld [vmem:[#allocation5 + $0x34] sm:$0xf0]  ;;  %v4480_v2 = vor.u32 %v5716_v60, %v4479_v59  ;;  %v4335_v3 = vld [vmem:[#allocation5 + $0x248] sm:$0xf] }
 0x10e   :  { %2375 = vmatmul.bf16.vlgmr.msra.gmra.mxu2 %v6406_v36  ;;  %2388 = vmatmul.bf16.vlgmr.msra.gmra.mxu3 %v6408_v42  ;;  %v4463_v5 = vld [vmem:[#allocation5 + $0x348] sm:$0xf]  ;;  %v4064_v6 = vor.u32 %v5612_v62, %v4063_v61  ;;  %v5824_v60 = vld [vmem:[#allocation5 + $0x6d4] sm:$0xf0] }
 0x10f   :  { %2436 = vmatpush.bf16.msrb.mxu3 %v4988_v20  ;;  %v5624_v20 = vld [vmem:[#allocation5 + $0x94] sm:$0xf0]  ;;  %v4431_v40 = vld [vmem:[#allocation5 + $0x308] sm:$0xf] }
 0x110   :  { %2423 = vmatpush.bf16.msrb.mxu2 %v4860_v19  ;;  %2399 = vmatpush.bf16.msrb.mxu0 %v4572_v24  ;;  %v4111_v19 = vld [vmem:[#allocation5 + $0x88] sm:$0xf]  ;;  %v4528_v24 = vor.u32 %v5728_v18, %v4527_v17  ;;  %v5764_v17 = vld [vmem:[#allocation5 + $0x4f4] sm:$0xf0] }
 0x111   :  { %2412 = vmatpush.bf16.msrb.mxu1 %v4700_v26  ;;  %v4383_v26 = vld [vmem:[#allocation5 + $0x2a8] sm:$0xf]  ;;  %v4112_v29 = vor.u32 %v5624_v20, %v4111_v19  ;;  %v5796_v19 = vld [vmem:[#allocation5 + $0x5f4] sm:$0xf0] }
 0x112   :  { %v4384_v38 = vor.u32 %v5692_v28, %v4383_v26  ;;  %v4799_v18 = vld [vmem:[#allocation5 + $0x5e8] sm:$0xf]  ;;  %v5708_v28 = vld [vmem:[#allocation5 + $0x334] sm:$0xf0] }
 0x113   :  { %2437 = vmatpush.bf16.msrb.mxu3 %v4972_v39  ;;  %v4512_v39 = vor.u32 %v5724_v32, %v4511_v31  ;;  %v4447_v26 = vld [vmem:[#allocation5 + $0x328] sm:$0xf]  ;;  %v4320_v32 = vor.u32 %v5676_v22, %v4319_v21  ;;  %v5816_v22 = vld [vmem:[#allocation5 + $0x694] sm:$0xf0] }
 0x114   :  { %2424 = vmatpush.bf16.msrb.mxu2 %v4844_v34  ;;  %2400 = vmatpush.bf16.msrb.mxu0 %v4556_v48  ;;  %v5620_v34 = vld [vmem:[#allocation5 + $0x74] sm:$0xf0]  ;;  %v4655_v31 = vld [vmem:[#allocation5 + $0x4c8] sm:$0xf] }
 0x115   :  { %2413 = vmatpush.bf16.msrb.mxu1 %v4684_v43  ;;  %v4096_v48 = vor.u32 %v5620_v34, %v4095_v33  ;;  %v4224_v43 = vor.u32 %v5652_v37, %v4223_v35  ;;  %v5760_v33 = vld [vmem:[#allocation5 + $0x4d4] sm:$0xf0]  ;;  %v4783_v34 = vld [vmem:[#allocation5 + $0x5c8] sm:$0xf]  ;;  %v4448_v37 = vor.u32 %v5708_v28, %v4447_v26 }
 0x116   :  { %v5792_v35 = vld [vmem:[#allocation5 + $0x5d4] sm:$0xf0]  ;;  %v4656_v44 = vor.u32 %v5760_v33, %v4655_v31  ;;  %v4911_v59 = vld [vmem:[#allocation5 + $0x6c8] sm:$0xf] }
 0x117   :  { %2438 = vmatpush.bf16.msrb.mxu3 %v4956_v54  ;;  %2401 = vmatmul.bf16.vlgmr.msrb.gmra.mxu0 %v6412_v55  ;;  %v5684_v54 = vld [vmem:[#allocation5 + $0x274] sm:$0xf0]  ;;  %v4784_v45 = vor.u32 %v5792_v35, %v4783_v34  ;;  %v5039_v62 = vld [vmem:[#allocation5 + $0x7c8] sm:$0xf] }
 0x118   :  { %2445 = vmatpush.bf16.msra.mxu0 %v4160_v46  ;;  %2425 = vmatpush.bf16.msrb.mxu2 %v4828_v50  ;;  %v4079_v46 = vld [vmem:[#allocation5 + $0x48] sm:$0xf]  ;;  %v5648_v50 = vld [vmem:[#allocation5 + $0x154] sm:$0xf0]  ;;  %v4352_v1 = vor.u32 %v5684_v54, %v4351_v53 }
 0x119   :  { %2458 = vmatpush.bf16.msra.mxu1 %v4288_v47  ;;  %v5616_v47 = vld [vmem:[#allocation5 + $0x54] sm:$0xf0]  ;;  %v4208_v58 = vor.u32 %v5648_v50, %v4207_v49  ;;  %v4639_v50 = vld [vmem:[#allocation5 + $0x4a8] sm:$0xf] }
 0x11a   :  { %2414 = vmatmul.bf16.vlgmr.msrb.gmra.mxu1 %v6414_v57  ;;  %v4080_v56 = vor.u32 %v5616_v47, %v4079_v46  ;;  %v5055_v46 = vld [vmem:[#allocation5 + $0x7e8] sm:$0xf]  ;;  %v5860_v47 = vld [vmem:[#allocation5 + $0x7f4] sm:$0xf0] }
 0x11b   :  { %2439 = vmatpush.bf16.msrb.mxu3 %v4940_v8  ;;  %v5712_v8 = vld [vmem:[#allocation5 + $0x354] sm:$0xf0]  ;;  %v4767_v54 = vld [vmem:[#allocation5 + $0x5a8] sm:$0xf] }
 0x11c   :  { %2446 = vmatpush.bf16.msra.mxu0 %v4144_v63  ;;  %2426 = vmatpush.bf16.msrb.mxu2 %v4812_v4  ;;  %v4191_v63 = vld [vmem:[#allocation5 + $0x128] sm:$0xf]  ;;  %v5680_v4 = vld [vmem:[#allocation5 + $0x254] sm:$0xf0]  ;;  %v4464_v20 = vor.u32 %v5712_v8, %v4463_v5 }
 0x11d   :  { %2459 = vmatpush.bf16.msra.mxu1 %v4272_v0  ;;  %v5644_v0 = vld [vmem:[#allocation5 + $0x134] sm:$0xf0]  ;;  %v4879_v21 = vld [vmem:[#allocation5 + $0x688] sm:$0xf] }
 0x11e   :  { %2440 = vmatmul.bf16.vlgmr.msrb.gmra.mxu3 %v6420_v27  ;;  %v4192_v7 = vor.u32 %v5644_v0, %v4191_v63  ;;  %v5856_v63 = vld [vmem:[#allocation5 + $0x7d4] sm:$0xf0]  ;;  %v4880_v31 = vor.u32 %v5816_v22, %v4879_v21  ;;  %v4863_v35 = vld [vmem:[#allocation5 + $0x668] sm:$0xf] }
 0x11f   :  { %2484 = vmatpush.bf16.msra.mxu3 %v4544_v10  ;;  %2427 = vmatmul.bf16.vlgmr.msrb.gmra.mxu2 %v6418_v25  ;;  %v5608_v10 = vld [vmem:[#allocation5 + $0x14] sm:$0xf0]  ;;  %v4943_v21 = vld [vmem:[#allocation5 + $0x708] sm:$0xf] }
 0x120   :  { %2471 = vmatpush.bf16.msra.mxu2 %v4416_v9  ;;  %2447 = vmatpush.bf16.msra.mxu0 %v4128_v14  ;;  %v4047_v9 = vld [vmem:[#allocation5 + $0x8] sm:$0xf]  ;;  %v5784_v5 = vld [vmem:[#allocation5 + $0x594] sm:$0xf0] }
 0x121   :  { %2460 = vmatpush.bf16.msra.mxu1 %v4256_v15  ;;  %v4671_v14 = vld [vmem:[#allocation5 + $0x4e8] sm:$0xf]  ;;  %v4336_v15 = vor.u32 %v5680_v4, %v4335_v3  ;;  %v4912_v3 = vor.u32 %v5824_v60, %v4911_v59  ;;  %v5820_v8 = vld [vmem:[#allocation5 + $0x6b4] sm:$0xf0] }
 0x122   :  { %v4751_v4 = vld [vmem:[#allocation5 + $0x588] sm:$0xf]  ;;  %v5848_v26 = vld [vmem:[#allocation5 + $0x794] sm:$0xf0] }
 0x123   :  { %2485 = vmatpush.bf16.msra.mxu3 %v4528_v24  ;;  %v4176_v24 = vor.u32 %v5640_v13, %v4175_v11  ;;  %v5852_v11 = vld [vmem:[#allocation5 + $0x7b4] sm:$0xf0]  ;;  %v4752_v13 = vor.u32 %v5784_v5, %v4751_v4  ;;  %v4687_v59 = vld [vmem:[#allocation5 + $0x508] sm:$0xf] }
 0x124   :  { %2472 = vmatpush.bf16.msra.mxu2 %v4400_v23  ;;  %2448 = vmatpush.bf16.msra.mxu0 %v4112_v29  ;;  %v4048_v23 = vor.u32 %v5608_v10, %v4047_v9  ;;  %v4672_v29 = vor.u32 %v5764_v17, %v4671_v14  ;;  %v5023_v10 = vld [vmem:[#allocation5 + $0x7a8] sm:$0xf]  ;;  %v5776_v33 = vld [vmem:[#allocation5 + $0x554] sm:$0xf0] }
 0x125   :  { %2461 = vmatpush.bf16.msra.mxu1 %v4240_v30  ;;  %v4800_v30 = vor.u32 %v5796_v19, %v4799_v18  ;;  %v4607_v14 = vld [vmem:[#allocation5 + $0x468] sm:$0xf]  ;;  %v5780_v19 = vld [vmem:[#allocation5 + $0x574] sm:$0xf0] }
 0x126   :  { %v4735_v18 = vld [vmem:[#allocation5 + $0x568] sm:$0xf]  ;;  %v5768_v60 = vld [vmem:[#allocation5 + $0x514] sm:$0xf0] }
 0x127   :  { %2486 = vmatpush.bf16.msra.mxu3 %v4512_v39  ;;  %v5672_v39 = vld [vmem:[#allocation5 + $0x214] sm:$0xf0]  ;;  %v4736_v28 = vor.u32 %v5780_v19, %v4735_v18  ;;  %v4815_v19 = vld [vmem:[#allocation5 + $0x608] sm:$0xf] }
 0x128   :  { %2473 = vmatpush.bf16.msra.mxu2 %v4384_v38  ;;  %2449 = vmatpush.bf16.msra.mxu0 %v4096_v48  ;;  %v4303_v38 = vld [vmem:[#allocation5 + $0x208] sm:$0xf]  ;;  %v5804_v4 = vld [vmem:[#allocation5 + $0x634] sm:$0xf0] }
 0x129   :  { %2462 = vmatpush.bf16.msra.mxu1 %v4224_v43  ;;  %v4927_v48 = vld [vmem:[#allocation5 + $0x6e8] sm:$0xf]  ;;  %v5828_v43 = vld [vmem:[#allocation5 + $0x6f4] sm:$0xf0]  ;;  %v4304_v49 = vor.u32 %v5672_v39, %v4303_v38 }
 0x12a   :  { %v4928_v53 = vor.u32 %v5828_v43, %v4927_v48  ;;  %v4991_v39 = vld [vmem:[#allocation5 + $0x768] sm:$0xf]  ;;  %v5740_v43 = vld [vmem:[#allocation5 + $0x434] sm:$0xf0] }
 0x12b   :  { %2487 = vmatpush.bf16.msra.mxu3 %v4496_v52  ;;  %v4432_v52 = vor.u32 %v5704_v41, %v4431_v40  ;;  %v5844_v40 = vld [vmem:[#allocation5 + $0x774] sm:$0xf0]  ;;  %v4575_v48 = vld [vmem:[#allocation5 + $0x428] sm:$0xf] }
 0x12c   :  { %2474 = vmatpush.bf16.msra.mxu2 %v4368_v51  ;;  %2450 = vmatpush.bf16.msra.mxu0 %v4080_v56  ;;  %v5756_v51 = vld [vmem:[#allocation5 + $0x4b4] sm:$0xf0] }
 0x12d   :  { %2463 = vmatpush.bf16.msra.mxu1 %v4208_v58  ;;  %v5788_v56 = vld [vmem:[#allocation5 + $0x5b4] sm:$0xf0]  ;;  %v5056_v58 = vor.u32 %v5860_v47, %v5055_v46  ;;  %v4640_v61 = vor.u32 %v5756_v51, %v4639_v50  ;;  %v4992_v47 = vor.u32 %v5844_v40, %v4991_v39  ;;  %v4576_v51 = vor.u32 %v5740_v43, %v4575_v48  ;;  %v5694_v40 = vld [vmem:[#allocation5 + $0x2cc] sm:$0xf] }
 0x12e   :  { %v4768_v0 = vor.u32 %v5788_v56, %v4767_v54  ;;  %v5772_v46 = vld [vmem:[#allocation5 + $0x534] sm:$0xf0]  ;;  %v4559_v54 = vld [vmem:[#allocation5 + $0x408] sm:$0xf]  ;;  %v5726_v43 = vld [vmem:[#allocation5 + $0x3cc] sm:$0xf] }
 0x12f   :  { %2488 = vmatpush.bf16.msra.mxu3 %v4480_v2  ;;  %v5752_v2 = vld [vmem:[#allocation5 + $0x494] sm:$0xf0] }
 0x130   :  { %2475 = vmatpush.bf16.msra.mxu2 %v4352_v1  ;;  %2451 = vmatpush.bf16.msra.mxu0 %v4064_v6  ;;  %v4623_v1 = vld [vmem:[#allocation5 + $0x488] sm:$0xf]  ;;  %v5040_v6 = vor.u32 %v5856_v63, %v5039_v62  ;;  %v5808_v50 = vld [vmem:[#allocation5 + $0x654] sm:$0xf0]  ;;  %v5634_v62 = vld [vmem:[#allocation5 + $0xec] sm:$0xf] }
 0x131   :  { %2464 = vmatpush.bf16.msra.mxu1 %v4192_v7  ;;  %v4895_v7 = vld [vmem:[#allocation5 + $0x6a8] sm:$0xf]  ;;  %v4624_v9 = vor.u32 %v5752_v2, %v4623_v1  ;;  %v4161_v63 = vld [vmem:[#allocation5 + $0xf8] sm:$0xf0]  ;;  %v5832_v22 = vld [vmem:[#allocation5 + $0x714] sm:$0xf0] }
 0x132   :  { %v4896_v17 = vor.u32 %v5820_v8, %v4895_v7  ;;  %v4289_v2 = vld [vmem:[#allocation5 + $0x1f8] sm:$0xf0]  ;;  %v5836_v7 = vld [vmem:[#allocation5 + $0x734] sm:$0xf0]  ;;  %v4688_v8 = vor.u32 %v5768_v60, %v4687_v59  ;;  %v5722_v60 = vld [vmem:[#allocation5 + $0x3ac] sm:$0xf] }
 0x133   :  { %2489 = vmatpush.bf16.msra.mxu3 %v4464_v20  ;;  %v5024_v20 = vor.u32 %v5852_v11, %v5023_v10  ;;  %v5630_v10 = vld [vmem:[#allocation5 + $0xcc] sm:$0xf] }
 0x134   :  { %2476 = vmatpush.bf16.msra.mxu2 %v4336_v15  ;;  %2452 = vmatpush.bf16.msra.mxu0 %v4048_v23  ;;  %v5748_v15 = vld [vmem:[#allocation5 + $0x474] sm:$0xf0] }
 0x135   :  { %2465 = vmatpush.bf16.msra.mxu1 %v4176_v24  ;;  %v4608_v23 = vor.u32 %v5748_v15, %v4607_v14  ;;  %v5007_v24 = vld [vmem:[#allocation5 + $0x788] sm:$0xf]  ;;  %v4145_v14 = vld [vmem:[#allocation5 + $0xd8] sm:$0xf0]  ;;  %v5662_v15 = vld [vmem:[#allocation5 + $0x1cc] sm:$0xf] }
 0x136   :  { %v5008_v34 = vor.u32 %v5848_v26, %v5007_v24  ;;  %v4417_v24 = vld [vmem:[#allocation5 + $0x2f8] sm:$0xf0]  ;;  %v4148_v26 = vor.u32 %v5630_v10, %v4145_v14 }
 0x137   :  { %2490 = vmatpush.bf16.msra.mxu3 %v4448_v37  ;;  %2453 = vmatmul.bf16.vlgmr.msra.gmra.mxu0 %v6400_v12  ;;  %v5812_v37 = vld [vmem:[#allocation5 + $0x674] sm:$0xf0] }
 0x138   :  { %2497 = vmatpush.bf16.msrb.mxu0 %v4672_v29  ;;  %2477 = vmatpush.bf16.msra.mxu2 %v4320_v32  ;;  %v4591_v29 = vld [vmem:[#allocation5 + $0x448] sm:$0xf] }
 0x139   :  { %2510 = vmatpush.bf16.msrb.mxu1 %v4800_v30  ;;  %v5744_v30 = vld [vmem:[#allocation5 + $0x454] sm:$0xf0]  ;;  %v4719_v32 = vld [vmem:[#allocation5 + $0x548] sm:$0xf] }
 0x13a   :  { %2466 = vmatmul.bf16.vlgmr.msra.gmra.mxu1 %v6402_v16  ;;  %v4592_v38 = vor.u32 %v5744_v30, %v4591_v29  ;;  %v4720_v41 = vor.u32 %v5776_v33, %v4719_v32  ;;  %v4545_v29 = vld [vmem:[#allocation5 + $0x3f8] sm:$0xf0]  ;;  %v5626_v32 = vld [vmem:[#allocation5 + $0xac] sm:$0xf] }
 0x13b   :  { %2491 = vmatpush.bf16.msra.mxu3 %v4432_v52  ;;  %v4975_v52 = vld [vmem:[#allocation5 + $0x748] sm:$0xf]  ;;  %v4129_v33 = vld [vmem:[#allocation5 + $0xb8] sm:$0xf0] }
 0x13c   :  { %2498 = vmatpush.bf16.msrb.mxu0 %v4656_v44  ;;  %2478 = vmatpush.bf16.msra.mxu2 %v4304_v49  ;;  %v4864_v44 = vor.u32 %v5812_v37, %v4863_v35  ;;  %v4847_v49 = vld [vmem:[#allocation5 + $0x648] sm:$0xf]  ;;  %v5658_v37 = vld [vmem:[#allocation5 + $0x1ac] sm:$0xf]  ;;  %v4132_v48 = vor.u32 %v5626_v32, %v4129_v33  ;;  %v4193_v33 = vld [vmem:[#allocation5 + $0x138] sm:$0xf0] }
 0x13d   :  { %2511 = vmatpush.bf16.msrb.mxu1 %v4784_v45  ;;  %v4703_v45 = vld [vmem:[#allocation5 + $0x528] sm:$0xf]  ;;  %v5642_v32 = vld [vmem:[#allocation5 + $0x12c] sm:$0xf] }
 0x13e   :  { %2492 = vmatmul.bf16.vlgmr.msra.gmra.mxu3 %v6408_v42  ;;  %v4704_v56 = vor.u32 %v5772_v46, %v4703_v45  ;;  %v5622_v46 = vld [vmem:[#allocation5 + $0x8c] sm:$0xf] }
 0x13f   :  { %2536 = vmatpush.bf16.msrb.mxu3 %v5056_v58  ;;  %2479 = vmatmul.bf16.vlgmr.msra.gmra.mxu2 %v6406_v36  ;;  %v5736_v58 = vld [vmem:[#allocation5 + $0x414] sm:$0xf0] }
 0x140   :  { %2523 = vmatpush.bf16.msrb.mxu2 %v4928_v53  ;;  %2499 = vmatpush.bf16.msrb.mxu0 %v4640_v61  ;;  %v5840_v53 = vld [vmem:[#allocation5 + $0x754] sm:$0xf0]  ;;  %v4848_v61 = vor.u32 %v5808_v50, %v4847_v49  ;;  %v4560_v5 = vor.u32 %v5736_v58, %v4559_v54  ;;  %v4385_v58 = vld [vmem:[#allocation5 + $0x2b8] sm:$0xf0] }
 0x141   :  { %2512 = vmatpush.bf16.msrb.mxu1 %v4768_v0  ;;  %v5666_v0 = vld [vmem:[#allocation5 + $0x1ec] sm:$0xf]  ;;  %v4976_v1 = vor.u32 %v5840_v53, %v4975_v52  ;;  %v4241_v52 = vld [vmem:[#allocation5 + $0x198] sm:$0xf0] }
 0x142   :  { %v4292_v11 = vor.u32 %v5666_v0, %v4289_v2  ;;  %v4097_v0 = vld [vmem:[#allocation5 + $0x78] sm:$0xf0]  ;;  %v5650_v2 = vld [vmem:[#allocation5 + $0x16c] sm:$0xf] }
 0x143   :  { %2537 = vmatpush.bf16.msrb.mxu3 %v5040_v6  ;;  %v4959_v6 = vld [vmem:[#allocation5 + $0x728] sm:$0xf] }
 0x144   :  { %2524 = vmatpush.bf16.msrb.mxu2 %v4912_v3  ;;  %2500 = vmatpush.bf16.msrb.mxu0 %v4624_v9  ;;  %v4831_v3 = vld [vmem:[#allocation5 + $0x628] sm:$0xf]  ;;  %v4164_v9 = vor.u32 %v5634_v62, %v4161_v63  ;;  %v4960_v18 = vor.u32 %v5836_v7, %v4959_v6  ;;  %v5618_v63 = vld [vmem:[#allocation5 + $0x6c] sm:$0xf]  ;;  %v4369_v6 = vld [vmem:[#allocation5 + $0x298] sm:$0xf0] }
 0x145   :  { %2513 = vmatpush.bf16.msrb.mxu1 %v4752_v13  ;;  %v4832_v13 = vor.u32 %v5804_v4, %v4831_v3  ;;  %v4225_v3 = vld [vmem:[#allocation5 + $0x178] sm:$0xf0]  ;;  %v4100_v7 = vor.u32 %v5618_v63, %v4097_v0 }
 0x146   :  { %v4228_v10 = vor.u32 %v5650_v2, %v4225_v3  ;;  %v4449_v63 = vld [vmem:[#allocation5 + $0x338] sm:$0xf0]  ;;  %v5758_v2 = vld [vmem:[#allocation5 + $0x4cc] sm:$0xf] }
 0x147   :  { %2538 = vmatpush.bf16.msrb.mxu3 %v5024_v20  ;;  %v5800_v20 = vld [vmem:[#allocation5 + $0x614] sm:$0xf0] }
 0x148   :  { %2525 = vmatpush.bf16.msrb.mxu2 %v4896_v17  ;;  %2501 = vmatpush.bf16.msrb.mxu0 %v4608_v23  ;;  %v4273_v17 = vld [vmem:[#allocation5 + $0x1d8] sm:$0xf0]  ;;  %v5698_v23 = vld [vmem:[#allocation5 + $0x2ec] sm:$0xf] }
 0x149   :  { %2514 = vmatpush.bf16.msrb.mxu1 %v4736_v28  ;;  %v5730_v28 = vld [vmem:[#allocation5 + $0x3ec] sm:$0xf]  ;;  %v4276_v30 = vor.u32 %v5662_v15, %v4273_v17  ;;  %v4420_v35 = vor.u32 %v5698_v23, %v4417_v24 }
 0x14a   :  { %v4548_v39 = vor.u32 %v5730_v28, %v4545_v29  ;;  %v5646_v17 = vld [vmem:[#allocation5 + $0x14c] sm:$0xf] }
 0x14b   :  { %2539 = vmatpush.bf16.msrb.mxu3 %v5008_v34  ;;  %v4944_v34 = vor.u32 %v5832_v22, %v4943_v21  ;;  %v5682_v21 = vld [vmem:[#allocation5 + $0x26c] sm:$0xf]  ;;  %v4353_v22 = vld [vmem:[#allocation5 + $0x278] sm:$0xf0] }
 0x14c   :  { %2526 = vmatpush.bf16.msrb.mxu2 %v4880_v31  ;;  %2502 = vmatpush.bf16.msrb.mxu0 %v4592_v38  ;;  %v4816_v31 = vor.u32 %v5800_v20, %v4815_v19  ;;  %v4257_v38 = vld [vmem:[#allocation5 + $0x1b8] sm:$0xf0]  ;;  %v5714_v24 = vld [vmem:[#allocation5 + $0x36c] sm:$0xf] }
 0x14d   :  { %2515 = vmatpush.bf16.msrb.mxu1 %v4720_v41  ;;  %v4401_v41 = vld [vmem:[#allocation5 + $0x2d8] sm:$0xf0]  ;;  %v4260_v45 = vor.u32 %v5658_v37, %v4257_v38  ;;  %v5610_v29 = vld [vmem:[#allocation5 + $0x2c] sm:$0xf] }
 0x14e   :  { %v4404_v50 = vor.u32 %v5694_v40, %v4401_v41  ;;  %v5678_v37 = vld [vmem:[#allocation5 + $0x24c] sm:$0xf]  ;;  %v4337_v38 = vld [vmem:[#allocation5 + $0x258] sm:$0xf0] }
 0x14f   :  { %2540 = vmatpush.bf16.msrb.mxu3 %v4992_v47  ;;  %v4113_v47 = vld [vmem:[#allocation5 + $0x98] sm:$0xf0]  ;;  %v5710_v41 = vld [vmem:[#allocation5 + $0x34c] sm:$0xf] }
 0x150   :  { %2527 = vmatpush.bf16.msrb.mxu2 %v4864_v44  ;;  %2503 = vmatpush.bf16.msrb.mxu0 %v4576_v51  ;;  %v4529_v44 = vld [vmem:[#allocation5 + $0x3d8] sm:$0xf0]  ;;  %v5654_v51 = vld [vmem:[#allocation5 + $0x18c] sm:$0xf]  ;;  %v4116_v59 = vor.u32 %v5622_v46, %v4113_v47 }
 0x151   :  { %2516 = vmatpush.bf16.msrb.mxu1 %v4704_v56  ;;  %v4532_v53 = vor.u32 %v5726_v43, %v4529_v44  ;;  %v5690_v56 = vld [vmem:[#allocation5 + $0x2ac] sm:$0xf]  ;;  %v4244_v62 = vor.u32 %v5654_v51, %v4241_v52  ;;  %v4196_v44 = vor.u32 %v5642_v32, %v4193_v33  ;;  %v4177_v47 = vld [vmem:[#allocation5 + $0x118] sm:$0xf0] }
 0x152   :  { %v5606_v43 = vld [vmem:[#allocation5 + $0xc] sm:$0xf]  ;;  %v4673_v52 = vld [vmem:[#allocation5 + $0x4f8] sm:$0xf0] }
 0x153   :  { %2541 = vmatpush.bf16.msrb.mxu3 %v4976_v1  ;;  %v6438_v49 = vpop.f32.mrf.mxu0  ;;  %v6440_v54 = vpop.f32.mrf.mxu1  ;;  %v4388_v1 = vor.u32 %v5690_v56, %v4385_v58  ;;  %v5638_v46 = vld [vmem:[#allocation5 + $0x10c] sm:$0xf]  ;;  %v4801_v58 = vld [vmem:[#allocation5 + $0x5f8] sm:$0xf0] }
 0x154   :  { %2528 = vmatpush.bf16.msrb.mxu2 %v4848_v61  ;;  %2504 = vmatpush.bf16.msrb.mxu0 %v4560_v5  ;;  %v4513_v61 = vld [vmem:[#allocation5 + $0x3b8] sm:$0xf0]  ;;  %v5686_v5 = vld [vmem:[#allocation5 + $0x28c] sm:$0xf]  ;;  %v4180_v0 = vor.u32 %v5638_v46, %v4177_v47 }
 0x155   :  { %2517 = vmatpush.bf16.msrb.mxu1 %v4688_v8  ;;  %v4516_v4 = vor.u32 %v5722_v60, %v4513_v61  ;;  %v5718_v8 = vld [vmem:[#allocation5 + $0x38c] sm:$0xf]  ;;  %v4372_v15 = vor.u32 %v5686_v5, %v4369_v6  ;;  %v4321_v60 = vld [vmem:[#allocation5 + $0x238] sm:$0xf0] }
 0x156   :  { %v5762_v51 = vld [vmem:[#allocation5 + $0x4ec] sm:$0xf]  ;;  %v4657_v5 = vld [vmem:[#allocation5 + $0x4d8] sm:$0xf0] }
 0x157   :  { %2542 = vmatpush.bf16.msrb.mxu3 %v4960_v18  ;;  %2505 = vmatmul.bf16.vlgmr.msrb.gmra.mxu0 %v6412_v55  ;;  %v4209_v18 = vld [vmem:[#allocation5 + $0x158] sm:$0xf0]  ;;  %v5790_v6 = vld [vmem:[#allocation5 + $0x5cc] sm:$0xf] }
 0x158   :  { %2549 = vmatpush.bf16.msra.mxu0 %v4164_v9  ;;  %2529 = vmatpush.bf16.msrb.mxu2 %v4832_v13  ;;  %v4497_v9 = vld [vmem:[#allocation5 + $0x398] sm:$0xf0]  ;;  %v4212_v28 = vor.u32 %v5646_v17, %v4209_v18  ;;  %v5826_v17 = vld [vmem:[#allocation5 + $0x6ec] sm:$0xf] }
 0x159   :  { %2562 = vmatpush.bf16.msra.mxu1 %v4292_v11  ;;  %v5614_v11 = vld [vmem:[#allocation5 + $0x4c] sm:$0xf]  ;;  %v4081_v13 = vld [vmem:[#allocation5 + $0x58] sm:$0xf0]  ;;  %v4500_v19 = vor.u32 %v5718_v8, %v4497_v9 }
 0x15a   :  { %2518 = vmatmul.bf16.vlgmr.msrb.gmra.mxu1 %v6414_v57  ;;  %v4084_v23 = vor.u32 %v5614_v11, %v4081_v13  ;;  %v4305_v11 = vld [vmem:[#allocation5 + $0x218] sm:$0xf0]  ;;  %v5702_v13 = vld [vmem:[#allocation5 + $0x30c] sm:$0xf] }
 0x15b   :  { %2543 = vmatpush.bf16.msrb.mxu3 %v4944_v34  ;;  %v2248_v14 = vpop.f32.mrf.mxu0  ;;  %v2261_v20 = vpop.f32.mrf.mxu1  ;;  %v4929_v18 = vld [vmem:[#allocation5 + $0x6f8] sm:$0xf0]  ;;  %v5822_v33 = vld [vmem:[#allocation5 + $0x6cc] sm:$0xf] }
 0x15c   :  { %2550 = vmatpush.bf16.msra.mxu0 %v4148_v26  ;;  %2530 = vmatpush.bf16.msrb.mxu2 %v4816_v31  ;;  %v4481_v26 = vld [vmem:[#allocation5 + $0x378] sm:$0xf0]  ;;  %v4356_v31 = vor.u32 %v5682_v21, %v4353_v22  ;;  %v5858_v20 = vld [vmem:[#allocation5 + $0x7ec] sm:$0xf] }
 0x15d   :  { %2563 = vmatpush.bf16.msra.mxu1 %v4276_v30  ;;  %v4065_v30 = vld [vmem:[#allocation5 + $0x38] sm:$0xf0]  ;;  %v5818_v47 = vld [vmem:[#allocation5 + $0x6ac] sm:$0xf] }
 0x15e   :  { %2544 = vmatmul.bf16.vlgmr.msrb.gmra.mxu3 %v6420_v27  ;;  %v4068_v40 = vor.u32 %v5610_v29, %v4065_v30  ;;  %v5057_v21 = vld [vmem:[#allocation5 + $0x7f8] sm:$0xf0]  ;;  %v4932_v29 = vor.u32 %v5826_v17, %v4929_v18  ;;  %v5786_v30 = vld [vmem:[#allocation5 + $0x5ac] sm:$0xf] }
 0x15f   :  { %2588 = vmatpush.bf16.msra.mxu3 %v4548_v39  ;;  %2531 = vmatmul.bf16.vlgmr.msrb.gmra.mxu2 %v6418_v25  ;;  %v5060_v32 = vor.u32 %v5858_v20, %v5057_v21  ;;  %v4993_v20 = vld [vmem:[#allocation5 + $0x778] sm:$0xf0] }
 0x160   :  { %2575 = vmatpush.bf16.msra.mxu2 %v4420_v35  ;;  %2551 = vmatpush.bf16.msra.mxu0 %v4132_v48  ;;  %v4484_v35 = vor.u32 %v5714_v24, %v4481_v26  ;;  %v4465_v48 = vld [vmem:[#allocation5 + $0x358] sm:$0xf0]  ;;  %v5754_v24 = vld [vmem:[#allocation5 + $0x4ac] sm:$0xf] }
 0x161   :  { %2564 = vmatpush.bf16.msra.mxu1 %v4260_v45  ;;  %v6446_v39 = vpop.f32.mrf.mxu3  ;;  %v4049_v45 = vld [vmem:[#allocation5 + $0x18] sm:$0xf0]  ;;  %v4468_v56 = vor.u32 %v5710_v41, %v4465_v48  ;;  %v5750_v48 = vld [vmem:[#allocation5 + $0x48c] sm:$0xf] }
 0x162   :  { %v6444_v34 = vpop.f32.mrf.mxu2  ;;  %v4052_v61 = vor.u32 %v5606_v43, %v4049_v45  ;;  %v4641_v26 = vld [vmem:[#allocation5 + $0x4b8] sm:$0xf0] }
 0x163   :  { %2589 = vmatpush.bf16.msra.mxu3 %v4532_v53  ;;  %v5794_v53 = vld [vmem:[#allocation5 + $0x5ec] sm:$0xf]  ;;  %v4625_v43 = vld [vmem:[#allocation5 + $0x498] sm:$0xf0] }
 0x164   :  { %2576 = vmatpush.bf16.msra.mxu2 %v4404_v50  ;;  %2552 = vmatpush.bf16.msra.mxu0 %v4116_v59  ;;  %v4340_v50 = vor.u32 %v5678_v37, %v4337_v38  ;;  %v5674_v59 = vld [vmem:[#allocation5 + $0x22c] sm:$0xf]  ;;  %v4804_v3 = vor.u32 %v5794_v53, %v4801_v58  ;;  %v4644_v37 = vor.u32 %v5754_v24, %v4641_v26  ;;  %v4753_v45 = vld [vmem:[#allocation5 + $0x598] sm:$0xf0] }
 0x165   :  { %2565 = vmatpush.bf16.msra.mxu1 %v4244_v62  ;;  %v5706_v62 = vld [vmem:[#allocation5 + $0x32c] sm:$0xf] }
 0x166   :  { %v4452_v9 = vor.u32 %v5706_v62, %v4449_v63  ;;  %v5854_v38 = vld [vmem:[#allocation5 + $0x7cc] sm:$0xf]  ;;  %v4737_v63 = vld [vmem:[#allocation5 + $0x578] sm:$0xf0] }
 0x167   :  { %2590 = vmatpush.bf16.msra.mxu3 %v4516_v4  ;;  %v4324_v4 = vor.u32 %v5674_v59, %v4321_v60  ;;  %v5850_v53 = vld [vmem:[#allocation5 + $0x7ac] sm:$0xf]  ;;  %v4609_v60 = vld [vmem:[#allocation5 + $0x478] sm:$0xf0] }
 0x168   :  { %2577 = vmatpush.bf16.msra.mxu2 %v4388_v1  ;;  %2553 = vmatpush.bf16.msra.mxu0 %v4100_v7  ;;  %v4676_v1 = vor.u32 %v5762_v51, %v4673_v52  ;;  %v4785_v7 = vld [vmem:[#allocation5 + $0x5d8] sm:$0xf0]  ;;  %v4628_v52 = vor.u32 %v5750_v48, %v4625_v43  ;;  %v5746_v59 = vld [vmem:[#allocation5 + $0x46c] sm:$0xf] }
 0x169   :  { %2566 = vmatpush.bf16.msra.mxu1 %v4228_v10  ;;  %v5670_v10 = vld [vmem:[#allocation5 + $0x20c] sm:$0xf]  ;;  %v2287_v14 = vpop.f32.mrf.mxu3  ;;  %v4788_v22 = vor.u32 %v5790_v6, %v4785_v7  ;;  %v4561_v43 = vld [vmem:[#allocation5 + $0x418] sm:$0xf0] }
 0x16a   :  { %v2274_v8 = vpop.f32.mrf.mxu2  ;;  %v5778_v62 = vld [vmem:[#allocation5 + $0x56c] sm:$0xf]  ;;  %v4865_v14 = vld [vmem:[#allocation5 + $0x678] sm:$0xf0] }
 0x16b   :  { %2591 = vmatpush.bf16.msra.mxu3 %v4500_v19  ;;  %v4660_v19 = vor.u32 %v5758_v2, %v4657_v5  ;;  %v4612_v2 = vor.u32 %v5746_v59, %v4609_v60  ;;  %v4740_v5 = vor.u32 %v5778_v62, %v4737_v63  ;;  %v5742_v6 = vld [vmem:[#allocation5 + $0x44c] sm:$0xf]  ;;  %v4833_v59 = vld [vmem:[#allocation5 + $0x638] sm:$0xf0] }
 0x16c   :  { %2578 = vmatpush.bf16.msra.mxu2 %v4372_v15  ;;  %2554 = vmatpush.bf16.msra.mxu0 %v4084_v23  ;;  %v4433_v15 = vld [vmem:[#allocation5 + $0x318] sm:$0xf0]  ;;  %v4308_v23 = vor.u32 %v5670_v10, %v4305_v11  ;;  %v5774_v8 = vld [vmem:[#allocation5 + $0x54c] sm:$0xf] }
 0x16d   :  { %2567 = vmatpush.bf16.msra.mxu1 %v4212_v28  ;;  %v4436_v28 = vor.u32 %v5702_v13, %v4433_v15  ;;  %v5810_v13 = vld [vmem:[#allocation5 + $0x66c] sm:$0xf]  ;;  %v6459_v15 = vld [vmem:[%s6546_s3] sm:$0xf]  ;;  %v4961_v63 = vld [vmem:[#allocation5 + $0x738] sm:$0xf0] }
 0x16e   :  { %v4868_v24 = vor.u32 %v5810_v13, %v4865_v14  ;;  %v5770_v26 = vld [vmem:[#allocation5 + $0x52c] sm:$0xf]  ;;  %v4945_v13 = vld [vmem:[#allocation5 + $0x718] sm:$0xf0] }
 0x16f   :  { %2592 = vmatpush.bf16.msra.mxu3 %v4484_v35  ;;  %v4913_v35 = vld [vmem:[#allocation5 + $0x6d8] sm:$0xf0]  ;;  %v5834_v62 = vld [vmem:[#allocation5 + $0x72c] sm:$0xf] }
 0x170   :  { %2579 = vmatpush.bf16.msra.mxu2 %v4356_v31  ;;  %2555 = vmatpush.bf16.msra.mxu0 %v4068_v40  ;;  %v4769_v31 = vld [vmem:[#allocation5 + $0x5b8] sm:$0xf0] }
 0x171   :  { %2568 = vmatpush.bf16.msra.mxu1 %v4196_v44  ;;  %v5041_v40 = vld [vmem:[#allocation5 + $0x7d8] sm:$0xf0]  ;;  %v4772_v41 = vor.u32 %v5786_v30, %v4769_v31  ;;  %v5782_v44 = vld [vmem:[#allocation5 + $0x58c] sm:$0xf] }
 0x172   :  { %v4756_v58 = vor.u32 %v5782_v44, %v4753_v45  ;;  %v5806_v31 = vld [vmem:[#allocation5 + $0x64c] sm:$0xf]  ;;  %v4689_v44 = vld [vmem:[#allocation5 + $0x518] sm:$0xf0] }
 0x173   :  { %2593 = vmatpush.bf16.msra.mxu3 %v4468_v56  ;;  %v6450_v46 = vpop.f32.mrf.mxu0  ;;  %v6453_v51 = vpop.f32.mrf.mxu1  ;;  %v5025_v56 = vld [vmem:[#allocation5 + $0x7b8] sm:$0xf0] }
 0x174   :  { %2580 = vmatpush.bf16.msra.mxu2 %v4340_v50  ;;  %2556 = vmatpush.bf16.msra.mxu0 %v4052_v61  ;;  %v4897_v50 = vld [vmem:[#allocation5 + $0x6b8] sm:$0xf0] }
 0x175   :  { %2569 = vmatpush.bf16.msra.mxu1 %v4180_v0  ;;  %v4900_v61 = vor.u32 %v5818_v47, %v4897_v50  ;;  %v5028_v0 = vor.u32 %v5850_v53, %v5025_v56  ;;  %v5876_v47 = vld [vmem:[#allocation7 + $0x74] sm:$0xf0]  ;;  %v5183_v50 = vld [vmem:[#allocation7 + $0xf0] sm:$0xf] }
 0x176   :  { %v5892_v56 = vld [vmem:[#allocation7 + $0xf4] sm:$0xf0] }
 0x177   :  { %2594 = vmatpush.bf16.msra.mxu3 %v4452_v9  ;;  %2557 = vmatmul.bf16.vlgmr.msra.gmra.mxu0 %v6400_v12  ;;  %v4916_v12 = vor.u32 %v5822_v33, %v4913_v35  ;;  %v4721_v9 = vld [vmem:[#allocation5 + $0x558] sm:$0xf0] }
 0x178   :  { %2601 = vmatpush.bf16.msrb.mxu0 %v4676_v1  ;;  %2581 = vmatpush.bf16.msra.mxu2 %v4324_v4  ;;  %v5814_v1 = vld [vmem:[#allocation5 + $0x68c] sm:$0xf]  ;;  %v5009_v4 = vld [vmem:[#allocation5 + $0x798] sm:$0xf0]  ;;  %v4724_v21 = vor.u32 %v5774_v8, %v4721_v9 }
 0x179   :  { %2614 = vmatpush.bf16.msrb.mxu1 %v4804_v3  ;;  %v5846_v3 = vld [vmem:[#allocation5 + $0x78c] sm:$0xf]  ;;  %v4817_v9 = vld [vmem:[#allocation5 + $0x618] sm:$0xf0] }
 0x17a   :  { %2570 = vmatmul.bf16.vlgmr.msra.gmra.mxu1 %v6402_v16  ;;  %v5044_v16 = vor.u32 %v5854_v38, %v5041_v40  ;;  %v5012_v11 = vor.u32 %v5846_v3, %v5009_v4  ;;  %v4977_v38 = vld [vmem:[#allocation5 + $0x758] sm:$0xf0]  ;;  %v5734_v40 = vld [vmem:[#allocation5 + $0x40c] sm:$0xf]  ;;  %v5111_v4 = vld [vmem:[#allocation7 + $0x60] sm:$0xf] }
 0x17b   :  { %2595 = vmatpush.bf16.msra.mxu3 %v4436_v28  ;;  %v2300_v10 = vpop.f32.mrf.mxu0  ;;  %v2313_v17 = vpop.f32.mrf.mxu1  ;;  %v4705_v28 = vld [vmem:[#allocation5 + $0x538] sm:$0xf0]  ;;  %v5798_v8 = vld [vmem:[#allocation5 + $0x60c] sm:$0xf] }
 0x17c   :  { %2602 = vmatpush.bf16.msrb.mxu0 %v4660_v19  ;;  %2582 = vmatpush.bf16.msra.mxu2 %v4308_v23  ;;  %v5842_v19 = vld [vmem:[#allocation5 + $0x76c] sm:$0xf]  ;;  %v4577_v23 = vld [vmem:[#allocation5 + $0x438] sm:$0xf0]  ;;  %v4708_v48 = vor.u32 %v5770_v26, %v4705_v28  ;;  %v5167_v26 = vld [vmem:[#allocation7 + $0xd0] sm:$0xf] }
 0x17d   :  { %2615 = vmatpush.bf16.msrb.mxu1 %v4788_v22  ;;  %v5738_v22 = vld [vmem:[#allocation5 + $0x42c] sm:$0xf]  ;;  %v4996_v30 = vor.u32 %v5842_v19, %v4993_v20  ;;  %v4820_v20 = vor.u32 %v5798_v8, %v4817_v9  ;;  %v5888_v28 = vld [vmem:[#allocation7 + $0xd4] sm:$0xf0]  ;;  %v5135_v9 = vld [vmem:[#allocation7 + $0x90] sm:$0xf] }
 0x17e   :  { %2596 = vmatmul.bf16.vlgmr.msra.gmra.mxu3 %v6408_v42  ;;  %v4593_v42 = vld [vmem:[#allocation5 + $0x458] sm:$0xf0]  ;;  %v4580_v35 = vor.u32 %v5738_v22, %v4577_v23  ;;  %v5872_v22 = vld [vmem:[#allocation7 + $0x54] sm:$0xf0] }
 0x17f   :  { %2640 = vmatpush.bf16.msrb.mxu3 %v5060_v32  ;;  %2583 = vmatmul.bf16.vlgmr.msra.gmra.mxu2 %v6406_v36  ;;  %v4881_v36 = vld [vmem:[#allocation5 + $0x698] sm:$0xf0]  ;;  %v4596_v18 = vor.u32 %v5742_v6, %v4593_v42  ;;  %v5175_v6 = vld [vmem:[#allocation7 + $0xe0] sm:$0xf]  ;;  %v4964_v42 = vor.u32 %v5834_v62, %v4961_v63 }
 0x180   :  { %2627 = vmatpush.bf16.msrb.mxu2 %v4932_v29  ;;  %2603 = vmatpush.bf16.msrb.mxu0 %v4644_v37  ;;  %v4884_v7 = vor.u32 %v5814_v1, %v4881_v36  ;;  %v949_v29 = vperm.slane %v6459_v15, 0  ;;  %v4849_v32 = vld [vmem:[#allocation5 + $0x658] sm:$0xf0]  ;;  %v5838_v37 = vld [vmem:[#allocation5 + $0x74c] sm:$0xf] }
 0x181   :  { %2616 = vmatpush.bf16.msrb.mxu1 %v4772_v41  ;;  %v6462_v33 = vpop.f32.mrf.mxu2  ;;  %v6464_v41 = vpop.f32.mrf.mxu3  ;;  %v4852_v45 = vor.u32 %v5806_v31, %v4849_v32  ;;  %v4980_v53 = vor.u32 %v5838_v37, %v4977_v38  ;;  %v5168_v32 = vor.u32 %v5888_v28, %v5167_v26  ;;  %v5870_v37 = vld [vmem:[#allocation7 + $0x44] sm:$0xf0]  ;;  %v5159_v38 = vld [vmem:[#allocation7 + $0xc0] sm:$0xf]  ;;  %v5121_v26 = vld [vmem:[#allocation7 + $0x78] sm:$0xf0] }
 0x182   :  { %v5143_v63 = vld [vmem:[#allocation7 + $0xa0] sm:$0xf] }
 0x183   :  { %2641 = vmatpush.bf16.msrb.mxu3 %v5044_v16  ;;  %v5119_v16 = vld [vmem:[#allocation7 + $0x70] sm:$0xf]  ;;  %v2363_v60 = vpop.f32.mrf.mxu1 }
 0x184   :  { %2628 = vmatpush.bf16.msrb.mxu2 %v4916_v12  ;;  %2604 = vmatpush.bf16.msrb.mxu0 %v4628_v52  ;;  %v5766_v12 = vld [vmem:[#allocation5 + $0x50c] sm:$0xf]  ;;  %v2350_v52 = vpop.f32.mrf.mxu0  ;;  %v5120_v36 = vor.u32 %v5876_v47, %v5119_v16  ;;  %v5151_v47 = vld [vmem:[#allocation7 + $0xb0] sm:$0xf] }
 0x185   :  { %2617 = vmatpush.bf16.msrb.mxu1 %v4756_v58  ;;  %v5802_v58 = vld [vmem:[#allocation5 + $0x62c] sm:$0xf]  ;;  %v4692_v1 = vor.u32 %v5766_v12, %v4689_v44  ;;  %v5087_v44 = vld [vmem:[#allocation7 + $0x30] sm:$0xf] }
 0x186   :  { %v4836_v3 = vor.u32 %v5802_v58, %v4833_v59  ;;  %v5247_v58 = vld [vmem:[#allocation7 + $0x170] sm:$0xf] }
 0x187   :  { %2642 = vmatpush.bf16.msrb.mxu3 %v5028_v0  ;;  %v2247_v0 = vadd.f32 %v6438_v49, %v949_v29 }
 0x188   :  { %2629 = vmatpush.bf16.msrb.mxu2 %v4900_v61  ;;  %2605 = vmatpush.bf16.msrb.mxu0 %v4612_v2  ;;  %v4564_v61 = vor.u32 %v5734_v40, %v4561_v43  ;;  %v5184_v2 = vor.u32 %v5892_v56, %v5183_v50  ;;  %v5884_v50 = vld [vmem:[#allocation7 + $0xb4] sm:$0xf0] }
 0x189   :  { %2618 = vmatpush.bf16.msrb.mxu1 %v4740_v5  ;;  %v5874_v5 = vld [vmem:[#allocation7 + $0x64] sm:$0xf0]  ;;  %v2326_v10 = vpop.f32.mrf.mxu2  ;;  %v2260_v49 = vadd.f32 %v6440_v54, %v2247_v0  ;;  %v2339_v14 = vpop.f32.mrf.mxu3  ;;  %v5152_v59 = vor.u32 %v5884_v50, %v5151_v47  ;;  %v5900_v47 = vld [vmem:[#allocation7 + $0x134] sm:$0xf0] }
 0x18a   :  { %v5112_v17 = vor.u32 %v5874_v5, %v5111_v4  ;;  %v5882_v0 = vld [vmem:[#allocation7 + $0xa4] sm:$0xf0]  ;;  %v5239_v4 = vld [vmem:[#allocation7 + $0x160] sm:$0xf]  ;;  %v5880_v10 = vld [vmem:[#allocation7 + $0x94] sm:$0xf0] }
 0x18b   :  { %2643 = vmatpush.bf16.msrb.mxu3 %v5012_v11  ;;  %v5830_v11 = vld [vmem:[#allocation5 + $0x70c] sm:$0xf]  ;;  %v2365_v54 = vpop.f32.mrf.mxu1  ;;  %v2273_v29 = vadd.f32 %v6444_v34, %v2260_v49  ;;  %v5906_v5 = vld [vmem:[#allocation7 + $0x164] sm:$0xf0]  ;;  %v5231_v14 = vld [vmem:[#allocation7 + $0x150] sm:$0xf] }
 0x18c   :  { %2630 = vmatpush.bf16.msrb.mxu2 %v4884_v7  ;;  %2606 = vmatpush.bf16.msrb.mxu0 %v4596_v18  ;;  %v5890_v7 = vld [vmem:[#allocation7 + $0xe4] sm:$0xf0]  ;;  %v950_v18 = vperm.slane %v6459_v15, 1  ;;  %v2352_v23 = vpop.f32.mrf.mxu0  ;;  %v5240_v8 = vor.u32 %v5906_v5, %v5239_v4  ;;  %v5891_v54 = vld [vmem:[#allocation7 + $0xf4] sm:$0xf] }
 0x18d   :  { %2619 = vmatpush.bf16.msrb.mxu1 %v4724_v21  ;;  %v5176_v19 = vor.u32 %v5890_v7, %v5175_v6  ;;  %v5103_v21 = vld [vmem:[#allocation7 + $0x50] sm:$0xf]  ;;  %v5144_v6 = vor.u32 %v5882_v0, %v5143_v63  ;;  %v5864_v7 = vld [vmem:[#allocation7 + $0x14] sm:$0xf0]  ;;  %v5878_v23 = vld [vmem:[#allocation7 + $0x84] sm:$0xf0] }
 0x18e   :  { %v2351_v31 = vadd.f32 %v2350_v52, %v950_v18  ;;  %v5136_v18 = vor.u32 %v5880_v10, %v5135_v9  ;;  %v5885_v4 = vld [vmem:[#allocation7 + $0xc4] sm:$0xf]  ;;  %v5161_v5 = vld [vmem:[#allocation7 + $0xc8] sm:$0xf0]  ;;  %v5867_v10 = vld [vmem:[#allocation7 + $0x34] sm:$0xf] }
 0x18f   :  { %2644 = vmatpush.bf16.msrb.mxu3 %v4996_v30  ;;  %v5104_v30 = vor.u32 %v5872_v22, %v5103_v21  ;;  %v5127_v21 = vld [vmem:[#allocation7 + $0x80] sm:$0xf]  ;;  %v5164_v9 = vor.u32 %v5885_v4, %v5161_v5  ;;  %v5895_v5 = vld [vmem:[#allocation7 + $0x114] sm:$0xf] }
 0x190   :  { %2631 = vmatpush.bf16.msrb.mxu2 %v4868_v24  ;;  %2607 = vmatpush.bf16.msrb.mxu0 %v4580_v35  ;;  %v4948_v24 = vor.u32 %v5830_v11, %v4945_v13  ;;  %v5095_v35 = vld [vmem:[#allocation7 + $0x40] sm:$0xf]  ;;  %v2364_v34 = vadd.f32 %v2363_v60, %v2351_v31 }
 0x191   :  { %2620 = vmatpush.bf16.msrb.mxu1 %v4708_v48  ;;  %v2376_v40 = vpop.f32.mrf.mxu2  ;;  %v2286_v48 = vadd.f32 %v6446_v39, %v2273_v29  ;;  %v2389_v43 = vpop.f32.mrf.mxu3  ;;  %v5079_v60 = vld [vmem:[#allocation7 + $0x20] sm:$0xf]  ;;  %v5185_v29 = vld [vmem:[#allocation7 + $0xf8] sm:$0xf0] }
 0x192   :  { %v2377_v52 = vadd.f32 %v2376_v40, %v2364_v34  ;;  %v5113_v34 = vld [vmem:[#allocation7 + $0x68] sm:$0xf0] }
 0x193   :  { %2645 = vmatpush.bf16.msrb.mxu3 %v4980_v53  ;;  %v2299_v16 = vadd.f32 %v6450_v46, %v2286_v48 }
 0x194   :  { %2632 = vmatpush.bf16.msrb.mxu2 %v4852_v45  ;;  %2608 = vmatpush.bf16.msrb.mxu0 %v4564_v61  ;;  %v5868_v45 = vld [vmem:[#allocation7 + $0x34] sm:$0xf0]  ;;  %v2402_v53 = vpop.f32.mrf.mxu0  ;;  %v5866_v61 = vld [vmem:[#allocation7 + $0x24] sm:$0xf0] }
 0x195   :  { %2621 = vmatpush.bf16.msrb.mxu1 %v4692_v1  ;;  %v5088_v39 = vor.u32 %v5868_v45, %v5087_v44  ;;  %v2312_v62 = vadd.f32 %v6453_v51, %v2299_v16  ;;  %v2390_v1 = vadd.f32 %v2389_v43, %v2377_v52  ;;  %v5188_v43 = vor.u32 %v5891_v54, %v5185_v29  ;;  %v5889_v44 = vld [vmem:[#allocation7 + $0xe4] sm:$0xf]  ;;  %v5177_v45 = vld [vmem:[#allocation7 + $0xe8] sm:$0xf0]  ;;  %v5215_v16 = vld [vmem:[#allocation7 + $0x130] sm:$0xf] }
 0x196   :  { %v5145_v54 = vld [vmem:[#allocation7 + $0xa8] sm:$0xf0] }
 0x197   :  { %2646 = vmatpush.bf16.msrb.mxu3 %v4964_v42  ;;  %2609 = vmatmul.bf16.vlgmr.msrb.gmra.mxu0 %v6412_v55  ;;  %v5886_v55 = vld [vmem:[#allocation7 + $0xc4] sm:$0xf0]  ;;  %v2415_v56 = vpop.f32.mrf.mxu1  ;;  %v5071_v42 = vld [vmem:[#allocation7 + $0x10] sm:$0xf]  ;;  %v2403_v51 = vadd.f32 %v2402_v53, %v2390_v1 }
 0x198   :  { %3051 = vmatpush.bf16.msra.mxu0 %v5120_v36  ;;  %2633 = vmatpush.bf16.msrb.mxu2 %v4836_v3  ;;  %v5160_v12 = vor.u32 %v5886_v55, %v5159_v38  ;;  %v2325_v36 = vadd.f32 %v6462_v33, %v2312_v62  ;;  %v5080_v3 = vor.u32 %v5866_v61, %v5079_v60  ;;  %v5105_v60 = vld [vmem:[#allocation7 + $0x58] sm:$0xf0] }
 0x199   :  { %3064 = vmatpush.bf16.msra.mxu1 %v5184_v2  ;;  %v2378_v46 = vpop.f32.mrf.mxu2  ;;  %v2391_v2 = vpop.f32.mrf.mxu3  ;;  %v5072_v33 = vor.u32 %v5864_v7, %v5071_v42  ;;  %v2416_v28 = vadd.f32 %v2415_v56, %v2403_v51  ;;  %v5128_v55 = vor.u32 %v5878_v23, %v5127_v21  ;;  %v5216_v56 = vor.u32 %v5900_v47, %v5215_v16  ;;  %v5169_v62 = vld [vmem:[#allocation7 + $0xd8] sm:$0xf0]  ;;  %v5896_v42 = vld [vmem:[#allocation7 + $0x114] sm:$0xf0]  ;;  %v5865_v23 = vld [vmem:[#allocation7 + $0x24] sm:$0xf] }
 0x19a   :  { %2622 = vmatmul.bf16.vlgmr.msrb.gmra.mxu1 %v6414_v57  ;;  %v5096_v57 = vor.u32 %v5870_v37, %v5095_v35  ;;  %v2338_v13 = vadd.f32 %v6464_v41, %v2325_v36  ;;  %v5223_v35 = vld [vmem:[#allocation7 + $0x140] sm:$0xf]  ;;  %v5902_v37 = vld [vmem:[#allocation7 + $0x144] sm:$0xf0]  ;;  %v5869_v2 = vld [vmem:[#allocation7 + $0x44] sm:$0xf] }
 0x19b   :  { %2647 = vmatpush.bf16.msrb.mxu3 %v4948_v24  ;;  %v5875_v24 = vld [vmem:[#allocation7 + $0x74] sm:$0xf]  ;;  %v5224_v48 = vor.u32 %v5902_v37, %v5223_v35  ;;  %v5089_v51 = vld [vmem:[#allocation7 + $0x38] sm:$0xf0]  ;;  %v5877_v47 = vld [vmem:[#allocation7 + $0x84] sm:$0xf] }
 0x19c   :  { %3052 = vmatpush.bf16.msra.mxu0 %v5112_v17  ;;  %2634 = vmatpush.bf16.msrb.mxu2 %v4820_v20  ;;  %v2404_v11 = vpop.f32.mrf.mxu0  ;;  %v5904_v17 = vld [vmem:[#allocation7 + $0x154] sm:$0xf0]  ;;  %v5862_v20 = vld [vmem:[#allocation7 + $0x4] sm:$0xf0]  ;;  %v5124_v40 = vor.u32 %v5875_v24, %v5121_v26  ;;  %v5249_v21 = vld [vmem:[#allocation7 + $0x178] sm:$0xf0] }
 0x19d   :  { %3065 = vmatpush.bf16.msra.mxu1 %v5176_v19  ;;  %v5063_v19 = vld [vmem:[#allocation7] sm:$0xf]  ;;  %v5232_v22 = vor.u32 %v5904_v17, %v5231_v14  ;;  %v5883_v11 = vld [vmem:[#allocation7 + $0xb4] sm:$0xf]  ;;  %v5894_v14 = vld [vmem:[#allocation7 + $0x104] sm:$0xf0] }
 0x19e   :  { %2648 = vmatmul.bf16.vlgmr.msrb.gmra.mxu3 %v6420_v27  ;;  %v5907_v17 = vld [vmem:[#allocation7 + $0x174] sm:$0xf]  ;;  %v5081_v24 = vld [vmem:[#allocation7 + $0x28] sm:$0xf0]  ;;  %v5073_v35 = vld [vmem:[#allocation7 + $0x18] sm:$0xf0] }
 0x19f   :  { %2635 = vmatmul.bf16.vlgmr.msrb.gmra.mxu2 %v6418_v25  ;;  %v5908_v25 = vld [vmem:[#allocation7 + $0x174] sm:$0xf0]  ;;  %v2417_v49 = vpop.f32.mrf.mxu1  ;;  %v5252_v26 = vor.u32 %v5907_v17, %v5249_v21  ;;  %v5084_v29 = vor.u32 %v5865_v23, %v5081_v24  ;;  %v5922_v17 = vld [vmem:[#allocation7 + $0x1e4] sm:$0xf0] }
 0x1a0   :  { %3053 = vmatpush.bf16.msra.mxu0 %v5104_v30  ;;  %v5248_v27 = vor.u32 %v5908_v25, %v5247_v58  ;;  %v2653_v30 = vmax.f32 %v2338_v13, 0.0  ;;  %v5898_v58 = vld [vmem:[#allocation7 + $0x124] sm:$0xf0]  ;;  %v5180_v25 = vor.u32 %v5889_v44, %v5177_v45  ;;  %v5153_v13 = vld [vmem:[#allocation7 + $0xb8] sm:$0xf0] }
 0x1a1   :  { %3066 = vmatpush.bf16.msra.mxu1 %v5168_v32  ;;  %v2441_v31 = vpop.f32.mrf.mxu3  ;;  %v5064_v32 = vor.u32 %v5862_v20, %v5063_v19  ;;  %v5092_v19 = vor.u32 %v5867_v10, %v5089_v51  ;;  %v5861_v44 = vld [vmem:[#allocation7 + $0x4] sm:$0xf]  ;;  %v5065_v45 = vld [vmem:[#allocation7 + $0x8] sm:$0xf0]  ;;  %v5311_v51 = vld [vmem:[#allocation7 + $0x1f0] sm:$0xf] }
 0x1a2   :  { %3077 = vmatpush.bf16.msra.mxu2 %v5248_v27  ;;  %v2428_v41 = vpop.f32.mrf.mxu2  ;;  %v6479_v50 = vpack.c.bf16 %v2653_v30, %v2653_v30  ;;  %v5887_v27 = vld [vmem:[#allocation7 + $0xd4] sm:$0xf]  ;;  %v5905_v30 = vld [vmem:[#allocation7 + $0x164] sm:$0xf]  ;;  %v5193_v10 = vld [vmem:[#allocation7 + $0x108] sm:$0xf0] }
 0x1a3   :  { %v2429_v38 = vadd.f32 %v2428_v41, %v2416_v28  ;;  %v5172_v36 = vor.u32 %v5887_v27, %v5169_v62  ;;  %v5881_v28 = vld [vmem:[#allocation7 + $0xa4] sm:$0xf]  ;;  %v5241_v41 = vld [vmem:[#allocation7 + $0x168] sm:$0xf0]  ;;  %v5899_v27 = vld [vmem:[#allocation7 + $0x134] sm:$0xf] }
 0x1a4   :  { %3054 = vmatpush.bf16.msra.mxu0 %v5096_v57  ;;  %v5873_v57 = vld [vmem:[#allocation7 + $0x64] sm:$0xf]  ;;  %v5244_v37 = vor.u32 %v5905_v30, %v5241_v41  ;;  %v5217_v62 = vld [vmem:[#allocation7 + $0x138] sm:$0xf0]  ;;  %v5920_v23 = vld [vmem:[#allocation7 + $0x1d4] sm:$0xf0] }
 0x1a5   :  { %3067 = vmatpush.bf16.msra.mxu1 %v5160_v12  ;;  %v2442_v12 = vadd.f32 %v2441_v31, %v2429_v38  ;;  %v5116_v53 = vor.u32 %v5873_v57, %v5113_v34  ;;  %v5148_v31 = vor.u32 %v5881_v28, %v5145_v54  ;;  %v5879_v38 = vld [vmem:[#allocation7 + $0x94] sm:$0xf]  ;;  %v5233_v34 = vld [vmem:[#allocation7 + $0x158] sm:$0xf0]  ;;  %v5287_v54 = vld [vmem:[#allocation7 + $0x1c0] sm:$0xf] }
 0x1a6   :  { %3078 = vmatpush.bf16.msra.mxu2 %v5240_v8  ;;  %v5903_v57 = vld [vmem:[#allocation7 + $0x154] sm:$0xf] }
 0x1a7   :  { %v2654_v52 = vmax.f32 %v2442_v12, 0.0  ;;  %v5236_v16 = vor.u32 %v5903_v57, %v5233_v34 }
 0x1a8   :  { %3055 = vmatpush.bf16.msra.mxu0 %v5088_v39  ;;  %v5207_v39 = vld [vmem:[#allocation7 + $0x120] sm:$0xf] }
 0x1a9   :  { %3068 = vmatpush.bf16.msra.mxu1 %v5152_v59  ;;  %v5871_v59 = vld [vmem:[#allocation7 + $0x54] sm:$0xf]  ;;  %v6481_v61 = vpack.c.bf16 %v2654_v52, %v2654_v52  ;;  %v5208_v63 = vor.u32 %v5898_v58, %v5207_v39  ;;  %v2443_v1 = vpop.f32.mrf.mxu3  ;;  %v5129_v52 = vld [vmem:[#allocation7 + $0x88] sm:$0xf0]  ;;  %v5068_v39 = vor.u32 %v5861_v44, %v5065_v45  ;;  %v5901_v58 = vld [vmem:[#allocation7 + $0x144] sm:$0xf] }
 0x1aa   :  { %3079 = vmatpush.bf16.msra.mxu2 %v5232_v22  ;;  %v2430_v0 = vpop.f32.mrf.mxu2  ;;  %v5108_v46 = vor.u32 %v5871_v59, %v5105_v60  ;;  %v5156_v22 = vor.u32 %v5883_v11, %v5153_v13  ;;  %v5132_v59 = vor.u32 %v5877_v47, %v5129_v52  ;;  %v5209_v1 = vld [vmem:[#allocation7 + $0x128] sm:$0xf0]  ;;  %v5263_v44 = vld [vmem:[#allocation7 + $0x190] sm:$0xf]  ;;  %v5912_v45 = vld [vmem:[#allocation7 + $0x194] sm:$0xf0] }
 0x1ab   :  { %v5897_v0 = vld [vmem:[#allocation7 + $0x124] sm:$0xf]  ;;  %v5255_v52 = vld [vmem:[#allocation7 + $0x180] sm:$0xf] }
 0x1ac   :  { %3056 = vmatpush.bf16.msra.mxu0 %v5080_v3  ;;  %v5097_v3 = vld [vmem:[#allocation7 + $0x48] sm:$0xf0] }
 0x1ad   :  { %3069 = vmatpush.bf16.msra.mxu1 %v5144_v6  ;;  %v5199_v6 = vld [vmem:[#allocation7 + $0x110] sm:$0xf]  ;;  %v5100_v7 = vor.u32 %v5869_v2, %v5097_v3  ;;  %v5212_v2 = vor.u32 %v5897_v0, %v5209_v1  ;;  %v5919_v1 = vld [vmem:[#allocation7 + $0x1d4] sm:$0xf] }
 0x1ae   :  { %3080 = vmatpush.bf16.msra.mxu2 %v5224_v48  ;;  %v5200_v8 = vor.u32 %v5896_v42, %v5199_v6  ;;  %v5201_v6 = vld [vmem:[#allocation7 + $0x118] sm:$0xf0] }
 0x1af   :  { %v5204_v42 = vor.u32 %v5895_v5, %v5201_v6  ;;  %v5289_v5 = vld [vmem:[#allocation7 + $0x1c8] sm:$0xf0] }
 0x1b0   :  { %3057 = vmatpush.bf16.msra.mxu0 %v5072_v33  ;;  %v5191_v33 = vld [vmem:[#allocation7 + $0x100] sm:$0xf] }
 0x1b1   :  { %3070 = vmatpush.bf16.msra.mxu1 %v5136_v18  ;;  %v5192_v20 = vor.u32 %v5894_v14, %v5191_v33  ;;  %v5924_v33 = vld [vmem:[#allocation7 + $0x1f4] sm:$0xf0] }
 0x1b2   :  { %3081 = vmatpush.bf16.msra.mxu2 %v5216_v56  ;;  %v5312_v14 = vor.u32 %v5924_v33, %v5311_v51  ;;  %v952_v51 = vperm.slane %v6459_v15, 3 }
 0x1b4   :  { %3058 = vmatpush.bf16.msra.mxu0 %v5064_v32  ;;  %v6485_v49 = vpop.f32.mrf.mxu0  ;;  %v5863_v32 = vld [vmem:[#allocation7 + $0x14] sm:$0xf]  ;;  %3090 = vmatpush.bf16.msra.mxu3 %v5312_v14 }
 0x1b5   :  { %3071 = vmatpush.bf16.msra.mxu1 %v5128_v55  ;;  %v5137_v55 = vld [vmem:[#allocation7 + $0x98] sm:$0xf0]  ;;  %v5911_v14 = vld [vmem:[#allocation7 + $0x194] sm:$0xf] }
 0x1b6   :  { %3082 = vmatpush.bf16.msra.mxu2 %v5208_v63  ;;  %v5140_v12 = vor.u32 %v5879_v38, %v5137_v55  ;;  %v5220_v63 = vor.u32 %v5899_v27, %v5217_v62  ;;  %v5916_v38 = vld [vmem:[#allocation7 + $0x1b4] sm:$0xf0]  ;;  %v5305_v27 = vld [vmem:[#allocation7 + $0x1e8] sm:$0xf0] }
 0x1b7   :  { %3059 = vmatmul.bf16.vlgmr.msra.gmra.mxu0 %v6479_v50  ;;  %v6487_v18 = vpop.f32.mrf.mxu1 }
 0x1b8   :  { %3103 = vmatpush.bf16.msrb.mxu0 %v5124_v40  ;;  %3072 = vmatmul.bf16.vlgmr.msra.gmra.mxu1 %v6481_v61 }
 0x1b9   :  { %3116 = vmatpush.bf16.msrb.mxu1 %v5188_v43  ;;  %v5076_v43 = vor.u32 %v5863_v32, %v5073_v35 }
 0x1ba   :  { %3083 = vmatpush.bf16.msra.mxu2 %v5200_v8 }
 0x1bc   :  { %3104 = vmatpush.bf16.msrb.mxu0 %v5116_v53  ;;  %v2456_v40 = vpop.f32.mrf.mxu0 }
 0x1bd   :  { %3117 = vmatpush.bf16.msrb.mxu1 %v5180_v25  ;;  %v5225_v25 = vld [vmem:[#allocation7 + $0x148] sm:$0xf0]  ;;  %v5271_v40 = vld [vmem:[#allocation7 + $0x1a0] sm:$0xf] }
 0x1be   :  { %3084 = vmatpush.bf16.msra.mxu2 %v5192_v20  ;;  %v5228_v60 = vor.u32 %v5901_v58, %v5225_v25  ;;  %v5313_v25 = vld [vmem:[#allocation7 + $0x1f8] sm:$0xf0] }
 0x1bf   :  { %v2469_v48 = vpop.f32.mrf.mxu1 }
 0x1c0   :  { %3105 = vmatpush.bf16.msrb.mxu0 %v5108_v46  ;;  %v951_v46 = vperm.slane %v6459_v15, 2  ;;  %v5914_v48 = vld [vmem:[#allocation7 + $0x1a4] sm:$0xf0] }
 0x1c1   :  { %3118 = vmatpush.bf16.msrb.mxu1 %v5172_v36  ;;  %v2493_v56 = vpop.f32.mrf.mxu3  ;;  %v5272_v34 = vor.u32 %v5914_v48, %v5271_v40 }
 0x1c2   :  { %3129 = vmatpush.bf16.msrb.mxu2 %v5252_v26  ;;  %v2480_v53 = vpop.f32.mrf.mxu2  ;;  %v2455_v4 = vadd.f32 %v6485_v49, %v951_v46  ;;  %v5303_v49 = vld [vmem:[#allocation7 + $0x1e0] sm:$0xf]  ;;  %v5297_v46 = vld [vmem:[#allocation7 + $0x1d8] sm:$0xf0] }
 0x1c4   :  { %3106 = vmatpush.bf16.msrb.mxu0 %v5100_v7  ;;  %v2468_v7 = vadd.f32 %v6487_v18, %v2455_v4  ;;  %v5917_v4 = vld [vmem:[#allocation7 + $0x1c4] sm:$0xf] }
 0x1c5   :  { %3119 = vmatpush.bf16.msrb.mxu1 %v5164_v9  ;;  %v5893_v9 = vld [vmem:[#allocation7 + $0x104] sm:$0xf]  ;;  %v5292_v6 = vor.u32 %v5917_v4, %v5289_v5  ;;  %v5938_v4 = vld [vmem:[#allocation8 + $0x68] sm:$0xff] }
 0x1c6   :  { %3130 = vmatpush.bf16.msrb.mxu2 %v5244_v37  ;;  %v2481_v11 = vadd.f32 %v2480_v53, %v2468_v7  ;;  %v5196_v13 = vor.u32 %v5893_v9, %v5193_v10  ;;  %v5279_v37 = vld [vmem:[#allocation7 + $0x1b0] sm:$0xf]  ;;  %v5910_v53 = vld [vmem:[#allocation7 + $0x184] sm:$0xf0]  ;;  %v5281_v7 = vld [vmem:[#allocation7 + $0x1b8] sm:$0xf0] }
 0x1c7   :  { %v5280_v55 = vor.u32 %v5916_v38, %v5279_v37  ;;  %v5256_v58 = vor.u32 %v5910_v53, %v5255_v52  ;;  %v5913_v9 = vld [vmem:[#allocation7 + $0x1a4] sm:$0xf]  ;;  %v5273_v10 = vld [vmem:[#allocation7 + $0x1a8] sm:$0xf0] }
 0x1c8   :  { %3107 = vmatpush.bf16.msrb.mxu0 %v5092_v19  ;;  %v5304_v19 = vor.u32 %v5922_v17, %v5303_v49  ;;  %v5925_v5 = vld [vmem:[#allocation8] sm:$0xff] }
 0x1c9   :  { %3120 = vmatpush.bf16.msrb.mxu1 %v5156_v22  ;;  %v2495_v3 = vpop.f32.mrf.mxu3  ;;  %v5295_v22 = vld [vmem:[#allocation7 + $0x1d0] sm:$0xf] }
 0x1ca   :  { %3131 = vmatpush.bf16.msrb.mxu2 %v5236_v16  ;;  %v2482_v36 = vpop.f32.mrf.mxu2  ;;  %3091 = vmatpush.bf16.msra.mxu3 %v5304_v19  ;;  %v5296_v24 = vor.u32 %v5920_v23, %v5295_v22  ;;  %v5264_v16 = vor.u32 %v5912_v45, %v5263_v44 }
 0x1cb   :  { %v5300_v36 = vor.u32 %v5919_v1, %v5297_v46  ;;  %v5927_v46 = vld [vmem:[#allocation8 + $0x10] sm:$0xff] }
 0x1cc   :  { %3108 = vmatpush.bf16.msrb.mxu0 %v5084_v29  ;;  %v5918_v29 = vld [vmem:[#allocation7 + $0x1c4] sm:$0xf0] }
 0x1cd   :  { %3121 = vmatpush.bf16.msrb.mxu1 %v5148_v31  ;;  %v5288_v31 = vor.u32 %v5918_v29, %v5287_v54 }
 0x1ce   :  { %3132 = vmatpush.bf16.msrb.mxu2 %v5228_v60  ;;  %3092 = vmatpush.bf16.msra.mxu3 %v5296_v24  ;;  %v5921_v60 = vld [vmem:[#allocation7 + $0x1e4] sm:$0xf] }
 0x1cf   :  { %v5308_v62 = vor.u32 %v5921_v60, %v5305_v27  ;;  %v5939_v60 = vld [vmem:[#allocation8 + $0x70] sm:$0xff]  ;;  %v5930_v27 = vld [vmem:[#allocation8 + $0x28] sm:$0xff] }
 0x1d0   :  { %3109 = vmatpush.bf16.msrb.mxu0 %v5076_v43 }
 0x1d1   :  { %3122 = vmatpush.bf16.msrb.mxu1 %v5140_v12 }
 0x1d2   :  { %3133 = vmatpush.bf16.msrb.mxu2 %v5220_v63  ;;  %3093 = vmatpush.bf16.msra.mxu3 %v5288_v31 }
 0x1d4   :  { %3110 = vmatpush.bf16.msrb.mxu0 %v5068_v39  ;;  %v2506_v8 = vpop.f32.mrf.mxu0 }
 0x1d5   :  { %3123 = vmatpush.bf16.msrb.mxu1 %v5132_v59 }
 0x1d6   :  { %3134 = vmatpush.bf16.msrb.mxu2 %v5212_v2  ;;  %3094 = vmatpush.bf16.msra.mxu3 %v5280_v55  ;;  %v2725_v55 = vld [vmem:[%s6548_s5] sm:$0x3] }
 0x1d7   :  { %3111 = vmatmul.bf16.vlgmr.msrb.gmra.mxu0 %v6479_v50  ;;  %v2519_v50 = vpop.f32.mrf.mxu1  ;;  %v2727_v40 = vperm.slane %v2725_v55, 0  ;;  %v2728_v45 = vperm.slane %v2725_v55, 1 }
 0x1d8   :  { %3124 = vmatmul.bf16.vlgmr.msrb.gmra.mxu1 %v6481_v61  ;;  %v2494_v61 = vadd.f32 %v2493_v56, %v2481_v11  ;;  %v5923_v56 = vld [vmem:[#allocation7 + $0x1f4] sm:$0xf] }
 0x1d9   :  { %v5316_v59 = vor.u32 %v5923_v56, %v5313_v25  ;;  %v5940_v25 = vld [vmem:[#allocation8 + $0x78] sm:$0xff] }
 0x1da   :  { %3135 = vmatpush.bf16.msrb.mxu2 %v5204_v42  ;;  %v2507_v20 = vadd.f32 %v2506_v8, %v2494_v61  ;;  %3095 = vmatpush.bf16.msra.mxu3 %v5272_v34  ;;  %v5915_v42 = vld [vmem:[#allocation7 + $0x1b4] sm:$0xf]  ;;  %v5265_v61 = vld [vmem:[#allocation7 + $0x198] sm:$0xf0] }
 0x1db   :  { %v5284_v8 = vor.u32 %v5915_v42, %v5281_v7  ;;  %v5268_v49 = vor.u32 %v5911_v14, %v5265_v61  ;;  %3304 = vmatpush.bf16.msra.mxu1 %v5940_v25  ;;  %v5936_v42 = vld [vmem:[#allocation8 + $0x58] sm:$0xff]  ;;  %v5935_v7 = vld [vmem:[#allocation8 + $0x50] sm:$0xff] }
 0x1dc   :  { %v2508_v21 = vpop.f32.mrf.mxu0  ;;  %v2520_v26 = vadd.f32 %v2519_v50, %v2507_v20  ;;  %v5276_v50 = vor.u32 %v5913_v9, %v5273_v10  ;;  %v5909_v20 = vld [vmem:[#allocation7 + $0x184] sm:$0xf]  ;;  %v5948_v10 = vld [vmem:[%s6551_s8 + $0x38] sm:$0xff] }
 0x1dd   :  { %v5257_v21 = vld [vmem:[#allocation7 + $0x188] sm:$0xf0]  ;;  %v5933_v9 = vld [vmem:[#allocation8 + $0x40] sm:$0xff] }
 0x1de   :  { %3136 = vmatpush.bf16.msrb.mxu2 %v5196_v13  ;;  %3096 = vmatpush.bf16.msra.mxu3 %v5264_v16  ;;  %v5260_v23 = vor.u32 %v5909_v20, %v5257_v21 }
 0x1df   :  { %v2521_v18 = vpop.f32.mrf.mxu1  ;;  %3305 = vmatpush.bf16.msra.mxu1 %v5939_v60 }
 0x1e1   :  { %v2545_v41 = vpop.f32.mrf.mxu3 }
 0x1e2   :  { %v2532_v28 = vpop.f32.mrf.mxu2  ;;  %3097 = vmatpush.bf16.msra.mxu3 %v5256_v58  ;;  %v5932_v58 = vld [vmem:[#allocation8 + $0x38] sm:$0xff] }
 0x1e3   :  { %v2533_v30 = vadd.f32 %v2532_v28, %v2520_v26  ;;  %3291 = vmatpush.bf16.msra.mxu0 %v5932_v58  ;;  %3306 = vmatpush.bf16.msra.mxu1 %v5938_v4  ;;  %v6000_v4 = vld [vmem:[%s6554_s11] ss:$0 sm:$0xff] }
 0x1e5   :  { %v2546_v32 = vadd.f32 %v2545_v41, %v2533_v30 }
 0x1e6   :  { %3142 = vmatpush.bf16.msrb.mxu3 %v5316_v59  ;;  %v5931_v59 = vld [vmem:[#allocation8 + $0x30] sm:$0xff] }
 0x1e7   :  { %v2655_v35 = vmax.f32 %v2546_v32, 0.0  ;;  %3292 = vmatpush.bf16.msra.mxu0 %v5931_v59 }
 0x1e9   :  { %v2659_v43 = vpack.c.bf16 %v2655_v35, %v2655_v35  ;;  %v2547_v12 = vpop.f32.mrf.mxu3 }
 0x1ea   :  { %v2534_v57 = vpop.f32.mrf.mxu2  ;;  %3143 = vmatpush.bf16.msrb.mxu3 %v5308_v62 }
 0x1eb   :  { %3085 = vmatmul.bf16.vlgmr.msra.gmra.mxu2 %v2659_v43  ;;  %3293 = vmatpush.bf16.msra.mxu0 %v5930_v27 }
 0x1ec   :  { %3387 = vmatpush.bf16.msra.mxu2 %v5948_v10  ;;  %v5965_v10 = vld [vmem:[#allocation13] sm:$0xff] }
 0x1ee   :  { %3144 = vmatpush.bf16.msrb.mxu3 %v5300_v36 }
 0x1f2   :  { %3145 = vmatpush.bf16.msrb.mxu3 %v5292_v6  ;;  %v5937_v6 = vld [vmem:[#allocation8 + $0x60] sm:$0xff] }
 0x1f3   :  { %3307 = vmatpush.bf16.msra.mxu1 %v5937_v6 }
 0x1f4   :  { %v2558_v47 = vpop.f32.mrf.mxu0 }
 0x1f5   :  { %v2559_v33 = vadd.f32 %v2558_v47, %v952_v51  ;;  %v5947_v51 = vld [vmem:[%s6551_s8 + $0x30] sm:$0xff] }
 0x1f6   :  { %3146 = vmatpush.bf16.msrb.mxu3 %v5284_v8  ;;  %v5934_v8 = vld [vmem:[#allocation8 + $0x48] sm:$0xff]  ;;  %3388 = vmatpush.bf16.msra.mxu2 %v5947_v51  ;;  %v5980_v51 = vld [vmem:[#allocation14 + $0x38] sm:$0xff] }
 0x1f7   :  { %v2571_v39 = vpop.f32.mrf.mxu1  ;;  %3308 = vmatpush.bf16.msra.mxu1 %v5936_v42 }
 0x1f8   :  { %v2572_v17 = vadd.f32 %v2571_v39, %v2559_v33 }
 0x1fa   :  { %3147 = vmatpush.bf16.msrb.mxu3 %v5276_v50 }
 0x1fb   :  { %3137 = vmatmul.bf16.vlgmr.msrb.gmra.mxu2 %v2659_v43  ;;  %3309 = vmatpush.bf16.msra.mxu1 %v5935_v7 }
 0x1fc   :  { %v2560_v63 = vpop.f32.mrf.mxu0 }
 0x1fd   :  { %v5929_v63 = vld [vmem:[#allocation8 + $0x20] sm:$0xff] }
 0x1fe   :  { %3148 = vmatpush.bf16.msrb.mxu3 %v5268_v49  ;;  %3294 = vmatpush.bf16.msra.mxu0 %v5929_v63  ;;  %v5957_v63 = vld [vmem:[#allocation11] sm:$0xff] }
 0x1ff   :  { %v2573_v0 = vpop.f32.mrf.mxu1  ;;  %3310 = vmatpush.bf16.msra.mxu1 %v5934_v8 }
 0x200   :  { %v5928_v0 = vld [vmem:[#allocation8 + $0x18] sm:$0xff] }
 0x201   :  { %v2597_v3 = vpop.f32.mrf.mxu3 }
 0x202   :  { %v2584_v2 = vpop.f32.mrf.mxu2  ;;  %3149 = vmatpush.bf16.msrb.mxu3 %v5260_v23  ;;  %3295 = vmatpush.bf16.msra.mxu0 %v5928_v0  ;;  %v5945_v23 = vld [vmem:[%s6551_s8 + $0x20] sm:$0xff]  ;;  %v5972_v0 = vld [vmem:[#allocation13 + $0x38] sm:$0xff] }
 0x203   :  { %v2585_v18 = vadd.f32 %v2584_v2, %v2572_v17  ;;  %3311 = vmatpush.bf16.msra.mxu1 %v5933_v9  ;;  %v5966_v9 = vld [vmem:[#allocation13 + $0x8] sm:$0xff] }
 0x205   :  { %v2598_v24 = vadd.f32 %v2597_v3, %v2585_v18  ;;  %v5926_v3 = vld [vmem:[#allocation8 + $0x8] sm:$0xff] }
 0x206   :  { %3296 = vmatpush.bf16.msra.mxu0 %v5927_v46  ;;  %v5970_v46 = vld [vmem:[#allocation13 + $0x28] sm:$0xff] }
 0x207   :  { %3636 = vmatpush.bf16.msrb.mxu1 %v5972_v0 }
 0x209   :  { %v2599_v13 = vpop.f32.mrf.mxu3 }
 0x20a   :  { %v2586_v11 = vpop.f32.mrf.mxu2  ;;  %3297 = vmatpush.bf16.msra.mxu0 %v5926_v3  ;;  %v5967_v3 = vld [vmem:[#allocation13 + $0x10] sm:$0xff] }
 0x20e   :  { %3298 = vmatpush.bf16.msra.mxu0 %v5925_v5 }
 0x214   :  { %v2610_v19 = vpop.f32.mrf.mxu0 }
 0x215   :  { %v2611_v15 = vadd.f32 %v2610_v19, %v2598_v24  ;;  %v5944_v24 = vld [vmem:[%s6551_s8 + $0x18] sm:$0xff] }
 0x217   :  { %v2623_v22 = vpop.f32.mrf.mxu1 }
 0x218   :  { %v2624_v54 = vadd.f32 %v2623_v22, %v2611_v15  ;;  %v5946_v22 = vld [vmem:[%s6551_s8 + $0x28] sm:$0xff]  ;;  %v5943_v15 = vld [vmem:[%s6551_s8 + $0x10] sm:$0xff] }
 0x219   :  { %3389 = vmatpush.bf16.msra.mxu2 %v5946_v22  ;;  %v5973_v22 = vld [vmem:[#allocation14] sm:$0xff] }
 0x21c   :  { %v2612_v26 = vpop.f32.mrf.mxu0 }
 0x21d   :  { %3390 = vmatpush.bf16.msra.mxu2 %v5945_v23  ;;  %v5942_v26 = vld [vmem:[%s6551_s8 + $0x8] sm:$0xff]  ;;  %v6002_v23 = vld [vmem:[%s6558_s15] ss:$0 sm:$0xff]  ;;  %s6252_s15 = smov [#allocation16]  }
 0x21f   :  { %v2625_v28 = vpop.f32.mrf.mxu1 }
 0x220   :  { %v5941_v28 = vld [vmem:[%s6551_s8] sm:$0xff] }
 0x221   :  { %v2649_v41 = vpop.f32.mrf.mxu3  ;;  %3391 = vmatpush.bf16.msra.mxu2 %v5944_v24 }
 0x222   :  { %v2636_v29 = vpop.f32.mrf.mxu2 }
 0x223   :  { %v2637_v30 = vadd.f32 %v2636_v29, %v2624_v54  ;;  %v5956_v54 = vld [vmem:[#allocation10 + $0x38] sm:$0xff]  ;;  %v5955_v29 = vld [vmem:[#allocation10 + $0x30] sm:$0xff] }
 0x225   :  { %v2650_v31 = vadd.f32 %v2649_v41, %v2637_v30  ;;  %3392 = vmatpush.bf16.msra.mxu2 %v5943_v15  ;;  %v5954_v30 = vld [vmem:[#allocation10 + $0x28] sm:$0xff] }
 0x227   :  { %v2656_v32 = vmax.f32 %v2650_v31, 0.0  ;;  %v5953_v31 = vld [vmem:[#allocation10 + $0x20] sm:$0xff] }
 0x229   :  { %v2660_v35 = vpack.c.bf16 %v2656_v32, %v2656_v32  ;;  %v2651_v38 = vpop.f32.mrf.mxu3  ;;  %3393 = vmatpush.bf16.msra.mxu2 %v5942_v26  ;;  %v5952_v32 = vld [vmem:[#allocation10 + $0x18] sm:$0xff] }
 0x22a   :  { %v2638_v37 = vpop.f32.mrf.mxu2  ;;  %v5998_v38 = vld [vmem:[%s6550_s7] ss:$0 sm:$0xff] }
 0x22b   :  { %3098 = vmatmul.bf16.vlgmr.msra.gmra.mxu3 %v2660_v35  ;;  %v5951_v37 = vld [vmem:[#allocation10 + $0x10] sm:$0xff] }
 0x22c   :  { %3470 = vmatpush.bf16.msra.mxu3 %v5956_v54 }
 0x22d   :  { %3394 = vmatpush.bf16.msra.mxu2 %v5941_v28 }
 0x230   :  { %3471 = vmatpush.bf16.msra.mxu3 %v5955_v29  ;;  %v3732_v29 = vlaneseq }
 0x231   :  { %3719 = vmatpush.bf16.msrb.mxu2 %v5980_v51 }
 0x234   :  { %v3060_v48 = vpop.f32.mrf.mxu0  ;;  %3472 = vmatpush.bf16.msra.mxu3 %v5954_v30  ;;  %v3733_v30 = vand.u32 127, %v3732_v29 }
 0x235   :  { %v3061_v43 = vadd.f32 %v3060_v48, %v2727_v40  ;;  %v3073_v57 = vpop.f32.mrf.mxu1 }
 0x236   :  { %vm3734_vm0 = vcmp.lt.s32.totalorder %v3733_v30, 8 }
 0x237   :  { %v3074_v34 = vadd.f32 %v3073_v57, %v3061_v43 }
 0x238   :  { %3473 = vmatpush.bf16.msra.mxu3 %v5953_v31 }
 0x23b   :  { %3150 = vmatmul.bf16.vlgmr.msrb.gmra.mxu3 %v2660_v35 }
 0x23c   :  { %v3062_v12 = vpop.f32.mrf.mxu0  ;;  %3474 = vmatpush.bf16.msra.mxu3 %v5952_v32 }
 0x23d   :  { %v3075_v44 = vpop.f32.mrf.mxu1  ;;  %v5950_v12 = vld [vmem:[#allocation10 + $0x8] sm:$0xff] }
 0x23e   :  { %v5949_v44 = vld [vmem:[#allocation10] sm:$0xff] }
 0x240   :  { %3475 = vmatpush.bf16.msra.mxu3 %v5951_v37 }
 0x244   :  { %3476 = vmatpush.bf16.msra.mxu3 %v5950_v12 }
 0x248   :  { %3477 = vmatpush.bf16.msra.mxu3 %v5949_v44 }
 0x254   :  { %v3112_v16 = vpop.f32.mrf.mxu0 }
 0x255   :  { %v3113_v47 = vadd.f32 %v3112_v16, %v2728_v45  ;;  %v3125_v52 = vpop.f32.mrf.mxu1  ;;  %v5964_v45 = vld [vmem:[#allocation11 + $0x38] sm:$0xff]  ;;  %v5963_v16 = vld [vmem:[#allocation11 + $0x30] sm:$0xff] }
 0x256   :  { %3553 = vmatpush.bf16.msrb.mxu0 %v5964_v45 }
 0x257   :  { %v3126_v53 = vadd.f32 %v3125_v52, %v3113_v47  ;;  %v5962_v47 = vld [vmem:[#allocation11 + $0x28] sm:$0xff]  ;;  %v5961_v52 = vld [vmem:[#allocation11 + $0x20] sm:$0xff] }
 0x25a   :  { %3554 = vmatpush.bf16.msrb.mxu0 %v5963_v16 }
 0x25c   :  { %v3114_v56 = vpop.f32.mrf.mxu0 }
 0x25d   :  { %v3127_v39 = vpop.f32.mrf.mxu1  ;;  %v5959_v56 = vld [vmem:[#allocation11 + $0x10] sm:$0xff] }
 0x25e   :  { %3555 = vmatpush.bf16.msrb.mxu0 %v5962_v47  ;;  %v5999_v39 = vld [vmem:[%s6552_s9] ss:$0 sm:$0xff] }
 0x262   :  { %3556 = vmatpush.bf16.msrb.mxu0 %v5961_v52 }
 0x26e   :  { %v3086_v62 = vpop.f32.mrf.mxu2 }
 0x26f   :  { %v3087_v11 = vadd.f32 %v3086_v62, %v3074_v34  ;;  %v5958_v62 = vld [vmem:[#allocation11 + $0x8] sm:$0xff] }
 0x276   :  { %v3088_v1 = vpop.f32.mrf.mxu2 }
 0x277   :  { %v5971_v1 = vld [vmem:[#allocation13 + $0x30] sm:$0xff] }
 0x278   :  { %3637 = vmatpush.bf16.msrb.mxu1 %v5971_v1 }
 0x27c   :  { %3638 = vmatpush.bf16.msrb.mxu1 %v5970_v46 }
 0x27e   :  { %v3138_v36 = vpop.f32.mrf.mxu2 }
 0x27f   :  { %v3139_v49 = vadd.f32 %v3138_v36, %v3126_v53  ;;  %v5960_v53 = vld [vmem:[#allocation11 + $0x18] sm:$0xff]  ;;  %v5969_v36 = vld [vmem:[#allocation13 + $0x20] sm:$0xff] }
 0x280   :  { %3557 = vmatpush.bf16.msrb.mxu0 %v5960_v53  ;;  %3639 = vmatpush.bf16.msrb.mxu1 %v5969_v36 }
 0x284   :  { %3558 = vmatpush.bf16.msrb.mxu0 %v5959_v56 }
 0x286   :  { %v3140_v2 = vpop.f32.mrf.mxu2 }
 0x287   :  { %v5968_v2 = vld [vmem:[#allocation13 + $0x18] sm:$0xff] }
 0x288   :  { %3559 = vmatpush.bf16.msrb.mxu0 %v5958_v62  ;;  %3640 = vmatpush.bf16.msrb.mxu1 %v5968_v2 }
 0x28c   :  { %3560 = vmatpush.bf16.msrb.mxu0 %v5957_v63  ;;  %3641 = vmatpush.bf16.msrb.mxu1 %v5967_v3 }
 0x290   :  { %3642 = vmatpush.bf16.msrb.mxu1 %v5966_v9 }
 0x294   :  { %3643 = vmatpush.bf16.msrb.mxu1 %v5965_v10 }
 0x2ae   :  { %v3099_v50 = vpop.f32.mrf.mxu3 }
 0x2af   :  { %v3100_v13 = vadd.f32 %v3099_v50, %v3087_v11  ;;  %v5979_v11 = vld [vmem:[#allocation14 + $0x30] sm:$0xff]  ;;  %v5978_v50 = vld [vmem:[#allocation14 + $0x28] sm:$0xff] }
 0x2b0   :  { %3720 = vmatpush.bf16.msrb.mxu2 %v5979_v11 }
 0x2b1   :  { %v3155_v33 = vmax.f32 %v3100_v13, 0.0  ;;  %v5977_v13 = vld [vmem:[#allocation14 + $0x20] sm:$0xff] }
 0x2b3   :  { %v3157_v14 = vpack.c.bf16 %v3155_v33, %v3155_v33  ;;  %v5976_v33 = vld [vmem:[#allocation14 + $0x18] sm:$0xff] }
 0x2b4   :  { %3721 = vmatpush.bf16.msrb.mxu2 %v5978_v50 }
 0x2b5   :  { %3299 = vmatmul.bf16.vlgmr.msra.gmra.mxu0 %v3157_v14  ;;  %v5975_v14 = vld [vmem:[#allocation14 + $0x10] sm:$0xff] }
 0x2b6   :  { %v3101_v61 = vpop.f32.mrf.mxu3 }
 0x2b7   :  { %v6001_v61 = vld [vmem:[%s6556_s13] ss:$0 sm:$0xff] }
 0x2b8   :  { %3722 = vmatpush.bf16.msrb.mxu2 %v5977_v13 }
 0x2bc   :  { %3723 = vmatpush.bf16.msrb.mxu2 %v5976_v33 }
 0x2be   :  { %v3151_v17 = vpop.f32.mrf.mxu3 }
 0x2bf   :  { %v3152_v19 = vadd.f32 %v3151_v17, %v3139_v49 }
 0x2c0   :  { %3724 = vmatpush.bf16.msrb.mxu2 %v5975_v14 }
 0x2c1   :  { %v3156_v20 = vmax.f32 %v3152_v19, 0.0 }
 0x2c3   :  { %v3158_v21 = vpack.c.bf16 %v3156_v20, %v3156_v20 }
 0x2c5   :  { %3312 = vmatmul.bf16.vlgmr.msra.gmra.mxu1 %v3158_v21 }
 0x2c6   :  { %v3153_v18 = vpop.f32.mrf.mxu3 }
 0x2c7   :  { %v5974_v18 = vld [vmem:[#allocation14 + $0x8] sm:$0xff] }
 0x2c8   :  { %3725 = vmatpush.bf16.msrb.mxu2 %v5974_v18 }
 0x2cc   :  { %3726 = vmatpush.bf16.msrb.mxu2 %v5973_v22 }
 0x332   :  { %v3300_v41 = vpop.f32.mrf.mxu0 }
 0x333   :  { %v3301_v55 = vadd.f32 %v5998_v38, %v3300_v41  ;;  %v6003_v41 = vld [vmem:[%s6560_s17] ss:$0 sm:$0xff]  ;;  %s3765_s17 = sshll.u32 %s6252_s15, 4  ;;  %s3766_s17 = int_to_ptr.vmem [resolvable:$true] %s3765_s17 }
 0x33a   :  { %v3302_v35 = vpop.f32.mrf.mxu0 }
 0x342   :  { %v3313_v40 = vpop.f32.mrf.mxu1 }
 0x343   :  { %v3314_v48 = vadd.f32 %v3313_v40, %v3301_v55 }
 0x345   :  { %v3317_v43 = vmax.f32 %v3314_v48, 0.0 }
 0x347   :  { %v3318_v57 = vpack.c.bf16 %v3317_v43, %v3317_v43 }
 0x349   :  { %3395 = vmatmul.bf16.vlgmr.msra.gmra.mxu2 %v3318_v57 }
 0x34a   :  { %v3315_v34 = vpop.f32.mrf.mxu1 }
 0x3cc   :  { %v3396_v58 = vpop.f32.mrf.mxu2 }
 0x3cd   :  { %v3397_v25 = vadd.f32 %v5999_v39, %v3396_v58 }
 0x3cf   :  { %v3400_v59 = vmax.f32 %v3397_v25, 0.0 }
 0x3d1   :  { %v3401_v60 = vpack.c.bf16 %v3400_v59, %v3400_v59 }
 0x3d3   :  { %3478 = vmatmul.bf16.vlgmr.msra.gmra.mxu3 %v3401_v60 }
 0x3d4   :  { %v3398_v27 = vpop.f32.mrf.mxu2 }
 0x456   :  { %v3479_v5 = vpop.f32.mrf.mxu3 }
 0x457   :  { %v3480_v6 = vadd.f32 %v6000_v4, %v3479_v5 }
 0x459   :  { %v3483_v42 = vmax.f32 %v3480_v6, 0.0 }
 0x45b   :  { %v3484_v7 = vpack.c.bf16 %v3483_v42, %v3483_v42 }
 0x45d   :  { %3561 = vmatmul.bf16.vlgmr.msrb.gmra.mxu0 %v3484_v7 }
 0x45e   :  { %v3481_v8 = vpop.f32.mrf.mxu3 }
 0x4da   :  { %v3562_v49 = vpop.f32.mrf.mxu0 }
 0x4db   :  { %v3563_v17 = vadd.f32 %v6001_v61, %v3562_v49 }
 0x4dd   :  { %v3566_v19 = vmax.f32 %v3563_v17, 0.0 }
 0x4df   :  { %v3567_v20 = vpack.c.bf16 %v3566_v19, %v3566_v19 }
 0x4e1   :  { %3644 = vmatmul.bf16.vlgmr.msrb.gmra.mxu1 %v3567_v20 }
 0x4e2   :  { %v3564_v21 = vpop.f32.mrf.mxu0 }
 0x55e   :  { %v3645_v24 = vpop.f32.mrf.mxu1 }
 0x55f   :  { %v3646_v15 = vadd.f32 %v6002_v23, %v3645_v24 }
 0x561   :  { %v3649_v26 = vmax.f32 %v3646_v15, 0.0 }
 0x563   :  { %v3650_v28 = vpack.c.bf16 %v3649_v26, %v3649_v26 }
 0x565   :  { %3727 = vmatmul.bf16.vlgmr.msrb.gmra.mxu2 %v3650_v28 }
 0x566   :  { %v3647_v54 = vpop.f32.mrf.mxu1 }
 0x5e8   :  { %v3728_v31 = vpop.f32.mrf.mxu2 }
 0x5e9   :  { %v3729_v32 = vadd.f32 %v6003_v41, %v3728_v31 }
 0x5eb   :  { %v3735_v35 = vsel %vm3734_vm0, %v3729_v32, -1e+30 }
 0x5ec   :  { %3736 = vmax.xlane.f32.xlu0 %v3735_v35 }
 0x5f0   :  { %v3730_v37 = vpop.f32.mrf.mxu2 }
 0x65f   :  { %v3737_v38 = vpop.xlane.xlu0 %3736 }
 0x660   :  { %v3738_v55 = vsub.f32 %v3735_v35, %v3737_v38 }
 0x662   :  { %v3739_v40 = vmul.f32 1.442695, %v3738_v55 }
 0x664   :  { %6004 = vpow2.f32 %v3739_v40 }
 0x66a   :  { %v6005_v48 = vpop.eup %6004 }
 0x66b   :  { %v3741_v43 = vsel %vm3734_vm0, %v6005_v48, 0.0 }
 0x66c   :  { %3742 = vadd.xlane.f32.xlu0 %v3741_v43 }
 0x6df   :  { %v3743_v57 = vpop.xlane.xlu0 %3742 }
 0x6e0   :  { %6006 = vrcp.f32 %v3743_v57  ;;  %v3755_v45 = vand.u32 2147483648, %v3743_v57  ;;  %v3753_v47 = vand.u32 2147483647, %v3743_v57  ;;  %vm3749_vm2 = vweird.f32 %v3743_v57 }
 0x6e2   :  { %v3756_v53 = vor.u32 1.1754944e-38, %v3755_v45  ;;  %vm3754_vm4 = vcmp.eq.f32.partialorder %v3753_v47, 8.507059e+37 }
 0x6e6   :  { %v6007_v34 = vpop.eup %6006 }
 0x6e7   :  { %v3745_v12 = vmul.f32 %v6007_v34, %v3743_v57  ;;  %vm3750_vm1 = vweird.f32 %v6007_v34 }
 0x6e8   :  { %vm3751_vm3 = vmor %vm3749_vm2, %vm3750_vm1 }
 0x6e9   :  { %v3746_v44 = vsub.f32 1.0, %v3745_v12 }
 0x6eb   :  { %v3747_v16 = vmul.f32 %v6007_v34, %v3746_v44 }
 0x6ed   :  { %v3748_v52 = vadd.f32 %v6007_v34, %v3747_v16 }
 0x6ef   :  { %v3752_v56 = vsel %vm3751_vm3, %v6007_v34, %v3748_v52 }
 0x6f0   :  { %v3757_v39 = vsel %vm3754_vm4, %v3756_v53, %v3752_v56 }
 0x6f1   :  { %v3758_v58 = vmul.f32 %v3757_v39, %v3741_v43 }
 0x6f3   :  { %3759 = vst [vmem:[#allocation16] sm:$0xff] %v3758_v58 }
 0x6f4   :  { %3770 = dma.vmem_to_hbm [thread:$0]  %s3766_s17, 128, %s3768_s29, [#allocation4]  }
 0x6f5   :  { %6234 = dma.done.wait [#allocation4], 128  }
 0x6f6   :  { %6235 = vsyncadd [#allocation4], 4294967168 }
 0x6f7   :  { %3775 = vsyncpa [#allocation3], 1 }
 0x6f8   :  { %3776 = vsyncpa [#allocation6], 1 }
 0x6f9   :  { %3777 = vsyncpa [#allocation9], 1 }
 0x6fa   :  { %3778 = vsyncpa [#allocation12], 1 }
 0x6fb   :  { %3779 = vsyncpa [#allocation15], 1 }
 0x6fc   :  { %3780 = vsyncpa [#allocation4], 1 }

</bundles_post_ra>
